<compile_context>
chip_gen: v7x
topology: tpu7x:2x2x1
jax: 0.10.0
libtpu: 0.0.40
codegen_flags: <defaults>
</compile_context>

<pallas_src>
import jax
import jax.numpy as jnp
from jax import lax
from jax.experimental import pallas as pl
from jax.experimental.pallas import tpu as pltpu


def _round_up(x, m):
    return ((x + m - 1) // m) * m


def _blockdiag(a, b):
    m, n = a.shape
    p, q = b.shape
    out = jnp.zeros((m + p, n + q), jnp.float32)
    return out.at[:m, :n].set(a).at[m:, n:].set(b)


# ---------------------------------------------------------------------------
# Fused kernel: dual-LSTM recurrence + interleaved reshape + fc1->ReLU->(fc2∘fc3)
# ---------------------------------------------------------------------------
def _fused_lstm_head_kernel(x_ref, h0_ref, c0_ref, wih_ref, whh_ref, bih_ref,
                            w1_ref, b1_ref, w23_ref, b23_ref, out_ref, xp_ref):
    T, R, twoI = x_ref.shape
    SW = h0_ref.shape[1]          # packed state width  (= 4*H = 128)
    GW = whh_ref.shape[1]         # packed gate width   (= 4*SW = 512)

    whh = whh_ref[...]            # recurrent weight, read once (VMEM resident)

    # ---- input projection for ALL timesteps in one MXU pass (bias folded in),
    #      hoisted off the serial recurrence chain ----
    x_flat = x_ref[...].reshape(T * R, twoI)
    xp = (jnp.dot(x_flat, wih_ref[...], preferred_element_type=jnp.float32)
          + bih_ref[...])
    xp_ref[...] = xp.reshape(T, R, GW)

    # ---- hoisted activation selectors: gates laid out [i | f | g | o], each SW
    #      lanes.  sigmoid(z) = 0.5*tanh(0.5*z) + 0.5, so ONE full-width tanh per
    #      step serves both the sigmoid gates and the tanh (g) gate. ----
    lane = lax.broadcasted_iota(jnp.int32, (R, GW), 1)
    is_g = jnp.logical_and(lane >= 2 * SW, lane < 3 * SW)
    scale = jnp.where(is_g, 1.0, 0.5).astype(jnp.float32)
    shift = jnp.where(is_g, 0.0, 0.5).astype(jnp.float32)

    def step(t, carry):
        h, c = carry
        z = xp_ref[t] + jnp.dot(h, whh, preferred_element_type=jnp.float32)
        a = jnp.tanh(z * scale) * scale + shift
        i = a[:, 0 * SW:1 * SW]
        f = a[:, 1 * SW:2 * SW]
        g = a[:, 2 * SW:3 * SW]
        o = a[:, 3 * SW:4 * SW]
        c_new = f * c + i * g
        h_new = o * jnp.tanh(c_new)
        return h_new, c_new

    h, _ = lax.fori_loop(0, T, step, (h0_ref[...], c0_ref[...]), unroll=True)

    # ---- fused head: the two halves of the torch-style interleaved reshape are
    #      the two column halves of h, so fc1 / (fc2∘fc3) run as block-diagonal
    #      matmuls producing a lane-dense (R, 2*NP) output slab ----
    a1 = jnp.dot(h, w1_ref[...], preferred_element_type=jnp.float32) + b1_ref[...]
    a1 = jnp.maximum(a1, 0.0)
    out_ref[...] = (jnp.dot(a1, w23_ref[...], preferred_element_type=jnp.float32)
                    + b23_ref[...])


# ---------------------------------------------------------------------------
# One-time weight packing (wrapper side, off the hot path)
# ---------------------------------------------------------------------------
def pack_params(params, states, *, num_layers=1):
    assert num_layers == 1  # TODO(synk): stacked LSTM not implemented.
    (wih1, whh1, b1, wih2, whh2, b2,
     w_fc1, b_fc1, w_fc2, b_fc2, w_fc3, b_fc3) = params
    h01, c01, h02, c02 = states

    I, H4 = wih1.shape
    H = H4 // 4
    B = h01.shape[0]
    assert B % 2 == 0, "interleaved reshape requires an even batch"
    R = B // 2
    SW = 4 * H          # [h1_even | h1_odd | h2_even | h2_odd]
    GW = 4 * SW         # [i | f | g | o], each SW wide

    grp_whh = (whh1, whh1, whh2, whh2)      # groups: 1e, 1o, 2e, 2o
    grp_wih = (wih1, wih1, wih2, wih2)
    grp_b = (b1, b1, b2, b2)
    grp_xoff = (0, I, 0, I)                 # even vs odd x columns in x_super

    Wih = jnp.zeros((2 * I, GW), jnp.float32)
    Whh = jnp.zeros((SW, GW), jnp.float32)
    bias = jnp.zeros((1, GW), jnp.float32)
    for gate in range(4):
        for grp in range(4):
            col = gate * SW + grp * H
            src = slice(gate * H, (gate + 1) * H)
            Whh = Whh.at[grp * H:(grp + 1) * H, col:col + H].set(grp_whh[grp][:, src])
            Wih = Wih.at[grp_xoff[grp]:grp_xoff[grp] + I,
                         col:col + H].set(grp_wih[grp][:, src])
            bias = bias.at[:, col:col + H].set(grp_b[grp][:, src])

    # Head: fc1 block-diagonal (applied to both column halves), fc2∘fc3 folded,
    # fc3 output zero-padded to a 128-lane-dense slab.
    pred_len = w_fc3.shape[1]
    np_pad = max(128, _round_up(pred_len, 128))
    HIGH = lax.Precision.HIGHEST
    w23 = jnp.dot(w_fc2, w_fc3, precision=HIGH)                  # (2H, pred_len)
    b23 = jnp.dot(b_fc2, w_fc3, precision=HIGH) + b_fc3          # (1, pred_len)
    w23p = jnp.zeros((w23.shape[0], np_pad), jnp.float32).at[:, :pred_len].set(w23)
    b23p = jnp.zeros((1, np_pad), jnp.float32).at[:, :pred_len].set(b23)

    w1_dbl = _blockdiag(w_fc1, w_fc1)                            # (4H, 4H)
    b1_dbl = jnp.concatenate([b_fc1, b_fc1], axis=1)             # (1, 4H)
    w23_dbl = _blockdiag(w23p, w23p)                             # (4H, 2*np_pad)
    b23_dbl = jnp.concatenate([b23p, b23p], axis=1)              # (1, 2*np_pad)

    # Initial states in super-batch layout: row j = states of batch (2j, 2j+1).
    h0 = jnp.concatenate([h01.reshape(R, 2 * H), h02.reshape(R, 2 * H)], axis=1)
    c0 = jnp.concatenate([c01.reshape(R, 2 * H), c02.reshape(R, 2 * H)], axis=1)

    return (Wih, Whh, bias, w1_dbl, b1_dbl, w23_dbl, b23_dbl, h0, c0,
            np_pad, pred_len)


# ---------------------------------------------------------------------------
# Forward
# ---------------------------------------------------------------------------
def multichannel_lstm_forward(x, packed, *, num_row_tiles=1):
    (wih_p, whh_p, bias_p, w1_p, b1_p, w23_p, b23_p,
     h0_p, c0_p, np_pad, pred_len) = packed

    x = jnp.asarray(x, jnp.float32)
    B, T, I = x.shape
    assert B % 2 == 0
    R = B // 2
    SW = h0_p.shape[1]
    GW = whh_p.shape[1]
    D1x2 = w1_p.shape[1]
    NPx2 = w23_p.shape[1]

    # Super-batch input: (T, R, 2I), row j = [x[t, 2j] | x[t, 2j+1]].
    x_s = jnp.transpose(x, (1, 0, 2)).reshape(T, R, 2 * I)

    # num_row_tiles=2 on v7x shards the parallel axis across both TensorCores.
    assert R % num_row_tiles == 0
    TR = R // num_row_tiles
    if num_row_tiles > 1:
        assert TR % 8 == 0
    grid = (num_row_tiles,)

    row_map = lambda i: (i, 0)
    const_map = lambda i: (0, 0)

    flops = int(2 * T * R * (2 * I) * GW + T * 2 * R * SW * GW
                + 2 * R * (SW * D1x2 + D1x2 * NPx2))
    transcendentals = int(T * R * (GW + SW))
    bytes_accessed = int(4 * (T * R * 2 * I + 2 * R * SW + 2 * I * GW + SW * GW + GW
                              + SW * D1x2 + D1x2 + D1x2 * NPx2 + NPx2 + R * NPx2))

    out_slab = pl.pallas_call(
        _fused_lstm_head_kernel,
        out_shape=jax.ShapeDtypeStruct((R, NPx2), jnp.float32),
        grid=grid,
        in_specs=[
            pl.BlockSpec((T, TR, 2 * I), lambda i: (0, i, 0)),   # x (time-major)
            pl.BlockSpec((TR, SW), row_map),                     # h0 (packed)
            pl.BlockSpec((TR, SW), row_map),                     # c0 (packed)
            pl.BlockSpec((2 * I, GW), const_map),                # Wih (packed)
            pl.BlockSpec((SW, GW), const_map),                   # Whh (block-diag)
            pl.BlockSpec((1, GW), const_map),                    # bias (packed)
            pl.BlockSpec((SW, D1x2), const_map),                 # fc1 (block-diag)
            pl.BlockSpec((1, D1x2), const_map),
            pl.BlockSpec((D1x2, NPx2), const_map),               # fc2∘fc3 (block-diag, padded)
            pl.BlockSpec((1, NPx2), const_map),
        ],
        out_specs=pl.BlockSpec((TR, NPx2), row_map),
        scratch_shapes=[pltpu.VMEM((T, TR, GW), jnp.float32)],   # hoisted x-projection
        compiler_params=pltpu.CompilerParams(
            dimension_semantics=("parallel",)),
        cost_estimate=pl.CostEstimate(flops=flops,
                                      transcendentals=transcendentals,
                                      bytes_accessed=bytes_accessed),
    )(x_s, h0_p, c0_p, wih_p, whh_p, bias_p, w1_p, b1_p, w23_p, b23_p)

    # Un-fold: cols [0:pred_len] are output rows 0..R-1 (lstm1 pairs),
    # cols [np_pad:np_pad+pred_len] are rows R..B-1 (lstm2 pairs).
    return jnp.concatenate([out_slab[:, :pred_len],
                            out_slab[:, np_pad:np_pad + pred_len]], axis=0)


# ---------------------------------------------------------------------------
# Parameter / state initialization (PyTorch-style uniform; weights stored
# pre-transposed as (in, out); LSTM b_ih + b_hh pre-combined; gate order i,f,g,o)
# ---------------------------------------------------------------------------
def init_params(key, input_size, hidden_size, pred_len, num_layers=1):
    H = hidden_size

    def uni(k, shape, bound):
        return jax.random.uniform(k, shape, jnp.float32, -bound, bound)

    def lstm(k):
        kih, khh, kbi, kbh = jax.random.split(k, 4)
        bound = 1.0 / jnp.sqrt(jnp.float32(H))
        wih = uni(kih, (input_size, 4 * H), bound)
        whh = uni(khh, (H, 4 * H), bound)
        b = uni(kbi, (1, 4 * H), bound) + uni(kbh, (1, 4 * H), bound)
        return wih, whh, b

    def linear(k, fan_in, fan_out):
        kw, kb = jax.random.split(k)
        bound = 1.0 / jnp.sqrt(jnp.float32(fan_in))
        return uni(kw, (fan_in, fan_out), bound), uni(kb, (1, fan_out), bound)

    k1, k2, k3, k4, k5 = jax.random.split(key, 5)
    wih1, whh1, b1 = lstm(k1)
    wih2, whh2, b2 = lstm(k2)
    w_fc1, b_fc1 = linear(k3, 2 * H * num_layers, 2 * H)
    w_fc2, b_fc2 = linear(k4, 2 * H, H)
    w_fc3, b_fc3 = linear(k5, H, pred_len)
    return (wih1, whh1, b1, wih2, whh2, b2,
            w_fc1, b_fc1, w_fc2, b_fc2, w_fc3, b_fc3)


def init_states(key, batch, hidden_size):
    # Mimics xavier_uniform_ on the module's (num_layers, 64, H) state buffers.
    bound = jnp.sqrt(6.0 / jnp.float32(batch * hidden_size + hidden_size))
    ks = jax.random.split(key, 4)
    return tuple(jax.random.uniform(k, (batch, hidden_size), jnp.float32,
                                    -bound, bound) for k in ks)


def _sigmoid(z):
    return 1.0 / (1.0 + jnp.exp(-z))


# ---------------------------------------------------------------------------
# Demo + pure-JAX reference check
# ---------------------------------------------------------------------------
if __name__ == "__main__":
    hist_len = 8
    pred_len = 4
    input_size = 4
    hidden_size = 32
    num_layers = 1
    batch = 64          # the module's h_1/c_1/h_2/c_2 buffers are sized for batch 64

    key = jax.random.PRNGKey(0)
    kx, kp, ks = jax.random.split(key, 3)

    x = jax.random.normal(kx, (batch, hist_len, input_size), jnp.float32)
    params = init_params(kp, input_size, hidden_size, pred_len, num_layers)
    states = init_states(ks, batch, hidden_size)

    packed = pack_params(params, states, num_layers=num_layers)
    out = multichannel_lstm_forward(x, packed, num_row_tiles=1)
    out = jax.block_until_ready(out)
    assert out.shape == (batch, pred_len)

    # ---- pure-JAX reference (f32, highest matmul precision) ----
    HIGH = jax.lax.Precision.HIGHEST

    def lstm_ref(xx, h0, c0, wih, whh, b):
        H = h0.shape[-1]
        h, c = h0, c0
        for t in range(xx.shape[1]):
            g = (jnp.dot(xx[:, t, :], wih, precision=HIGH)
                 + jnp.dot(h, whh, precision=HIGH) + b)
            i = _sigmoid(g[:, 0 * H:1 * H])
            f = _sigmoid(g[:, 1 * H:2 * H])
            gg = jnp.tanh(g[:, 2 * H:3 * H])
            o = _sigmoid(g[:, 3 * H:4 * H])
            c = f * c + i * gg
            h = o * jnp.tanh(c)
        return h

    (wih1, whh1, b1, wih2, whh2, b2,
     w_fc1, b_fc1, w_fc2, b_fc2, w_fc3, b_fc3) = params
    h01, c01, h02, c02 = states

    h1_ref = lstm_ref(x, h01, c01, wih1, whh1, b1)
    h2_ref = lstm_ref(x, h02, c02, wih2, whh2, b2)
    h_view_ref = jnp.concatenate([h1_ref[None], h2_ref[None]], axis=0).reshape(
        -1, 2 * num_layers * hidden_size)
    a = jnp.maximum(jnp.dot(h_view_ref, w_fc1, precision=HIGH) + b_fc1, 0.0)
    a = jnp.dot(a, w_fc2, precision=HIGH) + b_fc2
    ref = jnp.dot(a, w_fc3, precision=HIGH) + b_fc3

    assert jnp.allclose(out, ref, atol=2e-2, rtol=2e-2), (
        float(jnp.max(jnp.abs(out - ref))))

    print("KERNEL_OK")
</pallas_src>

<mosaic_0001>
module attributes {stable_mosaic.version = 11 : i64} {
  func.func @_fused_lstm_head_kernel(%arg0: i32, %arg1: memref<8x32x8xf32, #tpu.memory_space<vmem>>, %arg2: memref<32x128xf32, #tpu.memory_space<vmem>>, %arg3: memref<32x128xf32, #tpu.memory_space<vmem>>, %arg4: memref<8x512xf32, #tpu.memory_space<vmem>>, %arg5: memref<128x512xf32, #tpu.memory_space<vmem>>, %arg6: memref<1x512xf32, #tpu.memory_space<vmem>>, %arg7: memref<128x128xf32, #tpu.memory_space<vmem>>, %arg8: memref<1x128xf32, #tpu.memory_space<vmem>>, %arg9: memref<128x256xf32, #tpu.memory_space<vmem>>, %arg10: memref<1x256xf32, #tpu.memory_space<vmem>>, %arg11: memref<32x256xf32, #tpu.memory_space<vmem>>, %arg12: memref<8x32x512xf32, #tpu.memory_space<vmem>>) attributes {dimension_semantics = [#tpu.dimension_semantics<parallel>], iteration_bounds = array<i64: 1>, scalar_prefetch = 0 : i64, scratch_operands = 1 : i64, tpu.core_type = #tpu.core_type<tc>, window_params = [{transform_indices = @transform_0, window_bounds = array<i64: 8, 32, 8>}, {transform_indices = @transform_1, window_bounds = array<i64: 32, 128>}, {transform_indices = @transform_2, window_bounds = array<i64: 32, 128>}, {pipeline_mode = #tpu.pipeline_mode<synchronous>, transform_indices = @transform_3, window_bounds = array<i64: 8, 512>}, {pipeline_mode = #tpu.pipeline_mode<synchronous>, transform_indices = @transform_4, window_bounds = array<i64: 128, 512>}, {pipeline_mode = #tpu.pipeline_mode<synchronous>, transform_indices = @transform_5, window_bounds = array<i64: 1, 512>}, {pipeline_mode = #tpu.pipeline_mode<synchronous>, transform_indices = @transform_6, window_bounds = array<i64: 128, 128>}, {pipeline_mode = #tpu.pipeline_mode<synchronous>, transform_indices = @transform_7, window_bounds = array<i64: 1, 128>}, {pipeline_mode = #tpu.pipeline_mode<synchronous>, transform_indices = @transform_8, window_bounds = array<i64: 128, 256>}, {pipeline_mode = #tpu.pipeline_mode<synchronous>, transform_indices = @transform_9, window_bounds = array<i64: 1, 256>}, {transform_indices = @transform_10, window_bounds = array<i64: 32, 256>}]} {
    %c0 = arith.constant 0 : index
    %c0_0 = arith.constant 0 : index
    %0 = vector.load %arg5[%c0, %c0_0] : memref<128x512xf32, #tpu.memory_space<vmem>>, vector<128x512xf32>
    %c0_1 = arith.constant 0 : index
    %c0_2 = arith.constant 0 : index
    %c0_3 = arith.constant 0 : index
    %1 = vector.load %arg1[%c0_1, %c0_2, %c0_3] : memref<8x32x8xf32, #tpu.memory_space<vmem>>, vector<8x32x8xf32>
    %2 = vector.shape_cast %1 : vector<8x32x8xf32> to vector<256x8xf32>
    %c0_4 = arith.constant 0 : index
    %c0_5 = arith.constant 0 : index
    %3 = vector.load %arg4[%c0_4, %c0_5] : memref<8x512xf32, #tpu.memory_space<vmem>>, vector<8x512xf32>
    %cst = arith.constant dense<0.000000e+00> : vector<256x512xf32>
    %4 = tpu.matmul %2, %3, %cst {dimension_numbers = #tpu.dot_dimension_numbers<[1], [0], [0], [1], [0, 0, 1, 1], [], []>} : vector<256x8xf32>, vector<8x512xf32>, vector<256x512xf32> -> vector<256x512xf32>
    %c0_6 = arith.constant 0 : index
    %c0_7 = arith.constant 0 : index
    %5 = vector.load %arg6[%c0_6, %c0_7] : memref<1x512xf32, #tpu.memory_space<vmem>>, vector<1x512xf32>
    %6 = vector.broadcast %5 : vector<1x512xf32> to vector<256x512xf32>
    %7 = arith.addf %4, %6 : vector<256x512xf32>
    %8 = vector.shape_cast %7 : vector<256x512xf32> to vector<8x32x512xf32>
    %c0_8 = arith.constant 0 : index
    %c0_9 = arith.constant 0 : index
    %c0_10 = arith.constant 0 : index
    %9 = vector.load %arg12[%c0_8, %c0_9, %c0_10] : memref<8x32x512xf32, #tpu.memory_space<vmem>>, vector<8x32x512xf32>
    tpu.vector_store %arg12[%c0_8, %c0_9, %c0_10], %8 {strides = array<i32>} : memref<8x32x512xf32, #tpu.memory_space<vmem>>, vector<8x32x512xf32>,
    %10 = tpu.iota {dimensions = array<i32: 1>} : vector<32x512xi32>
    %c256_i32 = arith.constant 256 : i32
    %11 = vector.broadcast %c256_i32 : i32 to vector<32x512xi32>
    %12 = arith.cmpi sge, %10, %11 : vector<32x512xi32>
    %c384_i32 = arith.constant 384 : i32
    %13 = vector.broadcast %c384_i32 : i32 to vector<32x512xi32>
    %14 = arith.cmpi slt, %10, %13 : vector<32x512xi32>
    %15 = arith.andi %12, %14 : vector<32x512xi1>
    %cst_11 = arith.constant 1.000000e+00 : f32
    %cst_12 = arith.constant 5.000000e-01 : f32
    %16 = vector.broadcast %cst_11 : f32 to vector<32x512xf32>
    %17 = vector.broadcast %cst_12 : f32 to vector<32x512xf32>
    %18 = arith.select %15, %16, %17 : vector<32x512xi1>, vector<32x512xf32>
    %cst_13 = arith.constant 0.000000e+00 : f32
    %cst_14 = arith.constant 5.000000e-01 : f32
    %19 = vector.broadcast %cst_13 : f32 to vector<32x512xf32>
    %20 = vector.broadcast %cst_14 : f32 to vector<32x512xf32>
    %21 = arith.select %15, %19, %20 : vector<32x512xi1>, vector<32x512xf32>
    %c0_15 = arith.constant 0 : index
    %c0_16 = arith.constant 0 : index
    %22 = vector.load %arg2[%c0_15, %c0_16] : memref<32x128xf32, #tpu.memory_space<vmem>>, vector<32x128xf32>
    %c0_17 = arith.constant 0 : index
    %c0_18 = arith.constant 0 : index
    %23 = vector.load %arg3[%c0_17, %c0_18] : memref<32x128xf32, #tpu.memory_space<vmem>>, vector<32x128xf32>
    %c0_i32 = arith.constant 0 : i32
    %24 = arith.index_cast %c0_i32 : i32 to index
    %c0_19 = arith.constant 0 : index
    %c0_20 = arith.constant 0 : index
    %25 = vector.load %arg12[%24, %c0_19, %c0_20] : memref<8x32x512xf32, #tpu.memory_space<vmem>>, vector<1x32x512xf32>
    %26 = vector.shape_cast %25 : vector<1x32x512xf32> to vector<32x512xf32>
    %cst_21 = arith.constant dense<0.000000e+00> : vector<32x512xf32>
    %27 = tpu.matmul %22, %0, %cst_21 {dimension_numbers = #tpu.dot_dimension_numbers<[1], [0], [0], [1], [0, 0, 1, 1], [], []>} : vector<32x128xf32>, vector<128x512xf32>, vector<32x512xf32> -> vector<32x512xf32>
    %28 = arith.addf %26, %27 : vector<32x512xf32>
    %29 = arith.mulf %28, %18 : vector<32x512xf32>
    %30 = math.tanh %29 : vector<32x512xf32>
    %31 = arith.mulf %30, %18 : vector<32x512xf32>
    %32 = arith.addf %31, %21 : vector<32x512xf32>
    %33 = vector.extract_strided_slice %32 {offsets = [0, 0], sizes = [32, 128], strides = [1, 1]} : vector<32x512xf32> to vector<32x128xf32>
    %34 = vector.extract_strided_slice %32 {offsets = [0, 128], sizes = [32, 128], strides = [1, 1]} : vector<32x512xf32> to vector<32x128xf32>
    %35 = vector.extract_strided_slice %32 {offsets = [0, 256], sizes = [32, 128], strides = [1, 1]} : vector<32x512xf32> to vector<32x128xf32>
    %36 = vector.extract_strided_slice %32 {offsets = [0, 384], sizes = [32, 128], strides = [1, 1]} : vector<32x512xf32> to vector<32x128xf32>
    %37 = arith.mulf %34, %23 : vector<32x128xf32>
    %38 = arith.mulf %33, %35 : vector<32x128xf32>
    %39 = arith.addf %37, %38 : vector<32x128xf32>
    %40 = math.tanh %39 : vector<32x128xf32>
    %41 = arith.mulf %36, %40 : vector<32x128xf32>
    %c1_i32 = arith.constant 1 : i32
    %42 = arith.index_cast %c1_i32 : i32 to index
    %c0_22 = arith.constant 0 : index
    %c0_23 = arith.constant 0 : index
    %43 = vector.load %arg12[%42, %c0_22, %c0_23] : memref<8x32x512xf32, #tpu.memory_space<vmem>>, vector<1x32x512xf32>
    %44 = vector.shape_cast %43 : vector<1x32x512xf32> to vector<32x512xf32>
    %cst_24 = arith.constant dense<0.000000e+00> : vector<32x512xf32>
    %45 = tpu.matmul %41, %0, %cst_24 {dimension_numbers = #tpu.dot_dimension_numbers<[1], [0], [0], [1], [0, 0, 1, 1], [], []>} : vector<32x128xf32>, vector<128x512xf32>, vector<32x512xf32> -> vector<32x512xf32>
    %46 = arith.addf %44, %45 : vector<32x512xf32>
    %47 = arith.mulf %46, %18 : vector<32x512xf32>
    %48 = math.tanh %47 : vector<32x512xf32>
    %49 = arith.mulf %48, %18 : vector<32x512xf32>
    %50 = arith.addf %49, %21 : vector<32x512xf32>
    %51 = vector.extract_strided_slice %50 {offsets = [0, 0], sizes = [32, 128], strides = [1, 1]} : vector<32x512xf32> to vector<32x128xf32>
    %52 = vector.extract_strided_slice %50 {offsets = [0, 128], sizes = [32, 128], strides = [1, 1]} : vector<32x512xf32> to vector<32x128xf32>
    %53 = vector.extract_strided_slice %50 {offsets = [0, 256], sizes = [32, 128], strides = [1, 1]} : vector<32x512xf32> to vector<32x128xf32>
    %54 = vector.extract_strided_slice %50 {offsets = [0, 384], sizes = [32, 128], strides = [1, 1]} : vector<32x512xf32> to vector<32x128xf32>
    %55 = arith.mulf %52, %39 : vector<32x128xf32>
    %56 = arith.mulf %51, %53 : vector<32x128xf32>
    %57 = arith.addf %55, %56 : vector<32x128xf32>
    %58 = math.tanh %57 : vector<32x128xf32>
    %59 = arith.mulf %54, %58 : vector<32x128xf32>
    %c2_i32 = arith.constant 2 : i32
    %60 = arith.index_cast %c2_i32 : i32 to index
    %c0_25 = arith.constant 0 : index
    %c0_26 = arith.constant 0 : index
    %61 = vector.load %arg12[%60, %c0_25, %c0_26] : memref<8x32x512xf32, #tpu.memory_space<vmem>>, vector<1x32x512xf32>
    %62 = vector.shape_cast %61 : vector<1x32x512xf32> to vector<32x512xf32>
    %cst_27 = arith.constant dense<0.000000e+00> : vector<32x512xf32>
    %63 = tpu.matmul %59, %0, %cst_27 {dimension_numbers = #tpu.dot_dimension_numbers<[1], [0], [0], [1], [0, 0, 1, 1], [], []>} : vector<32x128xf32>, vector<128x512xf32>, vector<32x512xf32> -> vector<32x512xf32>
    %64 = arith.addf %62, %63 : vector<32x512xf32>
    %65 = arith.mulf %64, %18 : vector<32x512xf32>
    %66 = math.tanh %65 : vector<32x512xf32>
    %67 = arith.mulf %66, %18 : vector<32x512xf32>
    %68 = arith.addf %67, %21 : vector<32x512xf32>
    %69 = vector.extract_strided_slice %68 {offsets = [0, 0], sizes = [32, 128], strides = [1, 1]} : vector<32x512xf32> to vector<32x128xf32>
    %70 = vector.extract_strided_slice %68 {offsets = [0, 128], sizes = [32, 128], strides = [1, 1]} : vector<32x512xf32> to vector<32x128xf32>
    %71 = vector.extract_strided_slice %68 {offsets = [0, 256], sizes = [32, 128], strides = [1, 1]} : vector<32x512xf32> to vector<32x128xf32>
    %72 = vector.extract_strided_slice %68 {offsets = [0, 384], sizes = [32, 128], strides = [1, 1]} : vector<32x512xf32> to vector<32x128xf32>
    %73 = arith.mulf %70, %57 : vector<32x128xf32>
    %74 = arith.mulf %69, %71 : vector<32x128xf32>
    %75 = arith.addf %73, %74 : vector<32x128xf32>
    %76 = math.tanh %75 : vector<32x128xf32>
    %77 = arith.mulf %72, %76 : vector<32x128xf32>
    %c3_i32 = arith.constant 3 : i32
    %78 = arith.index_cast %c3_i32 : i32 to index
    %c0_28 = arith.constant 0 : index
    %c0_29 = arith.constant 0 : index
    %79 = vector.load %arg12[%78, %c0_28, %c0_29] : memref<8x32x512xf32, #tpu.memory_space<vmem>>, vector<1x32x512xf32>
    %80 = vector.shape_cast %79 : vector<1x32x512xf32> to vector<32x512xf32>
    %cst_30 = arith.constant dense<0.000000e+00> : vector<32x512xf32>
    %81 = tpu.matmul %77, %0, %cst_30 {dimension_numbers = #tpu.dot_dimension_numbers<[1], [0], [0], [1], [0, 0, 1, 1], [], []>} : vector<32x128xf32>, vector<128x512xf32>, vector<32x512xf32> -> vector<32x512xf32>
    %82 = arith.addf %80, %81 : vector<32x512xf32>
    %83 = arith.mulf %82, %18 : vector<32x512xf32>
    %84 = math.tanh %83 : vector<32x512xf32>
    %85 = arith.mulf %84, %18 : vector<32x512xf32>
    %86 = arith.addf %85, %21 : vector<32x512xf32>
    %87 = vector.extract_strided_slice %86 {offsets = [0, 0], sizes = [32, 128], strides = [1, 1]} : vector<32x512xf32> to vector<32x128xf32>
    %88 = vector.extract_strided_slice %86 {offsets = [0, 128], sizes = [32, 128], strides = [1, 1]} : vector<32x512xf32> to vector<32x128xf32>
    %89 = vector.extract_strided_slice %86 {offsets = [0, 256], sizes = [32, 128], strides = [1, 1]} : vector<32x512xf32> to vector<32x128xf32>
    %90 = vector.extract_strided_slice %86 {offsets = [0, 384], sizes = [32, 128], strides = [1, 1]} : vector<32x512xf32> to vector<32x128xf32>
    %91 = arith.mulf %88, %75 : vector<32x128xf32>
    %92 = arith.mulf %87, %89 : vector<32x128xf32>
    %93 = arith.addf %91, %92 : vector<32x128xf32>
    %94 = math.tanh %93 : vector<32x128xf32>
    %95 = arith.mulf %90, %94 : vector<32x128xf32>
    %c4_i32 = arith.constant 4 : i32
    %96 = arith.index_cast %c4_i32 : i32 to index
    %c0_31 = arith.constant 0 : index
    %c0_32 = arith.constant 0 : index
    %97 = vector.load %arg12[%96, %c0_31, %c0_32] : memref<8x32x512xf32, #tpu.memory_space<vmem>>, vector<1x32x512xf32>
    %98 = vector.shape_cast %97 : vector<1x32x512xf32> to vector<32x512xf32>
    %cst_33 = arith.constant dense<0.000000e+00> : vector<32x512xf32>
    %99 = tpu.matmul %95, %0, %cst_33 {dimension_numbers = #tpu.dot_dimension_numbers<[1], [0], [0], [1], [0, 0, 1, 1], [], []>} : vector<32x128xf32>, vector<128x512xf32>, vector<32x512xf32> -> vector<32x512xf32>
    %100 = arith.addf %98, %99 : vector<32x512xf32>
    %101 = arith.mulf %100, %18 : vector<32x512xf32>
    %102 = math.tanh %101 : vector<32x512xf32>
    %103 = arith.mulf %102, %18 : vector<32x512xf32>
    %104 = arith.addf %103, %21 : vector<32x512xf32>
    %105 = vector.extract_strided_slice %104 {offsets = [0, 0], sizes = [32, 128], strides = [1, 1]} : vector<32x512xf32> to vector<32x128xf32>
    %106 = vector.extract_strided_slice %104 {offsets = [0, 128], sizes = [32, 128], strides = [1, 1]} : vector<32x512xf32> to vector<32x128xf32>
    %107 = vector.extract_strided_slice %104 {offsets = [0, 256], sizes = [32, 128], strides = [1, 1]} : vector<32x512xf32> to vector<32x128xf32>
    %108 = vector.extract_strided_slice %104 {offsets = [0, 384], sizes = [32, 128], strides = [1, 1]} : vector<32x512xf32> to vector<32x128xf32>
    %109 = arith.mulf %106, %93 : vector<32x128xf32>
    %110 = arith.mulf %105, %107 : vector<32x128xf32>
    %111 = arith.addf %109, %110 : vector<32x128xf32>
    %112 = math.tanh %111 : vector<32x128xf32>
    %113 = arith.mulf %108, %112 : vector<32x128xf32>
    %c5_i32 = arith.constant 5 : i32
    %114 = arith.index_cast %c5_i32 : i32 to index
    %c0_34 = arith.constant 0 : index
    %c0_35 = arith.constant 0 : index
    %115 = vector.load %arg12[%114, %c0_34, %c0_35] : memref<8x32x512xf32, #tpu.memory_space<vmem>>, vector<1x32x512xf32>
    %116 = vector.shape_cast %115 : vector<1x32x512xf32> to vector<32x512xf32>
    %cst_36 = arith.constant dense<0.000000e+00> : vector<32x512xf32>
    %117 = tpu.matmul %113, %0, %cst_36 {dimension_numbers = #tpu.dot_dimension_numbers<[1], [0], [0], [1], [0, 0, 1, 1], [], []>} : vector<32x128xf32>, vector<128x512xf32>, vector<32x512xf32> -> vector<32x512xf32>
    %118 = arith.addf %116, %117 : vector<32x512xf32>
    %119 = arith.mulf %118, %18 : vector<32x512xf32>
    %120 = math.tanh %119 : vector<32x512xf32>
    %121 = arith.mulf %120, %18 : vector<32x512xf32>
    %122 = arith.addf %121, %21 : vector<32x512xf32>
    %123 = vector.extract_strided_slice %122 {offsets = [0, 0], sizes = [32, 128], strides = [1, 1]} : vector<32x512xf32> to vector<32x128xf32>
    %124 = vector.extract_strided_slice %122 {offsets = [0, 128], sizes = [32, 128], strides = [1, 1]} : vector<32x512xf32> to vector<32x128xf32>
    %125 = vector.extract_strided_slice %122 {offsets = [0, 256], sizes = [32, 128], strides = [1, 1]} : vector<32x512xf32> to vector<32x128xf32>
    %126 = vector.extract_strided_slice %122 {offsets = [0, 384], sizes = [32, 128], strides = [1, 1]} : vector<32x512xf32> to vector<32x128xf32>
    %127 = arith.mulf %124, %111 : vector<32x128xf32>
    %128 = arith.mulf %123, %125 : vector<32x128xf32>
    %129 = arith.addf %127, %128 : vector<32x128xf32>
    %130 = math.tanh %129 : vector<32x128xf32>
    %131 = arith.mulf %126, %130 : vector<32x128xf32>
    %c6_i32 = arith.constant 6 : i32
    %132 = arith.index_cast %c6_i32 : i32 to index
    %c0_37 = arith.constant 0 : index
    %c0_38 = arith.constant 0 : index
    %133 = vector.load %arg12[%132, %c0_37, %c0_38] : memref<8x32x512xf32, #tpu.memory_space<vmem>>, vector<1x32x512xf32>
    %134 = vector.shape_cast %133 : vector<1x32x512xf32> to vector<32x512xf32>
    %cst_39 = arith.constant dense<0.000000e+00> : vector<32x512xf32>
    %135 = tpu.matmul %131, %0, %cst_39 {dimension_numbers = #tpu.dot_dimension_numbers<[1], [0], [0], [1], [0, 0, 1, 1], [], []>} : vector<32x128xf32>, vector<128x512xf32>, vector<32x512xf32> -> vector<32x512xf32>
    %136 = arith.addf %134, %135 : vector<32x512xf32>
    %137 = arith.mulf %136, %18 : vector<32x512xf32>
    %138 = math.tanh %137 : vector<32x512xf32>
    %139 = arith.mulf %138, %18 : vector<32x512xf32>
    %140 = arith.addf %139, %21 : vector<32x512xf32>
    %141 = vector.extract_strided_slice %140 {offsets = [0, 0], sizes = [32, 128], strides = [1, 1]} : vector<32x512xf32> to vector<32x128xf32>
    %142 = vector.extract_strided_slice %140 {offsets = [0, 128], sizes = [32, 128], strides = [1, 1]} : vector<32x512xf32> to vector<32x128xf32>
    %143 = vector.extract_strided_slice %140 {offsets = [0, 256], sizes = [32, 128], strides = [1, 1]} : vector<32x512xf32> to vector<32x128xf32>
    %144 = vector.extract_strided_slice %140 {offsets = [0, 384], sizes = [32, 128], strides = [1, 1]} : vector<32x512xf32> to vector<32x128xf32>
    %145 = arith.mulf %142, %129 : vector<32x128xf32>
    %146 = arith.mulf %141, %143 : vector<32x128xf32>
    %147 = arith.addf %145, %146 : vector<32x128xf32>
    %148 = math.tanh %147 : vector<32x128xf32>
    %149 = arith.mulf %144, %148 : vector<32x128xf32>
    %c7_i32 = arith.constant 7 : i32
    %150 = arith.index_cast %c7_i32 : i32 to index
    %c0_40 = arith.constant 0 : index
    %c0_41 = arith.constant 0 : index
    %151 = vector.load %arg12[%150, %c0_40, %c0_41] : memref<8x32x512xf32, #tpu.memory_space<vmem>>, vector<1x32x512xf32>
    %152 = vector.shape_cast %151 : vector<1x32x512xf32> to vector<32x512xf32>
    %cst_42 = arith.constant dense<0.000000e+00> : vector<32x512xf32>
    %153 = tpu.matmul %149, %0, %cst_42 {dimension_numbers = #tpu.dot_dimension_numbers<[1], [0], [0], [1], [0, 0, 1, 1], [], []>} : vector<32x128xf32>, vector<128x512xf32>, vector<32x512xf32> -> vector<32x512xf32>
    %154 = arith.addf %152, %153 : vector<32x512xf32>
    %155 = arith.mulf %154, %18 : vector<32x512xf32>
    %156 = math.tanh %155 : vector<32x512xf32>
    %157 = arith.mulf %156, %18 : vector<32x512xf32>
    %158 = arith.addf %157, %21 : vector<32x512xf32>
    %159 = vector.extract_strided_slice %158 {offsets = [0, 0], sizes = [32, 128], strides = [1, 1]} : vector<32x512xf32> to vector<32x128xf32>
    %160 = vector.extract_strided_slice %158 {offsets = [0, 128], sizes = [32, 128], strides = [1, 1]} : vector<32x512xf32> to vector<32x128xf32>
    %161 = vector.extract_strided_slice %158 {offsets = [0, 256], sizes = [32, 128], strides = [1, 1]} : vector<32x512xf32> to vector<32x128xf32>
    %162 = vector.extract_strided_slice %158 {offsets = [0, 384], sizes = [32, 128], strides = [1, 1]} : vector<32x512xf32> to vector<32x128xf32>
    %163 = arith.mulf %160, %147 : vector<32x128xf32>
    %164 = arith.mulf %159, %161 : vector<32x128xf32>
    %165 = arith.addf %163, %164 : vector<32x128xf32>
    %166 = math.tanh %165 : vector<32x128xf32>
    %167 = arith.mulf %162, %166 : vector<32x128xf32>
    %c8_i32 = arith.constant 8 : i32
    %c0_43 = arith.constant 0 : index
    %c0_44 = arith.constant 0 : index
    %168 = vector.load %arg7[%c0_43, %c0_44] : memref<128x128xf32, #tpu.memory_space<vmem>>, vector<128x128xf32>
    %cst_45 = arith.constant dense<0.000000e+00> : vector<32x128xf32>
    %169 = tpu.matmul %167, %168, %cst_45 {dimension_numbers = #tpu.dot_dimension_numbers<[1], [0], [0], [1], [0, 0, 1, 1], [], []>} : vector<32x128xf32>, vector<128x128xf32>, vector<32x128xf32> -> vector<32x128xf32>
    %c0_46 = arith.constant 0 : index
    %c0_47 = arith.constant 0 : index
    %170 = vector.load %arg8[%c0_46, %c0_47] : memref<1x128xf32, #tpu.memory_space<vmem>>, vector<1x128xf32>
    %171 = vector.broadcast %170 : vector<1x128xf32> to vector<32x128xf32>
    %172 = arith.addf %169, %171 : vector<32x128xf32>
    %cst_48 = arith.constant 0.000000e+00 : f32
    %173 = vector.broadcast %cst_48 : f32 to vector<32x128xf32>
    %174 = arith.maximumf %172, %173 : vector<32x128xf32>
    %c0_49 = arith.constant 0 : index
    %c0_50 = arith.constant 0 : index
    %175 = vector.load %arg9[%c0_49, %c0_50] : memref<128x256xf32, #tpu.memory_space<vmem>>, vector<128x256xf32>
    %cst_51 = arith.constant dense<0.000000e+00> : vector<32x256xf32>
    %176 = tpu.matmul %174, %175, %cst_51 {dimension_numbers = #tpu.dot_dimension_numbers<[1], [0], [0], [1], [0, 0, 1, 1], [], []>} : vector<32x128xf32>, vector<128x256xf32>, vector<32x256xf32> -> vector<32x256xf32>
    %c0_52 = arith.constant 0 : index
    %c0_53 = arith.constant 0 : index
    %177 = vector.load %arg10[%c0_52, %c0_53] : memref<1x256xf32, #tpu.memory_space<vmem>>, vector<1x256xf32>
    %178 = vector.broadcast %177 : vector<1x256xf32> to vector<32x256xf32>
    %179 = arith.addf %176, %178 : vector<32x256xf32>
    %c0_54 = arith.constant 0 : index
    %c0_55 = arith.constant 0 : index
    %180 = vector.load %arg11[%c0_54, %c0_55] : memref<32x256xf32, #tpu.memory_space<vmem>>, vector<32x256xf32>
    tpu.vector_store %arg11[%c0_54, %c0_55], %179 {strides = array<i32>} : memref<32x256xf32, #tpu.memory_space<vmem>>, vector<32x256xf32>,
    return
  }
  func.func @transform_0(%arg0: i32) -> (i32, i32, i32) {
    %c0_i32 = arith.constant 0 : i32
    %c0_i32_0 = arith.constant 0 : i32
    %c0_i32_1 = arith.constant 0 : i32
    return %c0_i32, %arg0, %c0_i32_0 : i32, i32, i32
  }
  func.func @transform_1(%arg0: i32) -> (i32, i32) {
    %c0_i32 = arith.constant 0 : i32
    %c0_i32_0 = arith.constant 0 : i32
    return %arg0, %c0_i32 : i32, i32
  }
  func.func @transform_2(%arg0: i32) -> (i32, i32) {
    %c0_i32 = arith.constant 0 : i32
    %c0_i32_0 = arith.constant 0 : i32
    return %arg0, %c0_i32 : i32, i32
  }
  func.func @transform_3(%arg0: i32) -> (i32, i32) {
    %c0_i32 = arith.constant 0 : i32
    %c0_i32_0 = arith.constant 0 : i32
    %c0_i32_1 = arith.constant 0 : i32
    return %c0_i32, %c0_i32_0 : i32, i32
  }
  func.func @transform_4(%arg0: i32) -> (i32, i32) {
    %c0_i32 = arith.constant 0 : i32
    %c0_i32_0 = arith.constant 0 : i32
    %c0_i32_1 = arith.constant 0 : i32
    return %c0_i32, %c0_i32_0 : i32, i32
  }
  func.func @transform_5(%arg0: i32) -> (i32, i32) {
    %c0_i32 = arith.constant 0 : i32
    %c0_i32_0 = arith.constant 0 : i32
    %c0_i32_1 = arith.constant 0 : i32
    return %c0_i32, %c0_i32_0 : i32, i32
  }
  func.func @transform_6(%arg0: i32) -> (i32, i32) {
    %c0_i32 = arith.constant 0 : i32
    %c0_i32_0 = arith.constant 0 : i32
    %c0_i32_1 = arith.constant 0 : i32
    return %c0_i32, %c0_i32_0 : i32, i32
  }
  func.func @transform_7(%arg0: i32) -> (i32, i32) {
    %c0_i32 = arith.constant 0 : i32
    %c0_i32_0 = arith.constant 0 : i32
    %c0_i32_1 = arith.constant 0 : i32
    return %c0_i32, %c0_i32_0 : i32, i32
  }
  func.func @transform_8(%arg0: i32) -> (i32, i32) {
    %c0_i32 = arith.constant 0 : i32
    %c0_i32_0 = arith.constant 0 : i32
    %c0_i32_1 = arith.constant 0 : i32
    return %c0_i32, %c0_i32_0 : i32, i32
  }
  func.func @transform_9(%arg0: i32) -> (i32, i32) {
    %c0_i32 = arith.constant 0 : i32
    %c0_i32_0 = arith.constant 0 : i32
    %c0_i32_1 = arith.constant 0 : i32
    return %c0_i32, %c0_i32_0 : i32, i32
  }
  func.func @transform_10(%arg0: i32) -> (i32, i32) {
    %c0_i32 = arith.constant 0 : i32
    %c0_i32_0 = arith.constant 0 : i32
    return %arg0, %c0_i32 : i32, i32
  }
}

</mosaic_0001>

<bundles_post_ra>
// kernel: tpu_custom_call.1
= control target key start
LH: loop header
LB: loop body
LE: loop exit
PB: predicated region body
PF: predicated region fallthrough
CT: control target
= control target key end

     0   :  { %15 = vsyncpa [#allocation4], 0  ;;  %s6096_s0 = inlined_call_operand.vmem [shape: f32[8,32,8], index: 0, kind: input, shape index: {}]   ;;  %s6097_s1 = inlined_call_operand.vmem [shape: f32[32,128], index: 1, kind: input, shape index: {}]   ;;  %s6098_s2 = inlined_call_operand.vmem [shape: f32[32,128], index: 2, kind: input, shape index: {}]   ;;  %s6099_s3 = inlined_call_operand.hbm [shape: f32[8,512], index: 3, kind: input, shape index: {}]   ;;  %s6100_s4 = inlined_call_operand.hbm [shape: f32[128,512], index: 4, kind: input, shape index: {}]   ;;  %s6101_s5 = inlined_call_operand.vmem [shape: f32[1,512], index: 5, kind: input, shape index: {}]   ;;  %s6102_s6 = inlined_call_operand.hbm [shape: f32[128,128], index: 6, kind: input, shape index: {}]   ;;  %s6103_s7 = inlined_call_operand.vmem [shape: f32[1,128], index: 7, kind: input, shape index: {}]   ;;  %s6104_s8 = inlined_call_operand.vmem [shape: f32[128,256], index: 8, kind: input, shape index: {}]   ;;  %s6105_s9 = inlined_call_operand.vmem [shape: f32[1,256], index: 9, kind: input, shape index: {}]   ;;  %s6106_s10 = inlined_call_operand.hbm [shape: f32[32,256], index: 10, kind: output, shape index: {}]  }
   0x1   :  { %16 = vsyncpa [#allocation7], 0 }
   0x2   :  { %17 = vsyncpa [#allocation5], 0  ;;  %s4979_s13 = smov [#allocation6]   ;;  %s4885_s17 = scalar_lea.hbm %s6100_s4, 8192 }
   0x3   :  { %s39_s14 = sshll.u32 %s4979_s13, 4  ;;  %p4886_p0 = scmp.ne.s32.totalorder %s6100_s4, %s4885_s17  ;;  %s40_s14 = int_to_ptr.vmem [resolvable:$true] %s39_s14 }
   0x4   :  { %p4889_p1 = scmp.lt.u32.totalorder %s4885_s17, %s6100_s4 }
   0x6   :  { %p4891_p2 = pnand %p4889_p1, %p4886_p0 }
   0x8   :  { %4894 = shalt.err (!%p4891_p2)
}
   0x9   :  { %s4895_s22 = scalar_lea.vmem %s40_s14, 8192  ;;  %p4900_p4 = scmp.lt.s32.totalorder %s40_s14, %s40_s14 }
   0xa   :  { %p4896_p3 = scmp.ne.s32.totalorder %s40_s14, %s4895_s22  ;;  %p4901_p5 = scmp.lt.s32.totalorder %s4895_s22, %s4895_s22 }
   0xc   :  { %p4902_p6 = por %p4901_p5, %p4900_p4 }
   0xe   :  { %p4903_p7 = pnand %p4902_p6, %p4896_p3 }
  0x10   :  { %4906 = shalt.err (!%p4903_p7)
}
  0x11   :  { %s4980_s23 = smov 512   ;;  %s4981_s24 = smov 32  }
  0x12   :  { %45 = dma.hbm_to_vmem [thread:$0]  %s6100_s4, 8192, %s40_s14, [#allocation7], %s4980_s23, %s4980_s23, %s4981_s24  }
  0x13   :  { %s4982_s27 = smov [#allocation3]   ;;  %s4983_s29 = smov [#allocation8]  }
  0x14   :  { %s30_s28 = sshll.u32 %s4982_s27, 4  ;;  %s53_s30 = sshll.u32 %s4983_s29, 4  ;;  %s31_s28 = int_to_ptr.vmem [resolvable:$true] %s30_s28  ;;  %s54_s30 = int_to_ptr.vmem [resolvable:$true] %s53_s30 }
  0x15   :  { %s4907_s13 = scalar_lea.hbm %s6099_s3, 512 }
  0x16   :  { %p4908_p8 = scmp.ne.s32.totalorder %s6099_s3, %s4907_s13  ;;  %p4911_p9 = scmp.lt.u32.totalorder %s4907_s13, %s6099_s3 }
  0x18   :  { %p4913_p10 = pnand %p4911_p9, %p4908_p8 }
  0x1a   :  { %4916 = shalt.err (!%p4913_p10)
}
  0x1b   :  { %s4917_s4 = scalar_lea.vmem %s31_s28, 512  ;;  %p4922_p12 = scmp.lt.s32.totalorder %s31_s28, %s31_s28 }
  0x1c   :  { %p4918_p11 = scmp.ne.s32.totalorder %s31_s28, %s4917_s4  ;;  %p4923_p13 = scmp.lt.s32.totalorder %s4917_s4, %s4917_s4 }
  0x1e   :  { %p4924_p0 = por %p4923_p13, %p4922_p12 }
  0x20   :  { %p4925_p1 = pnand %p4924_p0, %p4918_p11 }
  0x22   :  { %4928 = shalt.err (!%p4925_p1)
}
  0x23   :  { %33 = dma.hbm_to_vmem [thread:$0]  %s6099_s3, 512, %s31_s28, [#allocation4]  }
  0x24   :  { %s4929_s22 = scalar_lea.hbm %s6102_s6, 2048 }
  0x25   :  { %p4930_p2 = scmp.ne.s32.totalorder %s6102_s6, %s4929_s22  ;;  %p4933_p3 = scmp.lt.u32.totalorder %s4929_s22, %s6102_s6 }
  0x27   :  { %p4935_p4 = pnand %p4933_p3, %p4930_p2 }
  0x29   :  { %4938 = shalt.err (!%p4935_p4)
}
  0x2a   :  { %s4939_s27 = scalar_lea.vmem %s54_s30, 2048  ;;  %p4944_p6 = scmp.lt.s32.totalorder %s54_s30, %s54_s30 }
  0x2b   :  { %p4940_p5 = scmp.ne.s32.totalorder %s54_s30, %s4939_s27  ;;  %p4945_p7 = scmp.lt.s32.totalorder %s4939_s27, %s4939_s27 }
  0x2d   :  { %p4946_p8 = por %p4945_p7, %p4944_p6 }
  0x2f   :  { %p4947_p9 = pnand %p4946_p8, %p4940_p5 }
  0x31   :  { %4950 = shalt.err (!%p4947_p9)
}
  0x32   :  { %s4984_s3 = smov 128   ;;  %s4985_s28 = smov 8  }
  0x33   :  { %59 = dma.hbm_to_vmem [thread:$0]  %s6102_s6, 2048, %s54_s30, [#allocation7], %s4984_s3, %s4984_s3, %s4985_s28  }
  0x34   :  { %4973 = dma.done.wait [#allocation4], 512  }
  0x35   :  { %4974 = vsyncadd [#allocation4], 4294966784 }
  0x36   :  { %4975 = dma.done.wait [#allocation7], 10240  }
  0x37   :  { %4976 = vsyncadd [#allocation7], 4294957056  ;;  %v6109_v0 = vmov 0.0   ;;  %v172_v1 = vld [vmem:[#allocation3 + $0x8] sm:$0xff]  ;;  %v174_v2 = vld [vmem:[#allocation3 + $0x18] sm:$0xff]  ;;  %vm197_vm0 = vcmask 64512  }
  0x38   :  { %358 = vmatprep.mubr.f32.mxu0 %v6109_v0  ;;  %615 = vmatprep.mubr.f32.mxu1 %v6109_v0  ;;  %v171_v3 = vld [vmem:[#allocation3] sm:$0xff]  ;;  %v173_v4 = vld [vmem:[#allocation3 + $0x10] sm:$0xff]  ;;  %v76_v6 = vld [vmem:[#allocation6 + $0x8] sm:$0xff] }
  0x39   :  { %294 = vmatprep.subr.mxu0 %v172_v1  ;;  %551 = vmatprep.subr.mxu1 %v174_v2  ;;  %v139_v5 = vld [vmem:[%s6096_s0] sm:$0xff]  ;;  %v80_v7 = vld [vmem:[#allocation6 + $0x28] sm:$0xff]  ;;  %v78_v12 = vld [vmem:[#allocation6 + $0x18] sm:$0xff] }
  0x3a   :  { %295 = vmatpush1.msra.mxu0 %v171_v3  ;;  %552 = vmatpush1.msra.mxu1 %v173_v4  ;;  %v75_v8 = vld [vmem:[#allocation6] sm:$0xff]  ;;  %v5088_v10 = vpack.c.bf16 %v80_v7, %v76_v6  ;;  %v82_v13 = vld [vmem:[#allocation6 + $0x38] sm:$0xff]  ;;  %v140_v14 = vld [vmem:[%s6096_s0 + $0x8] sm:$0xff] }
  0x3b   :  { %v79_v9 = vld [vmem:[#allocation6 + $0x20] sm:$0xff]  ;;  %3599 = vmatmul.mubr.msk.f32.vlgmr.msra.gmra.mrb[0].mxu0 %vm197_vm0, %v139_v5  ;;  %3631 = vmatmul.mubr.msk.f32.vlgmr.msra.gmra.mrb[0].mxu1 %vm197_vm0, %v139_v5  ;;  %v5097_v15 = vpack.c.bf16 %v82_v13, %v78_v12  ;;  %v77_v16 = vld [vmem:[#allocation6 + $0x10] sm:$0xff]  ;;  %v84_v19 = vld [vmem:[#allocation6 + $0x48] sm:$0xff] }
  0x3c   :  { %v5090_v11 = vpack.c.bf16 %v79_v9, %v75_v8  ;;  %364 = vmatprep.mubr.f32.mxu0 %v6109_v0  ;;  %621 = vmatprep.mubr.f32.mxu1 %v6109_v0  ;;  %v81_v17 = vld [vmem:[#allocation6 + $0x30] sm:$0xff]  ;;  %v88_v20 = vld [vmem:[#allocation6 + $0x68] sm:$0xff]  ;;  %v83_v21 = vld [vmem:[#allocation6 + $0x40] sm:$0xff] }
  0x3d   :  { %3723 = vmatprep.subr.bf16.mxu0 %v5088_v10  ;;  %v5100_v18 = vpack.c.bf16 %v81_v17, %v77_v16  ;;  %3755 = vmatprep.subr.bf16.mxu1 %v5097_v15  ;;  %v87_v22 = vld [vmem:[#allocation6 + $0x60] sm:$0xff]  ;;  %v5106_v23 = vpack.c.bf16 %v88_v20, %v84_v19  ;;  %v86_v25 = vld [vmem:[#allocation6 + $0x58] sm:$0xff]  ;;  %v141_v27 = vld [vmem:[%s6096_s0 + $0x10] sm:$0xff] }
  0x3e   :  { %3725 = vmatpush1.bf16.msra.mxu0 %v5090_v11  ;;  %v5108_v24 = vpack.c.bf16 %v87_v22, %v83_v21  ;;  %v90_v26 = vld [vmem:[#allocation6 + $0x78] sm:$0xff]  ;;  %v85_v29 = vld [vmem:[#allocation6 + $0x50] sm:$0xff]  ;;  %v92_v32 = vld [vmem:[#allocation6 + $0x88] sm:$0xff] }
  0x3f   :  { %3600 = vmatmul.mubr.msk.f32.gmra.mrb[2].mxu0 %vm197_vm0, %v140_v14  ;;  %3632 = vmatmul.mubr.msk.f32.gmra.mrb[2].mxu1 %vm197_vm0, %v140_v14  ;;  %v5115_v28 = vpack.c.bf16 %v90_v26, %v86_v25  ;;  %v89_v30 = vld [vmem:[#allocation6 + $0x70] sm:$0xff]  ;;  %v96_v33 = vld [vmem:[#allocation6 + $0xa8] sm:$0xff]  ;;  %v91_v34 = vld [vmem:[#allocation6 + $0x80] sm:$0xff] }
  0x40   :  { %370 = vmatprep.mubr.f32.mxu0 %v6109_v0  ;;  %627 = vmatprep.mubr.f32.mxu1 %v6109_v0  ;;  %v5119_v31 = vpack.c.bf16 %v89_v30, %v85_v29  ;;  %v95_v35 = vld [vmem:[#allocation6 + $0xa0] sm:$0xff]  ;;  %v5125_v36 = vpack.c.bf16 %v96_v33, %v92_v32  ;;  %v94_v38 = vld [vmem:[#allocation6 + $0x98] sm:$0xff]  ;;  %v93_v42 = vld [vmem:[#allocation6 + $0x90] sm:$0xff] }
  0x41   :  { %3757 = vmatpush1.bf16.msra.mxu1 %v5100_v18  ;;  %3727 = vmatprep.subr.bf16.mxu0 %v5106_v23  ;;  %v5127_v37 = vpack.c.bf16 %v95_v35, %v91_v34  ;;  %v98_v39 = vld [vmem:[#allocation6 + $0xb8] sm:$0xff]  ;;  %v97_v43 = vld [vmem:[#allocation6 + $0xb0] sm:$0xff]  ;;  %v100_v45 = vld [vmem:[#allocation6 + $0xc8] sm:$0xff] }
  0x42   :  { %3729 = vmatpush1.bf16.msra.mxu0 %v5108_v24  ;;  %3759 = vmatprep.subr.bf16.mxu1 %v5115_v28  ;;  %v142_v40 = vld [vmem:[%s6096_s0 + $0x18] sm:$0xff]  ;;  %v5134_v41 = vpack.c.bf16 %v98_v39, %v94_v38  ;;  %v5138_v44 = vpack.c.bf16 %v97_v43, %v93_v42  ;;  %v104_v46 = vld [vmem:[#allocation6 + $0xe8] sm:$0xff]  ;;  %v99_v47 = vld [vmem:[#allocation6 + $0xc0] sm:$0xff] }
  0x43   :  { %3601 = vmatmul.mubr.msk.f32.gmra.mrb[4].mxu0 %vm197_vm0, %v141_v27  ;;  %3633 = vmatmul.mubr.msk.f32.gmra.mrb[4].mxu1 %vm197_vm0, %v141_v27  ;;  %v103_v48 = vld [vmem:[#allocation6 + $0xe0] sm:$0xff]  ;;  %v5144_v49 = vpack.c.bf16 %v104_v46, %v100_v45  ;;  %v102_v51 = vld [vmem:[#allocation6 + $0xd8] sm:$0xff]  ;;  %v101_v55 = vld [vmem:[#allocation6 + $0xd0] sm:$0xff] }
  0x44   :  { %376 = vmatprep.mubr.f32.mxu0 %v6109_v0  ;;  %633 = vmatprep.mubr.f32.mxu1 %v6109_v0  ;;  %v5146_v50 = vpack.c.bf16 %v103_v48, %v99_v47  ;;  %v106_v52 = vld [vmem:[#allocation6 + $0xf8] sm:$0xff]  ;;  %v143_v53 = vld [vmem:[%s6096_s0 + $0x20] sm:$0xff]  ;;  %v105_v56 = vld [vmem:[#allocation6 + $0xf0] sm:$0xff] }
  0x45   :  { %3761 = vmatpush1.bf16.msra.mxu1 %v5119_v31  ;;  %3731 = vmatprep.subr.bf16.mxu0 %v5125_v36  ;;  %v5153_v54 = vpack.c.bf16 %v106_v52, %v102_v51  ;;  %v5157_v57 = vpack.c.bf16 %v105_v56, %v101_v55  ;;  %v108_v58 = vld [vmem:[#allocation6 + $0x108] sm:$0xff]  ;;  %v107_v60 = vld [vmem:[#allocation6 + $0x100] sm:$0xff]  ;;  %v110_v1 = vld [vmem:[#allocation6 + $0x118] sm:$0xff] }
  0x46   :  { %3733 = vmatpush1.bf16.msra.mxu0 %v5127_v37  ;;  %3763 = vmatprep.subr.bf16.mxu1 %v5134_v41  ;;  %v112_v59 = vld [vmem:[#allocation6 + $0x128] sm:$0xff]  ;;  %v111_v61 = vld [vmem:[#allocation6 + $0x120] sm:$0xff]  ;;  %v114_v2 = vld [vmem:[#allocation6 + $0x138] sm:$0xff] }
  0x47   :  { %3602 = vmatmul.mubr.msk.f32.gmra.mrb[6].mxu0 %vm197_vm0, %v142_v40  ;;  %3634 = vmatmul.mubr.msk.f32.gmra.mrb[6].mxu1 %vm197_vm0, %v142_v40  ;;  %v5163_v62 = vpack.c.bf16 %v112_v59, %v108_v58  ;;  %v5165_v63 = vpack.c.bf16 %v111_v61, %v107_v60  ;;  %v144_v3 = vld [vmem:[%s6096_s0 + $0x28] sm:$0xff]  ;;  %v5172_v4 = vpack.c.bf16 %v114_v2, %v110_v1  ;;  %v109_v5 = vld [vmem:[#allocation6 + $0x110] sm:$0xff]  ;;  %v115_v12 = vld [vmem:[#allocation6 + $0x140] sm:$0xff] }
  0x48   :  { %382 = vmatprep.mubr.f32.mxu0 %v6109_v0  ;;  %639 = vmatprep.mubr.f32.mxu1 %v6109_v0  ;;  %v113_v6 = vld [vmem:[#allocation6 + $0x130] sm:$0xff]  ;;  %v116_v8 = vld [vmem:[#allocation6 + $0x148] sm:$0xff]  ;;  %v119_v13 = vld [vmem:[#allocation6 + $0x160] sm:$0xff] }
  0x49   :  { %3765 = vmatpush1.bf16.msra.mxu1 %v5138_v44  ;;  %3735 = vmatprep.subr.bf16.mxu0 %v5144_v49  ;;  %v5176_v7 = vpack.c.bf16 %v113_v6, %v109_v5  ;;  %v120_v9 = vld [vmem:[#allocation6 + $0x168] sm:$0xff]  ;;  %v5184_v16 = vpack.c.bf16 %v119_v13, %v115_v12  ;;  %v118_v17 = vld [vmem:[#allocation6 + $0x158] sm:$0xff]  ;;  %v145_v20 = vld [vmem:[%s6096_s0 + $0x30] sm:$0xff] }
  0x4a   :  { %3737 = vmatpush1.bf16.msra.mxu0 %v5146_v50  ;;  %3767 = vmatprep.subr.bf16.mxu1 %v5153_v54  ;;  %v5182_v14 = vpack.c.bf16 %v120_v9, %v116_v8  ;;  %v122_v19 = vld [vmem:[#allocation6 + $0x178] sm:$0xff]  ;;  %v117_v22 = vld [vmem:[#allocation6 + $0x150] sm:$0xff]  ;;  %v124_v27 = vld [vmem:[#allocation6 + $0x188] sm:$0xff] }
  0x4b   :  { %3603 = vmatmul.mubr.msk.f32.gmra.mrb[8].mxu0 %vm197_vm0, %v143_v53  ;;  %3635 = vmatmul.mubr.msk.f32.gmra.mrb[8].mxu1 %vm197_vm0, %v143_v53  ;;  %v5191_v21 = vpack.c.bf16 %v122_v19, %v118_v17  ;;  %v121_v25 = vld [vmem:[#allocation6 + $0x170] sm:$0xff]  ;;  %v128_v29 = vld [vmem:[#allocation6 + $0x1a8] sm:$0xff]  ;;  %v123_v30 = vld [vmem:[#allocation6 + $0x180] sm:$0xff] }
  0x4c   :  { %388 = vmatprep.mubr.f32.mxu0 %v6109_v0  ;;  %645 = vmatprep.mubr.f32.mxu1 %v6109_v0  ;;  %v5195_v26 = vpack.c.bf16 %v121_v25, %v117_v22  ;;  %v127_v32 = vld [vmem:[#allocation6 + $0x1a0] sm:$0xff]  ;;  %v5201_v33 = vpack.c.bf16 %v128_v29, %v124_v27  ;;  %v126_v35 = vld [vmem:[#allocation6 + $0x198] sm:$0xff]  ;;  %v125_v42 = vld [vmem:[#allocation6 + $0x190] sm:$0xff] }
  0x4d   :  { %3769 = vmatpush1.bf16.msra.mxu1 %v5157_v57  ;;  %3739 = vmatprep.subr.bf16.mxu0 %v5163_v62  ;;  %v5203_v34 = vpack.c.bf16 %v127_v32, %v123_v30  ;;  %v130_v38 = vld [vmem:[#allocation6 + $0x1b8] sm:$0xff]  ;;  %v129_v43 = vld [vmem:[#allocation6 + $0x1b0] sm:$0xff]  ;;  %v132_v46 = vld [vmem:[#allocation6 + $0x1c8] sm:$0xff] }
  0x4e   :  { %3741 = vmatpush1.bf16.msra.mxu0 %v5165_v63  ;;  %3771 = vmatprep.subr.bf16.mxu1 %v5172_v4  ;;  %v146_v39 = vld [vmem:[%s6096_s0 + $0x38] sm:$0xff]  ;;  %v5210_v40 = vpack.c.bf16 %v130_v38, %v126_v35  ;;  %v5214_v45 = vpack.c.bf16 %v129_v43, %v125_v42  ;;  %v136_v47 = vld [vmem:[#allocation6 + $0x1e8] sm:$0xff]  ;;  %v131_v48 = vld [vmem:[#allocation6 + $0x1c0] sm:$0xff] }
  0x4f   :  { %3604 = vmatmul.mubr.msk.f32.gmra.mrb[10].mxu0 %vm197_vm0, %v144_v3  ;;  %3636 = vmatmul.mubr.msk.f32.gmra.mrb[10].mxu1 %vm197_vm0, %v144_v3  ;;  %v135_v51 = vld [vmem:[#allocation6 + $0x1e0] sm:$0xff]  ;;  %v5220_v52 = vpack.c.bf16 %v136_v47, %v132_v46  ;;  %v134_v55 = vld [vmem:[#allocation6 + $0x1d8] sm:$0xff]  ;;  %v133_v60 = vld [vmem:[#allocation6 + $0x1d0] sm:$0xff] }
  0x50   :  { %394 = vmatprep.mubr.f32.mxu0 %v6109_v0  ;;  %651 = vmatprep.mubr.f32.mxu1 %v6109_v0  ;;  %v5222_v53 = vpack.c.bf16 %v135_v51, %v131_v48  ;;  %v138_v56 = vld [vmem:[#allocation6 + $0x1f8] sm:$0xff]  ;;  %v147_v58 = vld [vmem:[%s6096_s0 + $0x40] sm:$0xff]  ;;  %v137_v61 = vld [vmem:[#allocation6 + $0x1f0] sm:$0xff] }
  0x51   :  { %3773 = vmatpush1.bf16.msra.mxu1 %v5176_v7  ;;  %3743 = vmatprep.subr.bf16.mxu0 %v5182_v14  ;;  %v5229_v59 = vpack.c.bf16 %v138_v56, %v134_v55  ;;  %v5233_v1 = vpack.c.bf16 %v137_v61, %v133_v60  ;;  %v148_v2 = vld [vmem:[%s6096_s0 + $0x48] sm:$0xff]  ;;  %v149_v3 = vld [vmem:[%s6096_s0 + $0x50] sm:$0xff]  ;;  %v150_v5 = vld [vmem:[%s6096_s0 + $0x58] sm:$0xff]  ;;  %v177_v56 = vlaneseq }
  0x52   :  { %3745 = vmatpush1.bf16.msra.mxu0 %v5184_v16  ;;  %3775 = vmatprep.subr.bf16.mxu1 %v5191_v21  ;;  %v151_v6 = vld [vmem:[%s6096_s0 + $0x60] sm:$0xff]  ;;  %v152_v8 = vld [vmem:[%s6096_s0 + $0x68] sm:$0xff]  ;;  %v153_v9 = vld [vmem:[%s6096_s0 + $0x70] sm:$0xff] }
  0x53   :  { %3605 = vmatmul.mubr.msk.f32.gmra.mrb[12].mxu0 %vm197_vm0, %v145_v20  ;;  %3637 = vmatmul.mubr.msk.f32.gmra.mrb[12].mxu1 %vm197_vm0, %v145_v20  ;;  %v154_v12 = vld [vmem:[%s6096_s0 + $0x78] sm:$0xff]  ;;  %v155_v13 = vld [vmem:[%s6096_s0 + $0x80] sm:$0xff]  ;;  %v156_v17 = vld [vmem:[%s6096_s0 + $0x88] sm:$0xff] }
  0x54   :  { %400 = vmatprep.mubr.f32.mxu0 %v6109_v0  ;;  %657 = vmatprep.mubr.f32.mxu1 %v6109_v0  ;;  %v157_v19 = vld [vmem:[%s6096_s0 + $0x90] sm:$0xff]  ;;  %v158_v20 = vld [vmem:[%s6096_s0 + $0x98] sm:$0xff]  ;;  %v159_v22 = vld [vmem:[%s6096_s0 + $0xa0] sm:$0xff] }
  0x55   :  { %3777 = vmatpush1.bf16.msra.mxu1 %v5195_v26  ;;  %3747 = vmatprep.subr.bf16.mxu0 %v5201_v33  ;;  %v160_v25 = vld [vmem:[%s6096_s0 + $0xa8] sm:$0xff]  ;;  %v161_v27 = vld [vmem:[%s6096_s0 + $0xb0] sm:$0xff]  ;;  %v162_v29 = vld [vmem:[%s6096_s0 + $0xb8] sm:$0xff] }
  0x56   :  { %3749 = vmatpush1.bf16.msra.mxu0 %v5203_v34  ;;  %3779 = vmatprep.subr.bf16.mxu1 %v5210_v40  ;;  %v163_v30 = vld [vmem:[%s6096_s0 + $0xc0] sm:$0xff]  ;;  %v164_v32 = vld [vmem:[%s6096_s0 + $0xc8] sm:$0xff]  ;;  %v165_v35 = vld [vmem:[%s6096_s0 + $0xd0] sm:$0xff] }
  0x57   :  { %3606 = vmatmul.mubr.msk.f32.gmra.mrb[14].mxu0 %vm197_vm0, %v146_v39  ;;  %3638 = vmatmul.mubr.msk.f32.gmra.mrb[14].mxu1 %vm197_vm0, %v146_v39  ;;  %v166_v38 = vld [vmem:[%s6096_s0 + $0xd8] sm:$0xff]  ;;  %v167_v39 = vld [vmem:[%s6096_s0 + $0xe0] sm:$0xff]  ;;  %v168_v42 = vld [vmem:[%s6096_s0 + $0xe8] sm:$0xff] }
  0x58   :  { %406 = vmatprep.mubr.f32.mxu0 %v6109_v0  ;;  %663 = vmatprep.mubr.f32.mxu1 %v6109_v0  ;;  %v169_v43 = vld [vmem:[%s6096_s0 + $0xf0] sm:$0xff]  ;;  %v170_v46 = vld [vmem:[%s6096_s0 + $0xf8] sm:$0xff]  ;;  %v961_v47 = vld [vmem:[%s6097_s1] sm:$0xff] }
  0x59   :  { %3781 = vmatpush1.bf16.msra.mxu1 %v5214_v45  ;;  %3751 = vmatprep.subr.bf16.mxu0 %v5220_v52  ;;  %v962_v48 = vld [vmem:[%s6097_s1 + $0x8] sm:$0xff]  ;;  %v963_v51 = vld [vmem:[%s6097_s1 + $0x10] sm:$0xff]  ;;  %v964_v55 = vld [vmem:[%s6097_s1 + $0x18] sm:$0xff] }
  0x5a   :  { %3753 = vmatpush1.bf16.msra.mxu0 %v5222_v53  ;;  %3783 = vmatprep.subr.bf16.mxu1 %v5229_v59  ;;  %v175_v61 = vld [vmem:[%s6101_s5] sm:$0xf] }
  0x5b   :  { %3607 = vmatmul.mubr.msk.f32.gmra.mrb[16].mxu0 %vm197_vm0, %v147_v58  ;;  %3639 = vmatmul.mubr.msk.f32.gmra.mrb[16].mxu1 %vm197_vm0, %v147_v58  ;;  %v5457_v58 = vshrl.u32 %v177_v56, 7 }
  0x5c   :  { %412 = vmatprep.mubr.f32.mxu0 %v6109_v0  ;;  %669 = vmatprep.mubr.f32.mxu1 %v6109_v0 }
  0x5d   :  { %3785 = vmatpush1.bf16.msra.mxu1 %v5233_v1  ;;  %3787 = vmatprep.subr.bf16.mxu0 %v5088_v10  ;;  %6113 = vst [vmem:[#allocation13_spill] sm:$0xff] %v5457_v58  ;;  %v6108_v60 = vsub.s32 0, %v5457_v58 }
  0x5e   :  { %3819 = vmatprep.subr.bf16.mxu1 %v5097_v15 }
  0x5f   :  { %3608 = vmatmul.mubr.msk.f32.gmra.mrb[18].mxu0 %vm197_vm0, %v148_v2  ;;  %3640 = vmatmul.mubr.msk.f32.gmra.mrb[18].mxu1 %vm197_vm0, %v148_v2  ;;  %v6107_v2 = vsub.s32 1, %v5457_v58 }
  0x60   :  { %418 = vmatprep.mubr.f32.mxu0 %v6109_v0  ;;  %675 = vmatprep.mubr.f32.mxu1 %v6109_v0 }
  0x63   :  { %3609 = vmatmul.mubr.msk.f32.gmra.mrb[20].mxu0 %vm197_vm0, %v149_v3  ;;  %3641 = vmatmul.mubr.msk.f32.gmra.mrb[20].mxu1 %vm197_vm0, %v149_v3  ;;  %v187_v3 = vsub.s32 2, %v5457_v58 }
  0x64   :  { %424 = vmatprep.mubr.f32.mxu0 %v6109_v0  ;;  %681 = vmatprep.mubr.f32.mxu1 %v6109_v0 }
  0x67   :  { %3610 = vmatmul.mubr.msk.f32.gmra.mrb[22].mxu0 %vm197_vm0, %v150_v5  ;;  %3642 = vmatmul.mubr.msk.f32.gmra.mrb[22].mxu1 %vm197_vm0, %v150_v5  ;;  %v5467_v5 = vrot.slane %v175_v61, %v6108_v60 }
  0x68   :  { %430 = vmatprep.mubr.f32.mxu0 %v6109_v0  ;;  %687 = vmatprep.mubr.f32.mxu1 %v6109_v0 }
  0x6b   :  { %3611 = vmatmul.mubr.msk.f32.gmra.mrb[24].mxu0 %vm197_vm0, %v151_v6  ;;  %3643 = vmatmul.mubr.msk.f32.gmra.mrb[24].mxu1 %vm197_vm0, %v151_v6  ;;  %v5471_v6 = vrot.slane %v175_v61, %v6107_v2 }
  0x6c   :  { %436 = vmatprep.mubr.f32.mxu0 %v6109_v0  ;;  %693 = vmatprep.mubr.f32.mxu1 %v6109_v0 }
  0x6f   :  { %3612 = vmatmul.mubr.msk.f32.gmra.mrb[26].mxu0 %vm197_vm0, %v152_v8  ;;  %3644 = vmatmul.mubr.msk.f32.gmra.mrb[26].mxu1 %vm197_vm0, %v152_v8  ;;  %v191_v8 = vsub.s32 3, %v5457_v58 }
  0x70   :  { %442 = vmatprep.mubr.f32.mxu0 %v6109_v0  ;;  %699 = vmatprep.mubr.f32.mxu1 %v6109_v0 }
  0x73   :  { %3613 = vmatmul.mubr.msk.f32.gmra.mrb[28].mxu0 %vm197_vm0, %v153_v9  ;;  %3645 = vmatmul.mubr.msk.f32.gmra.mrb[28].mxu1 %vm197_vm0, %v153_v9 }
  0x74   :  { %448 = vmatprep.mubr.f32.mxu0 %v6109_v0  ;;  %705 = vmatprep.mubr.f32.mxu1 %v6109_v0 }
  0x77   :  { %3614 = vmatmul.mubr.msk.f32.gmra.mrb[30].mxu0 %vm197_vm0, %v154_v12  ;;  %3646 = vmatmul.mubr.msk.f32.gmra.mrb[30].mxu1 %vm197_vm0, %v154_v12  ;;  %v5474_v12 = vrot.slane %v175_v61, %v187_v3 }
  0x78   :  { %454 = vmatprep.mubr.f32.mxu0 %v6109_v0  ;;  %711 = vmatprep.mubr.f32.mxu1 %v6109_v0 }
  0x7b   :  { %3615 = vmatmul.mubr.msk.f32.gmra.mrb[32].mxu0 %vm197_vm0, %v155_v13  ;;  %3647 = vmatmul.mubr.msk.f32.gmra.mrb[32].mxu1 %vm197_vm0, %v155_v13 }
  0x7c   :  { %460 = vmatprep.mubr.f32.mxu0 %v6109_v0  ;;  %717 = vmatprep.mubr.f32.mxu1 %v6109_v0 }
  0x7f   :  { %3616 = vmatmul.mubr.msk.f32.gmra.mrb[34].mxu0 %vm197_vm0, %v156_v17  ;;  %3648 = vmatmul.mubr.msk.f32.gmra.mrb[34].mxu1 %vm197_vm0, %v156_v17 }
  0x80   :  { %466 = vmatprep.mubr.f32.mxu0 %v6109_v0  ;;  %723 = vmatprep.mubr.f32.mxu1 %v6109_v0 }
  0x83   :  { %3617 = vmatmul.mubr.msk.f32.gmra.mrb[36].mxu0 %vm197_vm0, %v157_v19  ;;  %3649 = vmatmul.mubr.msk.f32.gmra.mrb[36].mxu1 %vm197_vm0, %v157_v19 }
  0x84   :  { %472 = vmatprep.mubr.f32.mxu0 %v6109_v0  ;;  %729 = vmatprep.mubr.f32.mxu1 %v6109_v0 }
  0x87   :  { %3618 = vmatmul.mubr.msk.f32.gmra.mrb[38].mxu0 %vm197_vm0, %v158_v20  ;;  %3650 = vmatmul.mubr.msk.f32.gmra.mrb[38].mxu1 %vm197_vm0, %v158_v20 }
  0x88   :  { %478 = vmatprep.mubr.f32.mxu0 %v6109_v0  ;;  %735 = vmatprep.mubr.f32.mxu1 %v6109_v0 }
  0x8b   :  { %3619 = vmatmul.mubr.msk.f32.gmra.mrb[40].mxu0 %vm197_vm0, %v159_v22  ;;  %3651 = vmatmul.mubr.msk.f32.gmra.mrb[40].mxu1 %vm197_vm0, %v159_v22 }
  0x8c   :  { %484 = vmatprep.mubr.f32.mxu0 %v6109_v0  ;;  %741 = vmatprep.mubr.f32.mxu1 %v6109_v0 }
  0x8f   :  { %3620 = vmatmul.mubr.msk.f32.gmra.mrb[42].mxu0 %vm197_vm0, %v160_v25  ;;  %3652 = vmatmul.mubr.msk.f32.gmra.mrb[42].mxu1 %vm197_vm0, %v160_v25 }
  0x90   :  { %490 = vmatprep.mubr.f32.mxu0 %v6109_v0  ;;  %747 = vmatprep.mubr.f32.mxu1 %v6109_v0 }
  0x93   :  { %3621 = vmatmul.mubr.msk.f32.gmra.mrb[44].mxu0 %vm197_vm0, %v161_v27  ;;  %3653 = vmatmul.mubr.msk.f32.gmra.mrb[44].mxu1 %vm197_vm0, %v161_v27  ;;  %v5478_v27 = vrot.slane %v175_v61, %v191_v8 }
  0x94   :  { %496 = vmatprep.mubr.f32.mxu0 %v6109_v0  ;;  %753 = vmatprep.mubr.f32.mxu1 %v6109_v0 }
  0x97   :  { %3622 = vmatmul.mubr.msk.f32.gmra.mrb[46].mxu0 %vm197_vm0, %v162_v29  ;;  %3654 = vmatmul.mubr.msk.f32.gmra.mrb[46].mxu1 %vm197_vm0, %v162_v29 }
  0x98   :  { %502 = vmatprep.mubr.f32.mxu0 %v6109_v0  ;;  %759 = vmatprep.mubr.f32.mxu1 %v6109_v0 }
  0x9b   :  { %3623 = vmatmul.mubr.msk.f32.gmra.mrb[48].mxu0 %vm197_vm0, %v163_v30  ;;  %3655 = vmatmul.mubr.msk.f32.gmra.mrb[48].mxu1 %vm197_vm0, %v163_v30 }
  0x9c   :  { %508 = vmatprep.mubr.f32.mxu0 %v6109_v0  ;;  %765 = vmatprep.mubr.f32.mxu1 %v6109_v0 }
  0x9f   :  { %3624 = vmatmul.mubr.msk.f32.gmra.mrb[50].mxu0 %vm197_vm0, %v164_v32  ;;  %3656 = vmatmul.mubr.msk.f32.gmra.mrb[50].mxu1 %vm197_vm0, %v164_v32 }
  0xa0   :  { %514 = vmatprep.mubr.f32.mxu0 %v6109_v0  ;;  %771 = vmatprep.mubr.f32.mxu1 %v6109_v0 }
  0xa3   :  { %3625 = vmatmul.mubr.msk.f32.gmra.mrb[52].mxu0 %vm197_vm0, %v165_v35  ;;  %3657 = vmatmul.mubr.msk.f32.gmra.mrb[52].mxu1 %vm197_vm0, %v165_v35 }
  0xa4   :  { %520 = vmatprep.mubr.f32.mxu0 %v6109_v0  ;;  %777 = vmatprep.mubr.f32.mxu1 %v6109_v0 }
  0xa7   :  { %3626 = vmatmul.mubr.msk.f32.gmra.mrb[54].mxu0 %vm197_vm0, %v166_v38  ;;  %3658 = vmatmul.mubr.msk.f32.gmra.mrb[54].mxu1 %vm197_vm0, %v166_v38 }
  0xa8   :  { %526 = vmatprep.mubr.f32.mxu0 %v6109_v0  ;;  %783 = vmatprep.mubr.f32.mxu1 %v6109_v0 }
  0xab   :  { %3627 = vmatmul.mubr.msk.f32.gmra.mrb[56].mxu0 %vm197_vm0, %v167_v39  ;;  %3659 = vmatmul.mubr.msk.f32.gmra.mrb[56].mxu1 %vm197_vm0, %v167_v39 }
  0xac   :  { %532 = vmatprep.mubr.f32.mxu0 %v6109_v0  ;;  %789 = vmatprep.mubr.f32.mxu1 %v6109_v0 }
  0xaf   :  { %3628 = vmatmul.mubr.msk.f32.gmra.mrb[58].mxu0 %vm197_vm0, %v168_v42  ;;  %3660 = vmatmul.mubr.msk.f32.gmra.mrb[58].mxu1 %vm197_vm0, %v168_v42 }
  0xb0   :  { %538 = vmatprep.mubr.f32.mxu0 %v6109_v0  ;;  %795 = vmatprep.mubr.f32.mxu1 %v6109_v0 }
  0xb3   :  { %3629 = vmatmul.mubr.msk.f32.gmra.mrb[60].mxu0 %vm197_vm0, %v169_v43  ;;  %3661 = vmatmul.mubr.msk.f32.gmra.mrb[60].mxu1 %vm197_vm0, %v169_v43 }
  0xb4   :  { %544 = vmatprep.mubr.f32.mxu0 %v6109_v0  ;;  %801 = vmatprep.mubr.f32.mxu1 %v6109_v0 }
  0xb7   :  { %3630 = vmatmul.mubr.msk.f32.gmra.mrb[62].mxu0 %vm197_vm0, %v170_v46  ;;  %3662 = vmatmul.mubr.msk.f32.gmra.mrb[62].mxu1 %vm197_vm0, %v170_v46 }
  0xb8   :  { %1049 = vmatprep.mubr.f32.mxu0 %v6109_v0  ;;  %1138 = vmatprep.mubr.f32.mxu1 %v6109_v0 }
  0xbb   :  { %1050 = vmatmul.mubr.f32.vlgmr.msra.gmra.mrb[0].mxu0 %v961_v47  ;;  %1139 = vmatmul.mubr.f32.vlgmr.msra.gmra.mrb[0].mxu1 %v961_v47 }
  0xbc   :  { %1055 = vmatprep.mubr.f32.mxu0 %v6109_v0  ;;  %1144 = vmatprep.mubr.f32.mxu1 %v6109_v0 }
  0xbd   :  { %3789 = vmatpush1.bf16.msra.mxu0 %v5090_v11  ;;  %3821 = vmatpush1.bf16.msra.mxu1 %v5100_v18 }
  0xbe   :  { %3791 = vmatprep.subr.bf16.mxu0 %v5106_v23  ;;  %3823 = vmatprep.subr.bf16.mxu1 %v5115_v28 }
  0xbf   :  { %1056 = vmatmul.mubr.f32.gmra.mrb[2].mxu0 %v962_v48  ;;  %1145 = vmatmul.mubr.f32.gmra.mrb[2].mxu1 %v962_v48 }
  0xc0   :  { %1061 = vmatprep.mubr.f32.mxu0 %v6109_v0  ;;  %1150 = vmatprep.mubr.f32.mxu1 %v6109_v0 }
  0xc1   :  { %3793 = vmatpush1.bf16.msra.mxu0 %v5108_v24  ;;  %3825 = vmatpush1.bf16.msra.mxu1 %v5119_v31 }
  0xc2   :  { %3795 = vmatprep.subr.bf16.mxu0 %v5125_v36  ;;  %3827 = vmatprep.subr.bf16.mxu1 %v5134_v41 }
  0xc3   :  { %1062 = vmatmul.mubr.f32.gmra.mrb[4].mxu0 %v963_v51  ;;  %1151 = vmatmul.mubr.f32.gmra.mrb[4].mxu1 %v963_v51 }
  0xc4   :  { %1067 = vmatprep.mubr.f32.mxu0 %v6109_v0  ;;  %1156 = vmatprep.mubr.f32.mxu1 %v6109_v0 }
  0xc5   :  { %3797 = vmatpush1.bf16.msra.mxu0 %v5127_v37  ;;  %3829 = vmatpush1.bf16.msra.mxu1 %v5138_v44 }
  0xc6   :  { %3799 = vmatprep.subr.bf16.mxu0 %v5144_v49  ;;  %3831 = vmatprep.subr.bf16.mxu1 %v5153_v54 }
  0xc7   :  { %1068 = vmatmul.mubr.f32.gmra.mrb[6].mxu0 %v964_v55  ;;  %1157 = vmatmul.mubr.f32.gmra.mrb[6].mxu1 %v964_v55 }
  0xc8   :  { %1344 = vmatprep.mubr.f32.mxu0 %v6109_v0  ;;  %1433 = vmatprep.mubr.f32.mxu1 %v6109_v0 }
  0xc9   :  { %3801 = vmatpush1.bf16.msra.mxu0 %v5146_v50  ;;  %3833 = vmatpush1.bf16.msra.mxu1 %v5157_v57 }
  0xca   :  { %3803 = vmatprep.subr.bf16.mxu0 %v5163_v62  ;;  %3835 = vmatprep.subr.bf16.mxu1 %v5172_v4 }
  0xcd   :  { %3805 = vmatpush1.bf16.msra.mxu0 %v5165_v63  ;;  %3837 = vmatpush1.bf16.msra.mxu1 %v5176_v7 }
  0xce   :  { %3807 = vmatprep.subr.bf16.mxu0 %v5182_v14  ;;  %3839 = vmatprep.subr.bf16.mxu1 %v5191_v21 }
  0xd1   :  { %3809 = vmatpush1.bf16.msra.mxu0 %v5184_v16  ;;  %3841 = vmatpush1.bf16.msra.mxu1 %v5195_v26 }
  0xd2   :  { %3811 = vmatprep.subr.bf16.mxu0 %v5201_v33  ;;  %3843 = vmatprep.subr.bf16.mxu1 %v5210_v40 }
  0xd5   :  { %3813 = vmatpush1.bf16.msra.mxu0 %v5203_v34  ;;  %3845 = vmatpush1.bf16.msra.mxu1 %v5214_v45 }
  0xd6   :  { %3815 = vmatprep.subr.bf16.mxu0 %v5220_v52  ;;  %3847 = vmatprep.subr.bf16.mxu1 %v5229_v59 }
  0xd9   :  { %3817 = vmatpush1.bf16.msra.mxu0 %v5222_v53  ;;  %3849 = vmatpush1.bf16.msra.mxu1 %v5233_v1 }
  0xda   :  { %3851 = vmatprep.subr.bf16.mxu0 %v5088_v10  ;;  %3883 = vmatprep.subr.bf16.mxu1 %v5097_v15 }
 0x18e   :  { %v1051_v9 = vpop.f32.mrb[0].mxu0  ;;  %v1140_v13 = vpop.f32.mrb[0].mxu1 }
 0x18f   :  { %v4298_v17 = vadd.f32 %v1051_v9, %v5467_v5  ;;  %v1053_v19 = vpop.f32.mrb[1].mxu0  ;;  %v1142_v20 = vpop.f32.mrb[1].mxu1  ;;  %v4362_v29 = vadd.f32 %v1140_v13, %v5474_v12 }
 0x190   :  { %v4299_v22 = vadd.f32 %v1053_v19, %v5471_v6  ;;  %v4363_v46 = vadd.f32 %v1142_v20, %v5478_v27 }
 0x191   :  { %v1179_v25 = vmul.f32 0.5, %v4298_v17 }
 0x192   :  { %v1180_v30 = vmul.f32 0.5, %v4299_v22  ;;  %v1057_v32 = vpop.f32.mrb[2].mxu0  ;;  %v1146_v35 = vpop.f32.mrb[2].mxu1  ;;  %v1182_v13 = vmul.f32 0.5, %v4363_v46 }
 0x193   :  { %4565 = vtanh.f32 %v1179_v25  ;;  %v4300_v38 = vadd.f32 %v1057_v32, %v5467_v5  ;;  %v1059_v39 = vpop.f32.mrb[3].mxu0  ;;  %v1148_v42 = vpop.f32.mrb[3].mxu1  ;;  %v4364_v48 = vadd.f32 %v1146_v35, %v5474_v12 }
 0x194   :  { %4567 = vtanh.f32 %v1180_v30  ;;  %v4301_v43 = vadd.f32 %v1059_v39, %v5471_v6  ;;  %v4365_v17 = vadd.f32 %v1148_v42, %v5478_v27 }
 0x195   :  { %v1183_v47 = vmul.f32 0.5, %v4300_v38  ;;  %4569 = vtanh.f32 %v4362_v29 }
 0x196   :  { %v1184_v51 = vmul.f32 0.5, %v4301_v43  ;;  %v1063_v55 = vpop.f32.mrb[4].mxu0  ;;  %v1152_v56 = vpop.f32.mrb[4].mxu1  ;;  %v1186_v43 = vmul.f32 0.5, %v4365_v17 }
 0x197   :  { %4571 = vtanh.f32 %v1183_v47  ;;  %v4302_v61 = vadd.f32 %v1063_v55, %v5467_v5  ;;  %v1065_v3 = vpop.f32.mrb[5].mxu0  ;;  %v1154_v8 = vpop.f32.mrb[5].mxu1  ;;  %v4366_v20 = vadd.f32 %v1152_v56, %v5474_v12 }
 0x198   :  { %4573 = vtanh.f32 %v1184_v51  ;;  %v4303_v9 = vadd.f32 %v1065_v3, %v5471_v6 }
 0x199   :  { %v1187_v19 = vmul.f32 0.5, %v4302_v61  ;;  %4575 = vtanh.f32 %v4364_v48  ;;  %v4367_v48 = vadd.f32 %v1154_v8, %v5478_v27 }
 0x19a   :  { %v1188_v22 = vmul.f32 0.5, %v4303_v9  ;;  %v1069_v25 = vpop.f32.mrb[6].mxu0  ;;  %v1158_v29 = vpop.f32.mrb[6].mxu1  ;;  %v965_v9 = vld [vmem:[%s6098_s2] sm:$0xff] }
 0x19b   :  { %4577 = vtanh.f32 %v1187_v19  ;;  %v4304_v30 = vadd.f32 %v1069_v25, %v5467_v5  ;;  %v1071_v32 = vpop.f32.mrb[7].mxu0  ;;  %v1160_v35 = vpop.f32.mrb[7].mxu1  ;;  %v4368_v56 = vadd.f32 %v1158_v29, %v5474_v12  ;;  %v1190_v25 = vmul.f32 0.5, %v4367_v48 }
 0x19c   :  { %4579 = vtanh.f32 %v1188_v22  ;;  %v4305_v38 = vadd.f32 %v1071_v32, %v5471_v6  ;;  %v4369_v8 = vadd.f32 %v1160_v35, %v5478_v27 }
 0x19d   :  { %v4566_v39 = vpop.eup %4565  ;;  %4581 = vtanh.f32 %v1182_v13  ;;  %v1191_v46 = vmul.f32 0.5, %v4304_v30 }
 0x19e   :  { %v4568_v42 = vpop.eup %4567  ;;  %v1211_v47 = vmul.f32 0.5, %v4566_v39  ;;  %4583 = vtanh.f32 %v4366_v20  ;;  %v1192_v51 = vmul.f32 0.5, %v4305_v38  ;;  %v966_v39 = vld [vmem:[%s6098_s2 + $0x8] sm:$0xff]  ;;  %v1194_v48 = vmul.f32 0.5, %v4369_v8 }
 0x19f   :  { %v1212_v55 = vmul.f32 0.5, %v4568_v42  ;;  %4585 = vtanh.f32 %v1191_v46  ;;  %v4570_v61 = vpop.eup %4569 }
 0x1a0   :  { %v1227_v3 = vadd.f32 0.5, %v1211_v47  ;;  %4587 = vtanh.f32 %v1192_v51 }
 0x1a1   :  { %v4572_v13 = vpop.eup %4571  ;;  %v1228_v17 = vadd.f32 0.5, %v1212_v55  ;;  %4589 = vtanh.f32 %v1186_v43 }
 0x1a2   :  { %v4574_v19 = vpop.eup %4573  ;;  %v1247_v22 = vmul.f32 %v4570_v61, %v1227_v3  ;;  %v1215_v20 = vmul.f32 0.5, %v4572_v13  ;;  %4591 = vtanh.f32 %v4368_v56  ;;  %v967_v13 = vld [vmem:[%s6098_s2 + $0x10] sm:$0xff] }
 0x1a3   :  { %v1243_v30 = vmul.f32 %v1228_v17, %v965_v9  ;;  %v1216_v32 = vmul.f32 0.5, %v4574_v19  ;;  %v4576_v29 = vpop.eup %4575  ;;  %4593 = vtanh.f32 %v1190_v25 }
 0x1a4   :  { %v1231_v38 = vadd.f32 0.5, %v1215_v20 }
 0x1a5   :  { %v4578_v46 = vpop.eup %4577  ;;  %v5500_v42 = vadd.f32 %v1247_v22, %v1243_v30  ;;  %v1232_v47 = vadd.f32 0.5, %v1216_v32 }
 0x1a6   :  { %v4580_v43 = vpop.eup %4579  ;;  %v1248_v51 = vmul.f32 %v4576_v29, %v1231_v38  ;;  %v1219_v55 = vmul.f32 0.5, %v4578_v46  ;;  %v968_v46 = vld [vmem:[%s6098_s2 + $0x18] sm:$0xff] }
 0x1a7   :  { %v4582_v61 = vpop.eup %4581  ;;  %4595 = vtanh.f32 %v5500_v42  ;;  %v1244_v35 = vmul.f32 %v1232_v47, %v966_v39  ;;  %v1220_v56 = vmul.f32 0.5, %v4580_v43 }
 0x1a8   :  { %v4584_v3 = vpop.eup %4583  ;;  %v1235_v9 = vadd.f32 0.5, %v1219_v55  ;;  %4597 = vtanh.f32 %v1194_v48  ;;  %v1214_v38 = vmul.f32 0.5, %v4582_v61 }
 0x1a9   :  { %v4586_v17 = vpop.eup %4585  ;;  %v5506_v19 = vadd.f32 %v1248_v51, %v1244_v35  ;;  %v1236_v22 = vadd.f32 0.5, %v1220_v56 }
 0x1aa   :  { %v4588_v20 = vpop.eup %4587  ;;  %v1249_v30 = vmul.f32 %v4584_v3, %v1235_v9  ;;  %v1223_v32 = vmul.f32 0.5, %v4586_v17  ;;  %v1230_v56 = vadd.f32 0.5, %v1214_v38 }
 0x1ab   :  { %v4590_v25 = vpop.eup %4589  ;;  %4599 = vtanh.f32 %v5506_v19  ;;  %v1245_v8 = vmul.f32 %v1236_v22, %v967_v13  ;;  %v1224_v29 = vmul.f32 0.5, %v4588_v20 }
 0x1ac   :  { %v1239_v39 = vadd.f32 0.5, %v1223_v32  ;;  %v4592_v47 = vpop.eup %4591  ;;  %v1218_v3 = vmul.f32 0.5, %v4590_v25 }
 0x1ad   :  { %v5512_v43 = vadd.f32 %v1249_v30, %v1245_v8  ;;  %v1240_v51 = vadd.f32 0.5, %v1224_v29  ;;  %v4594_v48 = vpop.eup %4593 }
 0x1ae   :  { %v1250_v55 = vmul.f32 %v4592_v47, %v1239_v39  ;;  %v1234_v22 = vadd.f32 0.5, %v1218_v3  ;;  %v1222_v20 = vmul.f32 0.5, %v4594_v48 }
 0x1af   :  { %4601 = vtanh.f32 %v5512_v43  ;;  %v1246_v35 = vmul.f32 %v1240_v51, %v968_v46 }
 0x1b0   :  { %v1238_v25 = vadd.f32 0.5, %v1222_v20 }
 0x1b1   :  { %v4596_v9 = vpop.eup %4595  ;;  %v5515_v13 = vadd.f32 %v1250_v55, %v1246_v35 }
 0x1b2   :  { %v1259_v61 = vmul.f32 %v4596_v9, %v1230_v56  ;;  %v4598_v17 = vpop.eup %4597 }
 0x1b3   :  { %4603 = vtanh.f32 %v5515_v13  ;;  %v1226_v8 = vmul.f32 0.5, %v4598_v17 }
 0x1b4   :  { %1345 = vmatmul.mubr.f32.vlgmr.msra.gmra.mrb[8].mxu0 %v1259_v61  ;;  %1434 = vmatmul.mubr.f32.vlgmr.msra.gmra.mrb[8].mxu1 %v1259_v61 }
 0x1b5   :  { %v4600_v30 = vpop.eup %4599  ;;  %1350 = vmatprep.mubr.f32.mxu0 %v6109_v0  ;;  %1439 = vmatprep.mubr.f32.mxu1 %v6109_v0  ;;  %v1242_v39 = vadd.f32 0.5, %v1226_v8 }
 0x1b6   :  { %v1260_v32 = vmul.f32 %v4600_v30, %v1234_v22  ;;  %3853 = vmatpush1.bf16.msra.mxu0 %v5090_v11  ;;  %3885 = vmatpush1.bf16.msra.mxu1 %v5100_v18 }
 0x1b7   :  { %3855 = vmatprep.subr.bf16.mxu0 %v5106_v23  ;;  %3887 = vmatprep.subr.bf16.mxu1 %v5115_v28 }
 0x1b8   :  { %1351 = vmatmul.mubr.f32.gmra.mrb[10].mxu0 %v1260_v32  ;;  %1440 = vmatmul.mubr.f32.gmra.mrb[10].mxu1 %v1260_v32 }
 0x1b9   :  { %v4602_v29 = vpop.eup %4601  ;;  %1356 = vmatprep.mubr.f32.mxu0 %v6109_v0  ;;  %1445 = vmatprep.mubr.f32.mxu1 %v6109_v0 }
 0x1ba   :  { %v1261_v38 = vmul.f32 %v4602_v29, %v1238_v25  ;;  %3857 = vmatpush1.bf16.msra.mxu0 %v5108_v24  ;;  %3889 = vmatpush1.bf16.msra.mxu1 %v5119_v31 }
 0x1bb   :  { %3859 = vmatprep.subr.bf16.mxu0 %v5125_v36  ;;  %3891 = vmatprep.subr.bf16.mxu1 %v5134_v41 }
 0x1bc   :  { %1357 = vmatmul.mubr.f32.gmra.mrb[12].mxu0 %v1261_v38  ;;  %1446 = vmatmul.mubr.f32.gmra.mrb[12].mxu1 %v1261_v38 }
 0x1bd   :  { %v4604_v46 = vpop.eup %4603  ;;  %1362 = vmatprep.mubr.f32.mxu0 %v6109_v0  ;;  %1451 = vmatprep.mubr.f32.mxu1 %v6109_v0 }
 0x1be   :  { %v1262_v47 = vmul.f32 %v4604_v46, %v1242_v39  ;;  %3861 = vmatpush1.bf16.msra.mxu0 %v5127_v37  ;;  %3893 = vmatpush1.bf16.msra.mxu1 %v5138_v44 }
 0x1bf   :  { %3863 = vmatprep.subr.bf16.mxu0 %v5144_v49  ;;  %3895 = vmatprep.subr.bf16.mxu1 %v5153_v54 }
 0x1c0   :  { %1363 = vmatmul.mubr.f32.gmra.mrb[14].mxu0 %v1262_v47  ;;  %1452 = vmatmul.mubr.f32.gmra.mrb[14].mxu1 %v1262_v47 }
 0x1c1   :  { %1639 = vmatprep.mubr.f32.mxu0 %v6109_v0  ;;  %1728 = vmatprep.mubr.f32.mxu1 %v6109_v0 }
 0x1c2   :  { %3865 = vmatpush1.bf16.msra.mxu0 %v5146_v50  ;;  %3897 = vmatpush1.bf16.msra.mxu1 %v5157_v57 }
 0x1c3   :  { %3867 = vmatprep.subr.bf16.mxu0 %v5163_v62  ;;  %3899 = vmatprep.subr.bf16.mxu1 %v5172_v4 }
 0x1c6   :  { %3869 = vmatpush1.bf16.msra.mxu0 %v5165_v63  ;;  %3901 = vmatpush1.bf16.msra.mxu1 %v5176_v7 }
 0x1c7   :  { %3871 = vmatprep.subr.bf16.mxu0 %v5182_v14  ;;  %3903 = vmatprep.subr.bf16.mxu1 %v5191_v21 }
 0x1ca   :  { %3873 = vmatpush1.bf16.msra.mxu0 %v5184_v16  ;;  %3905 = vmatpush1.bf16.msra.mxu1 %v5195_v26 }
 0x1cb   :  { %3875 = vmatprep.subr.bf16.mxu0 %v5201_v33  ;;  %3907 = vmatprep.subr.bf16.mxu1 %v5210_v40 }
 0x1ce   :  { %3877 = vmatpush1.bf16.msra.mxu0 %v5203_v34  ;;  %3909 = vmatpush1.bf16.msra.mxu1 %v5214_v45 }
 0x1cf   :  { %3879 = vmatprep.subr.bf16.mxu0 %v5220_v52  ;;  %3911 = vmatprep.subr.bf16.mxu1 %v5229_v59 }
 0x1d2   :  { %3881 = vmatpush1.bf16.msra.mxu0 %v5222_v53  ;;  %3913 = vmatpush1.bf16.msra.mxu1 %v5233_v1 }
 0x1d3   :  { %3915 = vmatprep.subr.bf16.mxu0 %v5088_v10  ;;  %3947 = vmatprep.subr.bf16.mxu1 %v5097_v15 }
 0x287   :  { %v1346_v51 = vpop.f32.mrb[8].mxu0  ;;  %v1435_v55 = vpop.f32.mrb[8].mxu1 }
 0x288   :  { %v4306_v35 = vadd.f32 %v1346_v51, %v5467_v5  ;;  %v1348_v48 = vpop.f32.mrb[9].mxu0  ;;  %v1437_v56 = vpop.f32.mrb[9].mxu1  ;;  %v4370_v61 = vadd.f32 %v1435_v55, %v5474_v12 }
 0x289   :  { %v4307_v3 = vadd.f32 %v1348_v48, %v5471_v6  ;;  %v4371_v29 = vadd.f32 %v1437_v56, %v5478_v27 }
 0x28a   :  { %v1474_v9 = vmul.f32 0.5, %v4306_v35 }
 0x28b   :  { %v1475_v17 = vmul.f32 0.5, %v4307_v3  ;;  %v1352_v22 = vpop.f32.mrb[10].mxu0  ;;  %v1441_v20 = vpop.f32.mrb[10].mxu1 }
 0x28c   :  { %4605 = vtanh.f32 %v1474_v9  ;;  %v4308_v30 = vadd.f32 %v1352_v22, %v5467_v5  ;;  %v1354_v32 = vpop.f32.mrb[11].mxu0  ;;  %v1443_v25 = vpop.f32.mrb[11].mxu1  ;;  %v4372_v39 = vadd.f32 %v1441_v20, %v5474_v12  ;;  %v1477_v9 = vmul.f32 0.5, %v4371_v29 }
 0x28d   :  { %4607 = vtanh.f32 %v1475_v17  ;;  %v4309_v8 = vadd.f32 %v1354_v32, %v5471_v6  ;;  %v4373_v17 = vadd.f32 %v1443_v25, %v5478_v27 }
 0x28e   :  { %v1478_v38 = vmul.f32 0.5, %v4308_v30  ;;  %4609 = vtanh.f32 %v4370_v61 }
 0x28f   :  { %v1479_v46 = vmul.f32 0.5, %v4309_v8  ;;  %v1358_v47 = vpop.f32.mrb[12].mxu0  ;;  %v1447_v51 = vpop.f32.mrb[12].mxu1  ;;  %v1481_v29 = vmul.f32 0.5, %v4373_v17 }
 0x290   :  { %4611 = vtanh.f32 %v1478_v38  ;;  %v4310_v55 = vadd.f32 %v1358_v47, %v5467_v5  ;;  %v1360_v35 = vpop.f32.mrb[13].mxu0  ;;  %v1449_v48 = vpop.f32.mrb[13].mxu1  ;;  %v4374_v56 = vadd.f32 %v1447_v51, %v5474_v12 }
 0x291   :  { %4613 = vtanh.f32 %v1479_v46  ;;  %v4311_v3 = vadd.f32 %v1360_v35, %v5471_v6 }
 0x292   :  { %v1482_v22 = vmul.f32 0.5, %v4310_v55  ;;  %4615 = vtanh.f32 %v4372_v39  ;;  %v4375_v39 = vadd.f32 %v1449_v48, %v5478_v27 }
 0x293   :  { %v1483_v61 = vmul.f32 0.5, %v4311_v3  ;;  %v1364_v20 = vpop.f32.mrb[14].mxu0  ;;  %v1453_v30 = vpop.f32.mrb[14].mxu1 }
 0x294   :  { %4617 = vtanh.f32 %v1482_v22  ;;  %v4312_v32 = vadd.f32 %v1364_v20, %v5467_v5  ;;  %v1366_v8 = vpop.f32.mrb[15].mxu0  ;;  %v1455_v38 = vpop.f32.mrb[15].mxu1  ;;  %v4376_v22 = vadd.f32 %v1453_v30, %v5474_v12 }
 0x295   :  { %4619 = vtanh.f32 %v1483_v61  ;;  %v4313_v46 = vadd.f32 %v1366_v8, %v5471_v6 }
 0x296   :  { %v4606_v47 = vpop.eup %4605  ;;  %4621 = vtanh.f32 %v1477_v9  ;;  %v1486_v35 = vmul.f32 0.5, %v4312_v32  ;;  %v1485_v32 = vmul.f32 0.5, %v4375_v39 }
 0x297   :  { %v4608_v25 = vpop.eup %4607  ;;  %v1506_v55 = vmul.f32 0.5, %v4606_v47  ;;  %4623 = vtanh.f32 %v4374_v56  ;;  %v1487_v51 = vmul.f32 0.5, %v4313_v46  ;;  %v4377_v47 = vadd.f32 %v1455_v38, %v5478_v27 }
 0x298   :  { %v1507_v3 = vmul.f32 0.5, %v4608_v25  ;;  %4625 = vtanh.f32 %v1486_v35  ;;  %v4610_v20 = vpop.eup %4609 }
 0x299   :  { %v1522_v2 = vadd.f32 0.5, %v1506_v55  ;;  %4627 = vtanh.f32 %v1487_v51 }
 0x29a   :  { %v4612_v61 = vpop.eup %4611  ;;  %v1523_v60 = vadd.f32 0.5, %v1507_v3  ;;  %4629 = vtanh.f32 %v1481_v29  ;;  %v1489_v29 = vmul.f32 0.5, %v4377_v47 }
 0x29b   :  { %v4614_v8 = vpop.eup %4613  ;;  %v1542_v9 = vmul.f32 %v4610_v20, %v1522_v2  ;;  %v1510_v17 = vmul.f32 0.5, %v4612_v61  ;;  %4631 = vtanh.f32 %v4376_v22 }
 0x29c   :  { %v1538_v56 = vmul.f32 %v1523_v60, %v5500_v42  ;;  %v1511_v48 = vmul.f32 0.5, %v4614_v8  ;;  %v4616_v46 = vpop.eup %4615  ;;  %4633 = vtanh.f32 %v1485_v32 }
 0x29d   :  { %v1526_v35 = vadd.f32 0.5, %v1510_v17 }
 0x29e   :  { %v4618_v25 = vpop.eup %4617  ;;  %v5575_v30 = vadd.f32 %v1542_v9, %v1538_v56  ;;  %v1527_v55 = vadd.f32 0.5, %v1511_v48 }
 0x29f   :  { %v4620_v51 = vpop.eup %4619  ;;  %v1543_v0 = vmul.f32 %v4616_v46, %v1526_v35  ;;  %v1514_v3 = vmul.f32 0.5, %v4618_v25 }
 0x2a0   :  { %v4622_v2 = vpop.eup %4621  ;;  %4635 = vtanh.f32 %v5575_v30  ;;  %v1539_v38 = vmul.f32 %v1527_v55, %v5506_v19  ;;  %v1515_v39 = vmul.f32 0.5, %v4620_v51 }
 0x2a1   :  { %v4624_v60 = vpop.eup %4623  ;;  %v1530_v42 = vadd.f32 0.5, %v1514_v3  ;;  %4637 = vtanh.f32 %v1489_v29  ;;  %v1509_v48 = vmul.f32 0.5, %v4622_v2 }
 0x2a2   :  { %v4626_v22 = vpop.eup %4625  ;;  %v5579_v20 = vadd.f32 %v1543_v0, %v1539_v38  ;;  %v1531_v61 = vadd.f32 0.5, %v1515_v39 }
 0x2a3   :  { %v4628_v8 = vpop.eup %4627  ;;  %v1544_v9 = vmul.f32 %v4624_v60, %v1530_v42  ;;  %v1518_v17 = vmul.f32 0.5, %v4626_v22  ;;  %v1525_v3 = vadd.f32 0.5, %v1509_v48 }
 0x2a4   :  { %v4630_v56 = vpop.eup %4629  ;;  %4639 = vtanh.f32 %v5579_v20  ;;  %v1540_v32 = vmul.f32 %v1531_v61, %v5512_v43  ;;  %v1519_v47 = vmul.f32 0.5, %v4628_v8  ;;  %v6114_v61 = vmov 0.0  }
 0x2a5   :  { %v1534_v46 = vadd.f32 0.5, %v1518_v17  ;;  %v4632_v19 = vpop.eup %4631  ;;  %v1513_v29 = vmul.f32 0.5, %v4630_v56 }
 0x2a6   :  { %v5583_v35 = vadd.f32 %v1544_v9, %v1540_v32  ;;  %v1535_v25 = vadd.f32 0.5, %v1519_v47  ;;  %v4634_v51 = vpop.eup %4633 }
 0x2a7   :  { %v1545_v55 = vmul.f32 %v4632_v19, %v1534_v46  ;;  %v1529_v2 = vadd.f32 0.5, %v1513_v29  ;;  %v1517_v42 = vmul.f32 0.5, %v4634_v51 }
 0x2a8   :  { %4641 = vtanh.f32 %v5583_v35  ;;  %v1541_v0 = vmul.f32 %v1535_v25, %v5515_v13 }
 0x2a9   :  { %v1533_v8 = vadd.f32 0.5, %v1517_v42 }
 0x2aa   :  { %v4636_v38 = vpop.eup %4635  ;;  %v5587_v39 = vadd.f32 %v1545_v55, %v1541_v0 }
 0x2ab   :  { %v1554_v60 = vmul.f32 %v4636_v38, %v1525_v3  ;;  %v4638_v43 = vpop.eup %4637 }
 0x2ac   :  { %4643 = vtanh.f32 %v5587_v39  ;;  %v1521_v9 = vmul.f32 0.5, %v4638_v43 }
 0x2ad   :  { %1640 = vmatmul.mubr.f32.vlgmr.msra.gmra.mrb[16].mxu0 %v1554_v60  ;;  %1729 = vmatmul.mubr.f32.vlgmr.msra.gmra.mrb[16].mxu1 %v1554_v60 }
 0x2ae   :  { %v4640_v22 = vpop.eup %4639  ;;  %1645 = vmatprep.mubr.f32.mxu0 %v6114_v61  ;;  %1734 = vmatprep.mubr.f32.mxu1 %v6114_v61  ;;  %v1537_v32 = vadd.f32 0.5, %v1521_v9 }
 0x2af   :  { %v1555_v13 = vmul.f32 %v4640_v22, %v1529_v2  ;;  %3917 = vmatpush1.bf16.msra.mxu0 %v5090_v11  ;;  %3949 = vmatpush1.bf16.msra.mxu1 %v5100_v18 }
 0x2b0   :  { %3919 = vmatprep.subr.bf16.mxu0 %v5106_v23  ;;  %3951 = vmatprep.subr.bf16.mxu1 %v5115_v28 }
 0x2b1   :  { %1646 = vmatmul.mubr.f32.gmra.mrb[18].mxu0 %v1555_v13  ;;  %1735 = vmatmul.mubr.f32.gmra.mrb[18].mxu1 %v1555_v13 }
 0x2b2   :  { %v4642_v17 = vpop.eup %4641  ;;  %1651 = vmatprep.mubr.f32.mxu0 %v6114_v61  ;;  %1740 = vmatprep.mubr.f32.mxu1 %v6114_v61 }
 0x2b3   :  { %v1556_v56 = vmul.f32 %v4642_v17, %v1533_v8  ;;  %3921 = vmatpush1.bf16.msra.mxu0 %v5108_v24  ;;  %3953 = vmatpush1.bf16.msra.mxu1 %v5119_v31 }
 0x2b4   :  { %3923 = vmatprep.subr.bf16.mxu0 %v5125_v36  ;;  %3955 = vmatprep.subr.bf16.mxu1 %v5134_v41 }
 0x2b5   :  { %1652 = vmatmul.mubr.f32.gmra.mrb[20].mxu0 %v1556_v56  ;;  %1741 = vmatmul.mubr.f32.gmra.mrb[20].mxu1 %v1556_v56 }
 0x2b6   :  { %v4644_v47 = vpop.eup %4643  ;;  %1657 = vmatprep.mubr.f32.mxu0 %v6114_v61  ;;  %1746 = vmatprep.mubr.f32.mxu1 %v6114_v61 }
 0x2b7   :  { %v1557_v48 = vmul.f32 %v4644_v47, %v1537_v32  ;;  %3925 = vmatpush1.bf16.msra.mxu0 %v5127_v37  ;;  %3957 = vmatpush1.bf16.msra.mxu1 %v5138_v44 }
 0x2b8   :  { %3927 = vmatprep.subr.bf16.mxu0 %v5144_v49  ;;  %3959 = vmatprep.subr.bf16.mxu1 %v5153_v54 }
 0x2b9   :  { %1658 = vmatmul.mubr.f32.gmra.mrb[22].mxu0 %v1557_v48  ;;  %1747 = vmatmul.mubr.f32.gmra.mrb[22].mxu1 %v1557_v48 }
 0x2ba   :  { %1934 = vmatprep.mubr.f32.mxu0 %v6114_v61  ;;  %2023 = vmatprep.mubr.f32.mxu1 %v6114_v61 }
 0x2bb   :  { %3929 = vmatpush1.bf16.msra.mxu0 %v5146_v50  ;;  %3961 = vmatpush1.bf16.msra.mxu1 %v5157_v57 }
 0x2bc   :  { %3931 = vmatprep.subr.bf16.mxu0 %v5163_v62  ;;  %3963 = vmatprep.subr.bf16.mxu1 %v5172_v4 }
 0x2bf   :  { %3933 = vmatpush1.bf16.msra.mxu0 %v5165_v63  ;;  %3965 = vmatpush1.bf16.msra.mxu1 %v5176_v7 }
 0x2c0   :  { %3935 = vmatprep.subr.bf16.mxu0 %v5182_v14  ;;  %3967 = vmatprep.subr.bf16.mxu1 %v5191_v21 }
 0x2c3   :  { %3937 = vmatpush1.bf16.msra.mxu0 %v5184_v16  ;;  %3969 = vmatpush1.bf16.msra.mxu1 %v5195_v26 }
 0x2c4   :  { %3939 = vmatprep.subr.bf16.mxu0 %v5201_v33  ;;  %3971 = vmatprep.subr.bf16.mxu1 %v5210_v40 }
 0x2c7   :  { %3941 = vmatpush1.bf16.msra.mxu0 %v5203_v34  ;;  %3973 = vmatpush1.bf16.msra.mxu1 %v5214_v45 }
 0x2c8   :  { %3943 = vmatprep.subr.bf16.mxu0 %v5220_v52  ;;  %3975 = vmatprep.subr.bf16.mxu1 %v5229_v59 }
 0x2cb   :  { %3945 = vmatpush1.bf16.msra.mxu0 %v5222_v53  ;;  %3977 = vmatpush1.bf16.msra.mxu1 %v5233_v1 }
 0x2cc   :  { %3979 = vmatprep.subr.bf16.mxu0 %v5088_v10  ;;  %4011 = vmatprep.subr.bf16.mxu1 %v5097_v15 }
 0x380   :  { %v1641_v46 = vpop.f32.mrb[16].mxu0  ;;  %v1730_v19 = vpop.f32.mrb[16].mxu1 }
 0x381   :  { %v4314_v25 = vadd.f32 %v1641_v46, %v5467_v5  ;;  %v1643_v55 = vpop.f32.mrb[17].mxu0  ;;  %v1732_v0 = vpop.f32.mrb[17].mxu1  ;;  %v4378_v29 = vadd.f32 %v1730_v19, %v5474_v12 }
 0x382   :  { %v4315_v51 = vadd.f32 %v1643_v55, %v5471_v6  ;;  %v4379_v8 = vadd.f32 %v1732_v0, %v5478_v27 }
 0x383   :  { %v1769_v3 = vmul.f32 0.5, %v4314_v25 }
 0x384   :  { %v1770_v38 = vmul.f32 0.5, %v4315_v51  ;;  %v1647_v60 = vpop.f32.mrb[18].mxu0  ;;  %v1736_v43 = vpop.f32.mrb[18].mxu1  ;;  %v1772_v55 = vmul.f32 0.5, %v4379_v8 }
 0x385   :  { %4645 = vtanh.f32 %v1769_v3  ;;  %v4316_v2 = vadd.f32 %v1647_v60, %v5467_v5  ;;  %v1649_v42 = vpop.f32.mrb[19].mxu0  ;;  %v1738_v22 = vpop.f32.mrb[19].mxu1  ;;  %v4380_v17 = vadd.f32 %v1736_v43, %v5474_v12 }
 0x386   :  { %4647 = vtanh.f32 %v1770_v38  ;;  %v4317_v13 = vadd.f32 %v1649_v42, %v5471_v6  ;;  %v4381_v51 = vadd.f32 %v1738_v22, %v5478_v27 }
 0x387   :  { %v1773_v9 = vmul.f32 0.5, %v4316_v2  ;;  %4649 = vtanh.f32 %v4378_v29 }
 0x388   :  { %v1774_v56 = vmul.f32 0.5, %v4317_v13  ;;  %v1653_v32 = vpop.f32.mrb[20].mxu0  ;;  %v1742_v47 = vpop.f32.mrb[20].mxu1  ;;  %v1776_v8 = vmul.f32 0.5, %v4381_v51 }
 0x389   :  { %4651 = vtanh.f32 %v1773_v9  ;;  %v4318_v48 = vadd.f32 %v1653_v32, %v5467_v5  ;;  %v1655_v46 = vpop.f32.mrb[21].mxu0  ;;  %v1744_v19 = vpop.f32.mrb[21].mxu1  ;;  %v4382_v0 = vadd.f32 %v1742_v47, %v5474_v12 }
 0x38a   :  { %4653 = vtanh.f32 %v1774_v56  ;;  %v4319_v25 = vadd.f32 %v1655_v46, %v5471_v6 }
 0x38b   :  { %v1777_v3 = vmul.f32 0.5, %v4318_v48  ;;  %4655 = vtanh.f32 %v4380_v17  ;;  %v4383_v17 = vadd.f32 %v1744_v19, %v5478_v27 }
 0x38c   :  { %v1778_v29 = vmul.f32 0.5, %v4319_v25  ;;  %v1659_v38 = vpop.f32.mrb[22].mxu0  ;;  %v1748_v60 = vpop.f32.mrb[22].mxu1 }
 0x38d   :  { %4657 = vtanh.f32 %v1777_v3  ;;  %v4320_v43 = vadd.f32 %v1659_v38, %v5467_v5  ;;  %v1661_v2 = vpop.f32.mrb[23].mxu0  ;;  %v1750_v42 = vpop.f32.mrb[23].mxu1  ;;  %v4384_v46 = vadd.f32 %v1748_v60, %v5474_v12 }
 0x38e   :  { %4659 = vtanh.f32 %v1778_v29  ;;  %v4321_v13 = vadd.f32 %v1661_v2, %v5471_v6 }
 0x38f   :  { %v4646_v9 = vpop.eup %4645  ;;  %4661 = vtanh.f32 %v1772_v55  ;;  %v1781_v56 = vmul.f32 0.5, %v4320_v43  ;;  %v1780_v43 = vmul.f32 0.5, %v4383_v17 }
 0x390   :  { %v4648_v22 = vpop.eup %4647  ;;  %v1801_v32 = vmul.f32 0.5, %v4646_v9  ;;  %4663 = vtanh.f32 %v4382_v0  ;;  %v1782_v47 = vmul.f32 0.5, %v4321_v13  ;;  %v4385_v9 = vadd.f32 %v1750_v42, %v5478_v27 }
 0x391   :  { %v1802_v48 = vmul.f32 0.5, %v4648_v22  ;;  %4665 = vtanh.f32 %v1781_v56  ;;  %v4650_v25 = vpop.eup %4649 }
 0x392   :  { %v1817_v3 = vadd.f32 0.5, %v1801_v32  ;;  %4667 = vtanh.f32 %v1782_v47 }
 0x393   :  { %v4652_v29 = vpop.eup %4651  ;;  %v1818_v38 = vadd.f32 0.5, %v1802_v48  ;;  %4669 = vtanh.f32 %v1776_v8  ;;  %v1784_v8 = vmul.f32 0.5, %v4385_v9 }
 0x394   :  { %v4654_v2 = vpop.eup %4653  ;;  %v1837_v55 = vmul.f32 %v4650_v25, %v1817_v3  ;;  %v1805_v51 = vmul.f32 0.5, %v4652_v29  ;;  %4671 = vtanh.f32 %v4384_v46 }
 0x395   :  { %v1833_v0 = vmul.f32 %v1818_v38, %v5575_v30  ;;  %v1806_v19 = vmul.f32 0.5, %v4654_v2  ;;  %v4656_v13 = vpop.eup %4655  ;;  %4673 = vtanh.f32 %v1780_v43 }
 0x396   :  { %v1821_v56 = vadd.f32 0.5, %v1805_v51 }
 0x397   :  { %v4658_v22 = vpop.eup %4657  ;;  %v5647_v60 = vadd.f32 %v1837_v55, %v1833_v0  ;;  %v1822_v32 = vadd.f32 0.5, %v1806_v19 }
 0x398   :  { %v4660_v47 = vpop.eup %4659  ;;  %v1838_v58 = vmul.f32 %v4656_v13, %v1821_v56  ;;  %v1809_v48 = vmul.f32 0.5, %v4658_v22 }
 0x399   :  { %v4662_v25 = vpop.eup %4661  ;;  %4675 = vtanh.f32 %v5647_v60  ;;  %v1834_v42 = vmul.f32 %v1822_v32, %v5579_v20  ;;  %v1810_v17 = vmul.f32 0.5, %v4660_v47 }
 0x39a   :  { %v4664_v30 = vpop.eup %4663  ;;  %v1825_v3 = vadd.f32 0.5, %v1809_v48  ;;  %4677 = vtanh.f32 %v1784_v8  ;;  %v1804_v19 = vmul.f32 0.5, %v4662_v25 }
 0x39b   :  { %v4666_v46 = vpop.eup %4665  ;;  %v5651_v29 = vadd.f32 %v1838_v58, %v1834_v42  ;;  %v1826_v38 = vadd.f32 0.5, %v1810_v17 }
 0x39c   :  { %v4668_v2 = vpop.eup %4667  ;;  %v1839_v55 = vmul.f32 %v4664_v30, %v1825_v3  ;;  %v1813_v51 = vmul.f32 0.5, %v4666_v46  ;;  %v1820_v48 = vadd.f32 0.5, %v1804_v19 }
 0x39d   :  { %v4670_v0 = vpop.eup %4669  ;;  %4679 = vtanh.f32 %v5651_v29  ;;  %v1835_v43 = vmul.f32 %v1826_v38, %v5583_v35  ;;  %v1814_v9 = vmul.f32 0.5, %v4668_v2 }
 0x39e   :  { %v1829_v13 = vadd.f32 0.5, %v1813_v51  ;;  %v4672_v20 = vpop.eup %4671  ;;  %v1808_v8 = vmul.f32 0.5, %v4670_v0 }
 0x39f   :  { %v5655_v56 = vadd.f32 %v1839_v55, %v1835_v43  ;;  %v1830_v22 = vadd.f32 0.5, %v1814_v9  ;;  %v4674_v47 = vpop.eup %4673 }
 0x3a0   :  { %v1840_v32 = vmul.f32 %v4672_v20, %v1829_v13  ;;  %v1824_v25 = vadd.f32 0.5, %v1808_v8  ;;  %v1812_v3 = vmul.f32 0.5, %v4674_v47 }
 0x3a1   :  { %4681 = vtanh.f32 %v5655_v56  ;;  %v1836_v58 = vmul.f32 %v1830_v22, %v5587_v39 }
 0x3a2   :  { %v1828_v38 = vadd.f32 0.5, %v1812_v3 }
 0x3a3   :  { %v4676_v42 = vpop.eup %4675  ;;  %v5659_v17 = vadd.f32 %v1840_v32, %v1836_v58 }
 0x3a4   :  { %v1849_v30 = vmul.f32 %v4676_v42, %v1820_v48  ;;  %v4678_v35 = vpop.eup %4677 }
 0x3a5   :  { %4683 = vtanh.f32 %v5659_v17  ;;  %v1816_v2 = vmul.f32 0.5, %v4678_v35 }
 0x3a6   :  { %1935 = vmatmul.mubr.f32.vlgmr.msra.gmra.mrb[24].mxu0 %v1849_v30  ;;  %2024 = vmatmul.mubr.f32.vlgmr.msra.gmra.mrb[24].mxu1 %v1849_v30 }
 0x3a7   :  { %v4680_v46 = vpop.eup %4679  ;;  %1940 = vmatprep.mubr.f32.mxu0 %v6114_v61  ;;  %2029 = vmatprep.mubr.f32.mxu1 %v6114_v61  ;;  %v1832_v0 = vadd.f32 0.5, %v1816_v2 }
 0x3a8   :  { %v1850_v39 = vmul.f32 %v4680_v46, %v1824_v25  ;;  %3981 = vmatpush1.bf16.msra.mxu0 %v5090_v11  ;;  %4013 = vmatpush1.bf16.msra.mxu1 %v5100_v18 }
 0x3a9   :  { %3983 = vmatprep.subr.bf16.mxu0 %v5106_v23  ;;  %4015 = vmatprep.subr.bf16.mxu1 %v5115_v28 }
 0x3aa   :  { %1941 = vmatmul.mubr.f32.gmra.mrb[26].mxu0 %v1850_v39  ;;  %2030 = vmatmul.mubr.f32.gmra.mrb[26].mxu1 %v1850_v39 }
 0x3ab   :  { %v4682_v55 = vpop.eup %4681  ;;  %1946 = vmatprep.mubr.f32.mxu0 %v6114_v61  ;;  %2035 = vmatprep.mubr.f32.mxu1 %v6114_v61 }
 0x3ac   :  { %v1851_v51 = vmul.f32 %v4682_v55, %v1828_v38  ;;  %3985 = vmatpush1.bf16.msra.mxu0 %v5108_v24  ;;  %4017 = vmatpush1.bf16.msra.mxu1 %v5119_v31 }
 0x3ad   :  { %3987 = vmatprep.subr.bf16.mxu0 %v5125_v36  ;;  %4019 = vmatprep.subr.bf16.mxu1 %v5134_v41 }
 0x3ae   :  { %1947 = vmatmul.mubr.f32.gmra.mrb[28].mxu0 %v1851_v51  ;;  %2036 = vmatmul.mubr.f32.gmra.mrb[28].mxu1 %v1851_v51 }
 0x3af   :  { %v4684_v43 = vpop.eup %4683  ;;  %1952 = vmatprep.mubr.f32.mxu0 %v6114_v61  ;;  %2041 = vmatprep.mubr.f32.mxu1 %v6114_v61 }
 0x3b0   :  { %v1852_v9 = vmul.f32 %v4684_v43, %v1832_v0  ;;  %3989 = vmatpush1.bf16.msra.mxu0 %v5127_v37  ;;  %4021 = vmatpush1.bf16.msra.mxu1 %v5138_v44 }
 0x3b1   :  { %3991 = vmatprep.subr.bf16.mxu0 %v5144_v49  ;;  %4023 = vmatprep.subr.bf16.mxu1 %v5153_v54 }
 0x3b2   :  { %1953 = vmatmul.mubr.f32.gmra.mrb[30].mxu0 %v1852_v9  ;;  %2042 = vmatmul.mubr.f32.gmra.mrb[30].mxu1 %v1852_v9 }
 0x3b3   :  { %2229 = vmatprep.mubr.f32.mxu0 %v6114_v61  ;;  %2318 = vmatprep.mubr.f32.mxu1 %v6114_v61 }
 0x3b4   :  { %3993 = vmatpush1.bf16.msra.mxu0 %v5146_v50  ;;  %4025 = vmatpush1.bf16.msra.mxu1 %v5157_v57 }
 0x3b5   :  { %3995 = vmatprep.subr.bf16.mxu0 %v5163_v62  ;;  %4027 = vmatprep.subr.bf16.mxu1 %v5172_v4 }
 0x3b8   :  { %3997 = vmatpush1.bf16.msra.mxu0 %v5165_v63  ;;  %4029 = vmatpush1.bf16.msra.mxu1 %v5176_v7 }
 0x3b9   :  { %3999 = vmatprep.subr.bf16.mxu0 %v5182_v14  ;;  %4031 = vmatprep.subr.bf16.mxu1 %v5191_v21 }
 0x3bc   :  { %4001 = vmatpush1.bf16.msra.mxu0 %v5184_v16  ;;  %4033 = vmatpush1.bf16.msra.mxu1 %v5195_v26 }
 0x3bd   :  { %4003 = vmatprep.subr.bf16.mxu0 %v5201_v33  ;;  %4035 = vmatprep.subr.bf16.mxu1 %v5210_v40 }
 0x3c0   :  { %4005 = vmatpush1.bf16.msra.mxu0 %v5203_v34  ;;  %4037 = vmatpush1.bf16.msra.mxu1 %v5214_v45 }
 0x3c1   :  { %4007 = vmatprep.subr.bf16.mxu0 %v5220_v52  ;;  %4039 = vmatprep.subr.bf16.mxu1 %v5229_v59 }
 0x3c4   :  { %4009 = vmatpush1.bf16.msra.mxu0 %v5222_v53  ;;  %4041 = vmatpush1.bf16.msra.mxu1 %v5233_v1 }
 0x3c5   :  { %4043 = vmatprep.subr.bf16.mxu0 %v5088_v10  ;;  %4075 = vmatprep.subr.bf16.mxu1 %v5097_v15 }
 0x479   :  { %v1936_v19 = vpop.f32.mrb[24].mxu0  ;;  %v2025_v13 = vpop.f32.mrb[24].mxu1 }
 0x47a   :  { %v4322_v20 = vadd.f32 %v1936_v19, %v5467_v5  ;;  %v1938_v22 = vpop.f32.mrb[25].mxu0  ;;  %v2027_v32 = vpop.f32.mrb[25].mxu1  ;;  %v4386_v48 = vadd.f32 %v2025_v13, %v5474_v12 }
 0x47b   :  { %v4323_v58 = vadd.f32 %v1938_v22, %v5471_v6  ;;  %v4387_v39 = vadd.f32 %v2027_v32, %v5478_v27 }
 0x47c   :  { %v2064_v47 = vmul.f32 0.5, %v4322_v20 }
 0x47d   :  { %v2065_v8 = vmul.f32 0.5, %v4323_v58  ;;  %v1942_v42 = vpop.f32.mrb[26].mxu0  ;;  %v2031_v30 = vpop.f32.mrb[26].mxu1  ;;  %v2067_v20 = vmul.f32 0.5, %v4387_v39 }
 0x47e   :  { %4685 = vtanh.f32 %v2064_v47  ;;  %v4324_v35 = vadd.f32 %v1942_v42, %v5467_v5  ;;  %v1944_v25 = vpop.f32.mrb[27].mxu0  ;;  %v2033_v3 = vpop.f32.mrb[27].mxu1  ;;  %v4388_v2 = vadd.f32 %v2031_v30, %v5474_v12 }
 0x47f   :  { %4687 = vtanh.f32 %v2065_v8  ;;  %v4325_v46 = vadd.f32 %v1944_v25, %v5471_v6  ;;  %v4389_v22 = vadd.f32 %v2033_v3, %v5478_v27 }
 0x480   :  { %v2068_v38 = vmul.f32 0.5, %v4324_v35  ;;  %4689 = vtanh.f32 %v4386_v48 }
 0x481   :  { %v2069_v55 = vmul.f32 0.5, %v4325_v46  ;;  %v1948_v51 = vpop.f32.mrb[28].mxu0  ;;  %v2037_v0 = vpop.f32.mrb[28].mxu1  ;;  %v2071_v39 = vmul.f32 0.5, %v4389_v22 }
 0x482   :  { %4691 = vtanh.f32 %v2068_v38  ;;  %v4326_v43 = vadd.f32 %v1948_v51, %v5467_v5  ;;  %v1950_v9 = vpop.f32.mrb[29].mxu0  ;;  %v2039_v19 = vpop.f32.mrb[29].mxu1  ;;  %v4390_v32 = vadd.f32 %v2037_v0, %v5474_v12 }
 0x483   :  { %4693 = vtanh.f32 %v2069_v55  ;;  %v4327_v13 = vadd.f32 %v1950_v9, %v5471_v6 }
 0x484   :  { %v2072_v58 = vmul.f32 0.5, %v4326_v43  ;;  %4695 = vtanh.f32 %v4388_v2  ;;  %v4391_v2 = vadd.f32 %v2039_v19, %v5478_v27 }
 0x485   :  { %v2073_v47 = vmul.f32 0.5, %v4327_v13  ;;  %v1954_v48 = vpop.f32.mrb[30].mxu0  ;;  %v2043_v8 = vpop.f32.mrb[30].mxu1 }
 0x486   :  { %4697 = vtanh.f32 %v2072_v58  ;;  %v4328_v42 = vadd.f32 %v1954_v48, %v5467_v5  ;;  %v1956_v30 = vpop.f32.mrb[31].mxu0  ;;  %v2045_v35 = vpop.f32.mrb[31].mxu1  ;;  %v4392_v43 = vadd.f32 %v2043_v8, %v5474_v12 }
 0x487   :  { %4699 = vtanh.f32 %v2073_v47  ;;  %v4329_v25 = vadd.f32 %v1956_v30, %v5471_v6  ;;  %v4393_v30 = vadd.f32 %v2045_v35, %v5478_v27 }
 0x488   :  { %v4686_v46 = vpop.eup %4685  ;;  %4701 = vtanh.f32 %v2067_v20  ;;  %v2076_v38 = vmul.f32 0.5, %v4328_v42  ;;  %v2075_v42 = vmul.f32 0.5, %v4391_v2 }
 0x489   :  { %v4688_v3 = vpop.eup %4687  ;;  %v2096_v55 = vmul.f32 0.5, %v4686_v46  ;;  %4703 = vtanh.f32 %v4390_v32  ;;  %v2077_v51 = vmul.f32 0.5, %v4329_v25 }
 0x48a   :  { %v2097_v0 = vmul.f32 0.5, %v4688_v3  ;;  %4705 = vtanh.f32 %v2076_v38  ;;  %v4690_v9 = vpop.eup %4689 }
 0x48b   :  { %v2112_v13 = vadd.f32 0.5, %v2096_v55  ;;  %4707 = vtanh.f32 %v2077_v51 }
 0x48c   :  { %v4692_v58 = vpop.eup %4691  ;;  %v2113_v47 = vadd.f32 0.5, %v2097_v0  ;;  %4709 = vtanh.f32 %v2071_v39  ;;  %v2079_v39 = vmul.f32 0.5, %v4393_v30 }
 0x48d   :  { %v4694_v48 = vpop.eup %4693  ;;  %v2132_v20 = vmul.f32 %v4690_v9, %v2112_v13  ;;  %v2100_v22 = vmul.f32 0.5, %v4692_v58  ;;  %4711 = vtanh.f32 %v4392_v43 }
 0x48e   :  { %v2128_v32 = vmul.f32 %v2113_v47, %v5647_v60  ;;  %v2101_v19 = vmul.f32 0.5, %v4694_v48  ;;  %v4696_v25 = vpop.eup %4695  ;;  %4713 = vtanh.f32 %v2075_v42 }
 0x48f   :  { %v2116_v46 = vadd.f32 0.5, %v2100_v22 }
 0x490   :  { %v4698_v38 = vpop.eup %4697  ;;  %v5719_v8 = vadd.f32 %v2132_v20, %v2128_v32  ;;  %v2117_v3 = vadd.f32 0.5, %v2101_v19 }
 0x491   :  { %v4700_v55 = vpop.eup %4699  ;;  %v2133_v51 = vmul.f32 %v4696_v25, %v2116_v46  ;;  %v2104_v0 = vmul.f32 0.5, %v4698_v38 }
 0x492   :  { %v4702_v9 = vpop.eup %4701  ;;  %4715 = vtanh.f32 %v5719_v8  ;;  %v2129_v35 = vmul.f32 %v2117_v3, %v5651_v29  ;;  %v2105_v2 = vmul.f32 0.5, %v4700_v55 }
 0x493   :  { %v4704_v60 = vpop.eup %4703  ;;  %v2120_v13 = vadd.f32 0.5, %v2104_v0  ;;  %4717 = vtanh.f32 %v2079_v39  ;;  %v2099_v19 = vmul.f32 0.5, %v4702_v9 }
 0x494   :  { %v4706_v43 = vpop.eup %4705  ;;  %v5723_v58 = vadd.f32 %v2133_v51, %v2129_v35  ;;  %v2121_v47 = vadd.f32 0.5, %v2105_v2 }
 0x495   :  { %v4708_v48 = vpop.eup %4707  ;;  %v2134_v20 = vmul.f32 %v4704_v60, %v2120_v13  ;;  %v2108_v22 = vmul.f32 0.5, %v4706_v43  ;;  %v2115_v0 = vadd.f32 0.5, %v2099_v19 }
 0x496   :  { %v4710_v32 = vpop.eup %4709  ;;  %4719 = vtanh.f32 %v5723_v58  ;;  %v2130_v42 = vmul.f32 %v2121_v47, %v5655_v56  ;;  %v2109_v30 = vmul.f32 0.5, %v4708_v48 }
 0x497   :  { %v2124_v25 = vadd.f32 0.5, %v2108_v22  ;;  %v4712_v29 = vpop.eup %4711  ;;  %v2103_v39 = vmul.f32 0.5, %v4710_v32 }
 0x498   :  { %v5727_v46 = vadd.f32 %v2134_v20, %v2130_v42  ;;  %v2125_v38 = vadd.f32 0.5, %v2109_v30  ;;  %v4714_v51 = vpop.eup %4713 }
 0x499   :  { %v2135_v3 = vmul.f32 %v4712_v29, %v2124_v25  ;;  %v2119_v9 = vadd.f32 0.5, %v2103_v39  ;;  %v2107_v13 = vmul.f32 0.5, %v4714_v51 }
 0x49a   :  { %4721 = vtanh.f32 %v5727_v46  ;;  %v2131_v55 = vmul.f32 %v2125_v38, %v5659_v17 }
 0x49b   :  { %v2123_v47 = vadd.f32 0.5, %v2107_v13 }
 0x49c   :  { %v4716_v35 = vpop.eup %4715  ;;  %v5731_v2 = vadd.f32 %v2135_v3, %v2131_v55 }
 0x49d   :  { %v2144_v60 = vmul.f32 %v4716_v35, %v2115_v0  ;;  %v4718_v56 = vpop.eup %4717 }
 0x49e   :  { %4723 = vtanh.f32 %v5731_v2  ;;  %v2111_v48 = vmul.f32 0.5, %v4718_v56 }
 0x49f   :  { %2230 = vmatmul.mubr.f32.vlgmr.msra.gmra.mrb[32].mxu0 %v2144_v60  ;;  %2319 = vmatmul.mubr.f32.vlgmr.msra.gmra.mrb[32].mxu1 %v2144_v60 }
 0x4a0   :  { %v4720_v43 = vpop.eup %4719  ;;  %2235 = vmatprep.mubr.f32.mxu0 %v6114_v61  ;;  %2324 = vmatprep.mubr.f32.mxu1 %v6114_v61  ;;  %v2127_v32 = vadd.f32 0.5, %v2111_v48 }
 0x4a1   :  { %v2145_v17 = vmul.f32 %v4720_v43, %v2119_v9  ;;  %4045 = vmatpush1.bf16.msra.mxu0 %v5090_v11  ;;  %4077 = vmatpush1.bf16.msra.mxu1 %v5100_v18 }
 0x4a2   :  { %4047 = vmatprep.subr.bf16.mxu0 %v5106_v23  ;;  %4079 = vmatprep.subr.bf16.mxu1 %v5115_v28 }
 0x4a3   :  { %2236 = vmatmul.mubr.f32.gmra.mrb[34].mxu0 %v2145_v17  ;;  %2325 = vmatmul.mubr.f32.gmra.mrb[34].mxu1 %v2145_v17 }
 0x4a4   :  { %v4722_v20 = vpop.eup %4721  ;;  %2241 = vmatprep.mubr.f32.mxu0 %v6114_v61  ;;  %2330 = vmatprep.mubr.f32.mxu1 %v6114_v61 }
 0x4a5   :  { %v2146_v22 = vmul.f32 %v4722_v20, %v2123_v47  ;;  %4049 = vmatpush1.bf16.msra.mxu0 %v5108_v24  ;;  %4081 = vmatpush1.bf16.msra.mxu1 %v5119_v31 }
 0x4a6   :  { %4051 = vmatprep.subr.bf16.mxu0 %v5125_v36  ;;  %4083 = vmatprep.subr.bf16.mxu1 %v5134_v41 }
 0x4a7   :  { %2242 = vmatmul.mubr.f32.gmra.mrb[36].mxu0 %v2146_v22  ;;  %2331 = vmatmul.mubr.f32.gmra.mrb[36].mxu1 %v2146_v22 }
 0x4a8   :  { %v4724_v42 = vpop.eup %4723  ;;  %2247 = vmatprep.mubr.f32.mxu0 %v6114_v61  ;;  %2336 = vmatprep.mubr.f32.mxu1 %v6114_v61 }
 0x4a9   :  { %v2147_v30 = vmul.f32 %v4724_v42, %v2127_v32  ;;  %4053 = vmatpush1.bf16.msra.mxu0 %v5127_v37  ;;  %4085 = vmatpush1.bf16.msra.mxu1 %v5138_v44 }
 0x4aa   :  { %4055 = vmatprep.subr.bf16.mxu0 %v5144_v49  ;;  %4087 = vmatprep.subr.bf16.mxu1 %v5153_v54 }
 0x4ab   :  { %2248 = vmatmul.mubr.f32.gmra.mrb[38].mxu0 %v2147_v30  ;;  %2337 = vmatmul.mubr.f32.gmra.mrb[38].mxu1 %v2147_v30 }
 0x4ac   :  { %2524 = vmatprep.mubr.f32.mxu0 %v6114_v61  ;;  %2613 = vmatprep.mubr.f32.mxu1 %v6114_v61 }
 0x4ad   :  { %4057 = vmatpush1.bf16.msra.mxu0 %v5146_v50  ;;  %4089 = vmatpush1.bf16.msra.mxu1 %v5157_v57 }
 0x4ae   :  { %4059 = vmatprep.subr.bf16.mxu0 %v5163_v62  ;;  %4091 = vmatprep.subr.bf16.mxu1 %v5172_v4 }
 0x4b1   :  { %4061 = vmatpush1.bf16.msra.mxu0 %v5165_v63  ;;  %4093 = vmatpush1.bf16.msra.mxu1 %v5176_v7 }
 0x4b2   :  { %4063 = vmatprep.subr.bf16.mxu0 %v5182_v14  ;;  %4095 = vmatprep.subr.bf16.mxu1 %v5191_v21 }
 0x4b5   :  { %4065 = vmatpush1.bf16.msra.mxu0 %v5184_v16  ;;  %4097 = vmatpush1.bf16.msra.mxu1 %v5195_v26 }
 0x4b6   :  { %4067 = vmatprep.subr.bf16.mxu0 %v5201_v33  ;;  %4099 = vmatprep.subr.bf16.mxu1 %v5210_v40 }
 0x4b9   :  { %4069 = vmatpush1.bf16.msra.mxu0 %v5203_v34  ;;  %4101 = vmatpush1.bf16.msra.mxu1 %v5214_v45 }
 0x4ba   :  { %4071 = vmatprep.subr.bf16.mxu0 %v5220_v52  ;;  %4103 = vmatprep.subr.bf16.mxu1 %v5229_v59 }
 0x4bd   :  { %4073 = vmatpush1.bf16.msra.mxu0 %v5222_v53  ;;  %4105 = vmatpush1.bf16.msra.mxu1 %v5233_v1 }
 0x4be   :  { %4107 = vmatprep.subr.bf16.mxu0 %v5088_v10  ;;  %4139 = vmatprep.subr.bf16.mxu1 %v5097_v15 }
 0x572   :  { %v2231_v19 = vpop.f32.mrb[32].mxu0  ;;  %v2320_v25 = vpop.f32.mrb[32].mxu1 }
 0x573   :  { %v4330_v29 = vadd.f32 %v2231_v19, %v5467_v5  ;;  %v2233_v38 = vpop.f32.mrb[33].mxu0  ;;  %v2322_v3 = vpop.f32.mrb[33].mxu1  ;;  %v4394_v0 = vadd.f32 %v2320_v25, %v5474_v12 }
 0x574   :  { %v4331_v55 = vadd.f32 %v2233_v38, %v5471_v6  ;;  %v4395_v17 = vadd.f32 %v2322_v3, %v5478_v27 }
 0x575   :  { %v2359_v51 = vmul.f32 0.5, %v4330_v29 }
 0x576   :  { %v2360_v39 = vmul.f32 0.5, %v4331_v55  ;;  %v2237_v35 = vpop.f32.mrb[34].mxu0  ;;  %v2326_v60 = vpop.f32.mrb[34].mxu1  ;;  %v2362_v29 = vmul.f32 0.5, %v4395_v17 }
 0x577   :  { %4725 = vtanh.f32 %v2359_v51  ;;  %v4332_v56 = vadd.f32 %v2237_v35, %v5467_v5  ;;  %v2239_v9 = vpop.f32.mrb[35].mxu0  ;;  %v2328_v13 = vpop.f32.mrb[35].mxu1  ;;  %v4396_v48 = vadd.f32 %v2326_v60, %v5474_v12 }
 0x578   :  { %4727 = vtanh.f32 %v2360_v39  ;;  %v4333_v43 = vadd.f32 %v2239_v9, %v5471_v6  ;;  %v4397_v38 = vadd.f32 %v2328_v13, %v5478_v27 }
 0x579   :  { %v2363_v47 = vmul.f32 0.5, %v4332_v56  ;;  %4729 = vtanh.f32 %v4394_v0 }
 0x57a   :  { %v2364_v20 = vmul.f32 0.5, %v4333_v43  ;;  %v2243_v22 = vpop.f32.mrb[36].mxu0  ;;  %v2332_v32 = vpop.f32.mrb[36].mxu1  ;;  %v2366_v17 = vmul.f32 0.5, %v4397_v38 }
 0x57b   :  { %4731 = vtanh.f32 %v2363_v47  ;;  %v4334_v42 = vadd.f32 %v2243_v22, %v5467_v5  ;;  %v2245_v30 = vpop.f32.mrb[37].mxu0  ;;  %v2334_v19 = vpop.f32.mrb[37].mxu1  ;;  %v4398_v3 = vadd.f32 %v2332_v32, %v5474_v12 }
 0x57c   :  { %4733 = vtanh.f32 %v2364_v20  ;;  %v4335_v25 = vadd.f32 %v2245_v30, %v5471_v6 }
 0x57d   :  { %v2367_v55 = vmul.f32 0.5, %v4334_v42  ;;  %4735 = vtanh.f32 %v4396_v48  ;;  %v4399_v48 = vadd.f32 %v2334_v19, %v5478_v27 }
 0x57e   :  { %v2368_v51 = vmul.f32 0.5, %v4335_v25  ;;  %v2249_v0 = vpop.f32.mrb[38].mxu0  ;;  %v2338_v39 = vpop.f32.mrb[38].mxu1 }
 0x57f   :  { %4737 = vtanh.f32 %v2367_v55  ;;  %v4336_v35 = vadd.f32 %v2249_v0, %v5467_v5  ;;  %v2251_v60 = vpop.f32.mrb[39].mxu0  ;;  %v2340_v56 = vpop.f32.mrb[39].mxu1  ;;  %v4400_v42 = vadd.f32 %v2338_v39, %v5474_v12 }
 0x580   :  { %4739 = vtanh.f32 %v2368_v51  ;;  %v4337_v9 = vadd.f32 %v2251_v60, %v5471_v6  ;;  %v4401_v60 = vadd.f32 %v2340_v56, %v5478_v27 }
 0x581   :  { %v4726_v43 = vpop.eup %4725  ;;  %4741 = vtanh.f32 %v2362_v29  ;;  %v2371_v47 = vmul.f32 0.5, %v4336_v35  ;;  %v2370_v35 = vmul.f32 0.5, %v4399_v48 }
 0x582   :  { %v4728_v13 = vpop.eup %4727  ;;  %v2391_v20 = vmul.f32 0.5, %v4726_v43  ;;  %4743 = vtanh.f32 %v4398_v3  ;;  %v2372_v22 = vmul.f32 0.5, %v4337_v9 }
 0x583   :  { %v2392_v32 = vmul.f32 0.5, %v4728_v13  ;;  %4745 = vtanh.f32 %v2371_v47  ;;  %v4730_v30 = vpop.eup %4729 }
 0x584   :  { %v2407_v25 = vadd.f32 0.5, %v2391_v20  ;;  %4747 = vtanh.f32 %v2372_v22 }
 0x585   :  { %v4732_v55 = vpop.eup %4731  ;;  %v2408_v51 = vadd.f32 0.5, %v2392_v32  ;;  %4749 = vtanh.f32 %v2366_v17  ;;  %v2374_v17 = vmul.f32 0.5, %v4401_v60 }
 0x586   :  { %v4734_v0 = vpop.eup %4733  ;;  %v2427_v29 = vmul.f32 %v4730_v30, %v2407_v25  ;;  %v2395_v38 = vmul.f32 0.5, %v4732_v55  ;;  %4751 = vtanh.f32 %v4400_v42 }
 0x587   :  { %v2423_v3 = vmul.f32 %v2408_v51, %v5719_v8  ;;  %v2396_v19 = vmul.f32 0.5, %v4734_v0  ;;  %v4736_v9 = vpop.eup %4735  ;;  %4753 = vtanh.f32 %v2370_v35 }
 0x588   :  { %v2411_v43 = vadd.f32 0.5, %v2395_v38 }
 0x589   :  { %v4738_v47 = vpop.eup %4737  ;;  %v5791_v39 = vadd.f32 %v2427_v29, %v2423_v3  ;;  %v2412_v13 = vadd.f32 0.5, %v2396_v19 }
 0x58a   :  { %v4740_v20 = vpop.eup %4739  ;;  %v2428_v22 = vmul.f32 %v4736_v9, %v2411_v43  ;;  %v2399_v32 = vmul.f32 0.5, %v4738_v47 }
 0x58b   :  { %v4742_v30 = vpop.eup %4741  ;;  %4755 = vtanh.f32 %v5791_v39  ;;  %v2424_v56 = vmul.f32 %v2412_v13, %v5723_v58  ;;  %v2400_v48 = vmul.f32 0.5, %v4740_v20 }
 0x58c   :  { %v4744_v8 = vpop.eup %4743  ;;  %v2415_v25 = vadd.f32 0.5, %v2399_v32  ;;  %4757 = vtanh.f32 %v2374_v17  ;;  %v2394_v19 = vmul.f32 0.5, %v4742_v30 }
 0x58d   :  { %v4746_v42 = vpop.eup %4745  ;;  %v5795_v55 = vadd.f32 %v2428_v22, %v2424_v56  ;;  %v2416_v51 = vadd.f32 0.5, %v2400_v48 }
 0x58e   :  { %v4748_v0 = vpop.eup %4747  ;;  %v2429_v29 = vmul.f32 %v4744_v8, %v2415_v25  ;;  %v2403_v38 = vmul.f32 0.5, %v4746_v42  ;;  %v2410_v32 = vadd.f32 0.5, %v2394_v19 }
 0x58f   :  { %v4750_v3 = vpop.eup %4749  ;;  %4759 = vtanh.f32 %v5795_v55  ;;  %v2425_v35 = vmul.f32 %v2416_v51, %v5727_v46  ;;  %v2404_v60 = vmul.f32 0.5, %v4748_v0 }
 0x590   :  { %v2419_v9 = vadd.f32 0.5, %v2403_v38  ;;  %v4752_v58 = vpop.eup %4751  ;;  %v2398_v17 = vmul.f32 0.5, %v4750_v3 }
 0x591   :  { %v5799_v43 = vadd.f32 %v2429_v29, %v2425_v35  ;;  %v2420_v47 = vadd.f32 0.5, %v2404_v60  ;;  %v4754_v22 = vpop.eup %4753 }
 0x592   :  { %v2430_v13 = vmul.f32 %v4752_v58, %v2419_v9  ;;  %v2414_v30 = vadd.f32 0.5, %v2398_v17  ;;  %v2402_v25 = vmul.f32 0.5, %v4754_v22 }
 0x593   :  { %4761 = vtanh.f32 %v5799_v43  ;;  %v2426_v20 = vmul.f32 %v2420_v47, %v5731_v2 }
 0x594   :  { %v2418_v51 = vadd.f32 0.5, %v2402_v25 }
 0x595   :  { %v4756_v56 = vpop.eup %4755  ;;  %v5803_v48 = vadd.f32 %v2430_v13, %v2426_v20 }
 0x596   :  { %v2439_v8 = vmul.f32 %v4756_v56, %v2410_v32  ;;  %v4758_v46 = vpop.eup %4757 }
 0x597   :  { %4763 = vtanh.f32 %v5803_v48  ;;  %v2406_v0 = vmul.f32 0.5, %v4758_v46 }
 0x598   :  { %2525 = vmatmul.mubr.f32.vlgmr.msra.gmra.mrb[40].mxu0 %v2439_v8  ;;  %2614 = vmatmul.mubr.f32.vlgmr.msra.gmra.mrb[40].mxu1 %v2439_v8 }
 0x599   :  { %v4760_v42 = vpop.eup %4759  ;;  %2530 = vmatprep.mubr.f32.mxu0 %v6114_v61  ;;  %2619 = vmatprep.mubr.f32.mxu1 %v6114_v61  ;;  %v2422_v3 = vadd.f32 0.5, %v2406_v0 }
 0x59a   :  { %v2440_v2 = vmul.f32 %v4760_v42, %v2414_v30  ;;  %4109 = vmatpush1.bf16.msra.mxu0 %v5090_v11  ;;  %4141 = vmatpush1.bf16.msra.mxu1 %v5100_v18 }
 0x59b   :  { %4111 = vmatprep.subr.bf16.mxu0 %v5106_v23  ;;  %4143 = vmatprep.subr.bf16.mxu1 %v5115_v28 }
 0x59c   :  { %2531 = vmatmul.mubr.f32.gmra.mrb[42].mxu0 %v2440_v2  ;;  %2620 = vmatmul.mubr.f32.gmra.mrb[42].mxu1 %v2440_v2 }
 0x59d   :  { %v4762_v29 = vpop.eup %4761  ;;  %2536 = vmatprep.mubr.f32.mxu0 %v6114_v61  ;;  %2625 = vmatprep.mubr.f32.mxu1 %v6114_v61 }
 0x59e   :  { %v2441_v38 = vmul.f32 %v4762_v29, %v2418_v51  ;;  %4113 = vmatpush1.bf16.msra.mxu0 %v5108_v24  ;;  %4145 = vmatpush1.bf16.msra.mxu1 %v5119_v31 }
 0x59f   :  { %4115 = vmatprep.subr.bf16.mxu0 %v5125_v36  ;;  %4147 = vmatprep.subr.bf16.mxu1 %v5134_v41 }
 0x5a0   :  { %2537 = vmatmul.mubr.f32.gmra.mrb[44].mxu0 %v2441_v38  ;;  %2626 = vmatmul.mubr.f32.gmra.mrb[44].mxu1 %v2441_v38 }
 0x5a1   :  { %v4764_v35 = vpop.eup %4763  ;;  %2542 = vmatprep.mubr.f32.mxu0 %v6114_v61  ;;  %2631 = vmatprep.mubr.f32.mxu1 %v6114_v61 }
 0x5a2   :  { %v2442_v60 = vmul.f32 %v4764_v35, %v2422_v3  ;;  %4117 = vmatpush1.bf16.msra.mxu0 %v5127_v37  ;;  %4149 = vmatpush1.bf16.msra.mxu1 %v5138_v44 }
 0x5a3   :  { %4119 = vmatprep.subr.bf16.mxu0 %v5144_v49  ;;  %4151 = vmatprep.subr.bf16.mxu1 %v5153_v54 }
 0x5a4   :  { %2543 = vmatmul.mubr.f32.gmra.mrb[46].mxu0 %v2442_v60  ;;  %2632 = vmatmul.mubr.f32.gmra.mrb[46].mxu1 %v2442_v60 }
 0x5a5   :  { %2819 = vmatprep.mubr.f32.mxu0 %v6114_v61  ;;  %2908 = vmatprep.mubr.f32.mxu1 %v6114_v61 }
 0x5a6   :  { %4121 = vmatpush1.bf16.msra.mxu0 %v5146_v50  ;;  %4153 = vmatpush1.bf16.msra.mxu1 %v5157_v57 }
 0x5a7   :  { %4123 = vmatprep.subr.bf16.mxu0 %v5163_v62  ;;  %4155 = vmatprep.subr.bf16.mxu1 %v5172_v4 }
 0x5aa   :  { %4125 = vmatpush1.bf16.msra.mxu0 %v5165_v63  ;;  %4157 = vmatpush1.bf16.msra.mxu1 %v5176_v7 }
 0x5ab   :  { %4127 = vmatprep.subr.bf16.mxu0 %v5182_v14  ;;  %4159 = vmatprep.subr.bf16.mxu1 %v5191_v21 }
 0x5ae   :  { %4129 = vmatpush1.bf16.msra.mxu0 %v5184_v16  ;;  %4161 = vmatpush1.bf16.msra.mxu1 %v5195_v26 }
 0x5af   :  { %4131 = vmatprep.subr.bf16.mxu0 %v5201_v33  ;;  %4163 = vmatprep.subr.bf16.mxu1 %v5210_v40 }
 0x5b2   :  { %4133 = vmatpush1.bf16.msra.mxu0 %v5203_v34  ;;  %4165 = vmatpush1.bf16.msra.mxu1 %v5214_v45 }
 0x5b3   :  { %4135 = vmatprep.subr.bf16.mxu0 %v5220_v52  ;;  %4167 = vmatprep.subr.bf16.mxu1 %v5229_v59 }
 0x5b6   :  { %4137 = vmatpush1.bf16.msra.mxu0 %v5222_v53  ;;  %4169 = vmatpush1.bf16.msra.mxu1 %v5233_v1 }
 0x5b7   :  { %4171 = vmatprep.subr.bf16.mxu0 %v5088_v10  ;;  %4203 = vmatprep.subr.bf16.mxu1 %v5097_v15 }
 0x66b   :  { %v2526_v19 = vpop.f32.mrb[40].mxu0  ;;  %v2615_v9 = vpop.f32.mrb[40].mxu1 }
 0x66c   :  { %v4338_v58 = vadd.f32 %v2526_v19, %v5467_v5  ;;  %v2528_v47 = vpop.f32.mrb[41].mxu0  ;;  %v2617_v13 = vpop.f32.mrb[41].mxu1  ;;  %v4402_v32 = vadd.f32 %v2615_v9, %v5474_v12 }
 0x66d   :  { %v4339_v20 = vadd.f32 %v2528_v47, %v5471_v6  ;;  %v4403_v25 = vadd.f32 %v2617_v13, %v5478_v27 }
 0x66e   :  { %v2654_v22 = vmul.f32 0.5, %v4338_v58 }
 0x66f   :  { %v2655_v17 = vmul.f32 0.5, %v4339_v20  ;;  %v2532_v56 = vpop.f32.mrb[42].mxu0  ;;  %v2621_v8 = vpop.f32.mrb[42].mxu1  ;;  %v2657_v19 = vmul.f32 0.5, %v4403_v25 }
 0x670   :  { %4765 = vtanh.f32 %v2654_v22  ;;  %v4340_v46 = vadd.f32 %v2532_v56, %v5467_v5  ;;  %v2534_v10 = vpop.f32.mrb[43].mxu0  ;;  %v2623_v30 = vpop.f32.mrb[43].mxu1  ;;  %v4404_v2 = vadd.f32 %v2621_v8, %v5474_v12 }
 0x671   :  { %4767 = vtanh.f32 %v2655_v17  ;;  %v4341_v15 = vadd.f32 %v2534_v10, %v5471_v6  ;;  %v4405_v9 = vadd.f32 %v2623_v30, %v5478_v27 }
 0x672   :  { %v2658_v42 = vmul.f32 0.5, %v4340_v46  ;;  %4769 = vtanh.f32 %v4402_v32 }
 0x673   :  { %v2659_v51 = vmul.f32 0.5, %v4341_v15  ;;  %v2538_v0 = vpop.f32.mrb[44].mxu0  ;;  %v2627_v29 = vpop.f32.mrb[44].mxu1  ;;  %v2661_v10 = vmul.f32 0.5, %v4405_v9 }
 0x674   :  { %4771 = vtanh.f32 %v2658_v42  ;;  %v4342_v38 = vadd.f32 %v2538_v0, %v5467_v5  ;;  %v2540_v3 = vpop.f32.mrb[45].mxu0  ;;  %v2629_v35 = vpop.f32.mrb[45].mxu1  ;;  %v4406_v47 = vadd.f32 %v2627_v29, %v5474_v12 }
 0x675   :  { %4773 = vtanh.f32 %v2659_v51  ;;  %v4343_v60 = vadd.f32 %v2540_v3, %v5471_v6  ;;  %v4407_v42 = vadd.f32 %v2629_v35, %v5478_v27 }
 0x676   :  { %v2662_v58 = vmul.f32 0.5, %v4342_v38  ;;  %4775 = vtanh.f32 %v4404_v2 }
 0x677   :  { %v2663_v13 = vmul.f32 0.5, %v4343_v60  ;;  %v2544_v20 = vpop.f32.mrb[46].mxu0  ;;  %v2633_v22 = vpop.f32.mrb[46].mxu1 }
 0x678   :  { %4777 = vtanh.f32 %v2662_v58  ;;  %v4344_v32 = vadd.f32 %v2544_v20, %v5467_v5  ;;  %v2546_v17 = vpop.f32.mrb[47].mxu0  ;;  %v2635_v56 = vpop.f32.mrb[47].mxu1  ;;  %v4408_v0 = vadd.f32 %v2633_v22, %v5474_v12 }
 0x679   :  { %4779 = vtanh.f32 %v2663_v13  ;;  %v4345_v8 = vadd.f32 %v2546_v17, %v5471_v6  ;;  %v2665_v13 = vmul.f32 0.5, %v4407_v42  ;;  %v4409_v20 = vadd.f32 %v2635_v56, %v5478_v27 }
 0x67a   :  { %v4766_v46 = vpop.eup %4765  ;;  %4781 = vtanh.f32 %v2657_v19  ;;  %v2666_v15 = vmul.f32 0.5, %v4344_v32 }
 0x67b   :  { %v4768_v30 = vpop.eup %4767  ;;  %v2686_v25 = vmul.f32 0.5, %v4766_v46  ;;  %4783 = vtanh.f32 %v4406_v47  ;;  %v2667_v2 = vmul.f32 0.5, %v4345_v8 }
 0x67c   :  { %v2687_v51 = vmul.f32 0.5, %v4768_v30  ;;  %4785 = vtanh.f32 %v2666_v15  ;;  %v4770_v29 = vpop.eup %4769 }
 0x67d   :  { %v2702_v38 = vadd.f32 0.5, %v2686_v25  ;;  %4787 = vtanh.f32 %v2667_v2 }
 0x67e   :  { %v4772_v3 = vpop.eup %4771  ;;  %v2703_v60 = vadd.f32 0.5, %v2687_v51  ;;  %4789 = vtanh.f32 %v2661_v10  ;;  %v2669_v10 = vmul.f32 0.5, %v4409_v20 }
 0x67f   :  { %v4774_v58 = vpop.eup %4773  ;;  %v2722_v19 = vmul.f32 %v4770_v29, %v2702_v38  ;;  %v2690_v9 = vmul.f32 0.5, %v4772_v3  ;;  %4791 = vtanh.f32 %v4408_v0 }
 0x680   :  { %v2718_v47 = vmul.f32 %v2703_v60, %v5791_v39  ;;  %v2691_v35 = vmul.f32 0.5, %v4774_v58  ;;  %v4776_v32 = vpop.eup %4775  ;;  %4793 = vtanh.f32 %v2665_v13 }
 0x681   :  { %v2706_v17 = vadd.f32 0.5, %v2690_v9 }
 0x682   :  { %v4778_v8 = vpop.eup %4777  ;;  %v5863_v22 = vadd.f32 %v2722_v19, %v2718_v47  ;;  %v2707_v46 = vadd.f32 0.5, %v2691_v35 }
 0x683   :  { %v4780_v15 = vpop.eup %4779  ;;  %v2723_v30 = vmul.f32 %v4776_v32, %v2706_v17  ;;  %v2694_v25 = vmul.f32 0.5, %v4778_v8 }
 0x684   :  { %v4782_v2 = vpop.eup %4781  ;;  %4795 = vtanh.f32 %v5863_v22  ;;  %v2719_v56 = vmul.f32 %v2707_v46, %v5795_v55  ;;  %v2695_v42 = vmul.f32 0.5, %v4780_v15 }
 0x685   :  { %v4784_v39 = vpop.eup %4783  ;;  %v2710_v51 = vadd.f32 0.5, %v2694_v25  ;;  %4797 = vtanh.f32 %v2669_v10  ;;  %v2689_v20 = vmul.f32 0.5, %v4782_v2 }
 0x686   :  { %v4786_v0 = vpop.eup %4785  ;;  %v5867_v29 = vadd.f32 %v2723_v30, %v2719_v56  ;;  %v2711_v38 = vadd.f32 0.5, %v2695_v42 }
 0x687   :  { %v4788_v3 = vpop.eup %4787  ;;  %v2724_v60 = vmul.f32 %v4784_v39, %v2710_v51  ;;  %v2698_v58 = vmul.f32 0.5, %v4786_v0  ;;  %v2705_v15 = vadd.f32 0.5, %v2689_v20 }
 0x688   :  { %v4790_v19 = vpop.eup %4789  ;;  %4799 = vtanh.f32 %v5867_v29  ;;  %v2720_v9 = vmul.f32 %v2711_v38, %v5799_v43  ;;  %v2699_v13 = vmul.f32 0.5, %v4788_v3 }
 0x689   :  { %v2714_v47 = vadd.f32 0.5, %v2698_v58  ;;  %v4792_v55 = vpop.eup %4791  ;;  %v2693_v30 = vmul.f32 0.5, %v4790_v19 }
 0x68a   :  { %v5871_v35 = vadd.f32 %v2724_v60, %v2720_v9  ;;  %v2715_v32 = vadd.f32 0.5, %v2699_v13  ;;  %v4794_v46 = vpop.eup %4793 }
 0x68b   :  { %v2725_v17 = vmul.f32 %v4792_v55, %v2714_v47  ;;  %v2709_v2 = vadd.f32 0.5, %v2693_v30  ;;  %v2697_v42 = vmul.f32 0.5, %v4794_v46 }
 0x68c   :  { %4801 = vtanh.f32 %v5871_v35  ;;  %v2721_v8 = vmul.f32 %v2715_v32, %v5803_v48 }
 0x68d   :  { %v2713_v51 = vadd.f32 0.5, %v2697_v42 }
 0x68e   :  { %v4796_v25 = vpop.eup %4795  ;;  %v5875_v10 = vadd.f32 %v2725_v17, %v2721_v8 }
 0x68f   :  { %v2734_v56 = vmul.f32 %v4796_v25, %v2705_v15  ;;  %v4798_v43 = vpop.eup %4797 }
 0x690   :  { %4803 = vtanh.f32 %v5875_v10  ;;  %v2701_v0 = vmul.f32 0.5, %v4798_v43 }
 0x691   :  { %2820 = vmatmul.mubr.f32.vlgmr.msra.gmra.mrb[48].mxu0 %v2734_v56  ;;  %2909 = vmatmul.mubr.f32.vlgmr.msra.gmra.mrb[48].mxu1 %v2734_v56 }
 0x692   :  { %v4800_v39 = vpop.eup %4799  ;;  %2825 = vmatprep.mubr.f32.mxu0 %v6114_v61  ;;  %2914 = vmatprep.mubr.f32.mxu1 %v6114_v61 }
 0x693   :  { %v2735_v48 = vmul.f32 %v4800_v39, %v2709_v2  ;;  %4173 = vmatpush1.bf16.msra.mxu0 %v5090_v11  ;;  %4205 = vmatpush1.bf16.msra.mxu1 %v5100_v18  ;;  %v2717_v11 = vadd.f32 0.5, %v2701_v0 }
 0x694   :  { %4175 = vmatprep.subr.bf16.mxu0 %v5106_v23  ;;  %4207 = vmatprep.subr.bf16.mxu1 %v5115_v28 }
 0x695   :  { %2826 = vmatmul.mubr.f32.gmra.mrb[50].mxu0 %v2735_v48  ;;  %2915 = vmatmul.mubr.f32.gmra.mrb[50].mxu1 %v2735_v48 }
 0x696   :  { %v4802_v38 = vpop.eup %4801  ;;  %2831 = vmatprep.mubr.f32.mxu0 %v6114_v61  ;;  %2920 = vmatprep.mubr.f32.mxu1 %v6114_v61 }
 0x697   :  { %v2736_v3 = vmul.f32 %v4802_v38, %v2713_v51  ;;  %4177 = vmatpush1.bf16.msra.mxu0 %v5108_v24  ;;  %4209 = vmatpush1.bf16.msra.mxu1 %v5119_v31 }
 0x698   :  { %4179 = vmatprep.subr.bf16.mxu0 %v5125_v36  ;;  %4211 = vmatprep.subr.bf16.mxu1 %v5134_v41 }
 0x699   :  { %2832 = vmatmul.mubr.f32.gmra.mrb[52].mxu0 %v2736_v3  ;;  %2921 = vmatmul.mubr.f32.gmra.mrb[52].mxu1 %v2736_v3 }
 0x69a   :  { %v4804_v18 = vpop.eup %4803  ;;  %2837 = vmatprep.mubr.f32.mxu0 %v6114_v61  ;;  %2926 = vmatprep.mubr.f32.mxu1 %v6114_v61 }
 0x69b   :  { %v2737_v23 = vmul.f32 %v4804_v18, %v2717_v11  ;;  %4181 = vmatpush1.bf16.msra.mxu0 %v5127_v37  ;;  %4213 = vmatpush1.bf16.msra.mxu1 %v5138_v44 }
 0x69c   :  { %4183 = vmatprep.subr.bf16.mxu0 %v5144_v49  ;;  %4215 = vmatprep.subr.bf16.mxu1 %v5153_v54 }
 0x69d   :  { %2838 = vmatmul.mubr.f32.gmra.mrb[54].mxu0 %v2737_v23  ;;  %2927 = vmatmul.mubr.f32.gmra.mrb[54].mxu1 %v2737_v23 }
 0x69e   :  { %3114 = vmatprep.mubr.f32.mxu0 %v6114_v61  ;;  %3203 = vmatprep.mubr.f32.mxu1 %v6114_v61 }
 0x69f   :  { %4185 = vmatpush1.bf16.msra.mxu0 %v5146_v50  ;;  %4217 = vmatpush1.bf16.msra.mxu1 %v5157_v57 }
 0x6a0   :  { %4187 = vmatprep.subr.bf16.mxu0 %v5163_v62  ;;  %4219 = vmatprep.subr.bf16.mxu1 %v5172_v4 }
 0x6a3   :  { %4189 = vmatpush1.bf16.msra.mxu0 %v5165_v63  ;;  %4221 = vmatpush1.bf16.msra.mxu1 %v5176_v7 }
 0x6a4   :  { %4191 = vmatprep.subr.bf16.mxu0 %v5182_v14  ;;  %4223 = vmatprep.subr.bf16.mxu1 %v5191_v21 }
 0x6a7   :  { %4193 = vmatpush1.bf16.msra.mxu0 %v5184_v16  ;;  %4225 = vmatpush1.bf16.msra.mxu1 %v5195_v26 }
 0x6a8   :  { %4195 = vmatprep.subr.bf16.mxu0 %v5201_v33  ;;  %4227 = vmatprep.subr.bf16.mxu1 %v5210_v40 }
 0x6ab   :  { %4197 = vmatpush1.bf16.msra.mxu0 %v5203_v34  ;;  %4229 = vmatpush1.bf16.msra.mxu1 %v5214_v45 }
 0x6ac   :  { %4199 = vmatprep.subr.bf16.mxu0 %v5220_v52  ;;  %4231 = vmatprep.subr.bf16.mxu1 %v5229_v59 }
 0x6af   :  { %4201 = vmatpush1.bf16.msra.mxu0 %v5222_v53  ;;  %4233 = vmatpush1.bf16.msra.mxu1 %v5233_v1 }
 0x764   :  { %v2821_v24 = vpop.f32.mrb[48].mxu0  ;;  %v2910_v28 = vpop.f32.mrb[48].mxu1 }
 0x765   :  { %v4346_v31 = vadd.f32 %v2821_v24, %v5467_v5  ;;  %v2823_v36 = vpop.f32.mrb[49].mxu0  ;;  %v2912_v37 = vpop.f32.mrb[49].mxu1  ;;  %v4410_v49 = vadd.f32 %v2910_v28, %v5474_v12 }
 0x766   :  { %v4347_v41 = vadd.f32 %v2823_v36, %v5471_v6  ;;  %v4411_v14 = vadd.f32 %v2912_v37, %v5478_v27 }
 0x767   :  { %v2949_v44 = vmul.f32 0.5, %v4346_v31 }
 0x768   :  { %v2950_v50 = vmul.f32 0.5, %v4347_v41  ;;  %v2827_v54 = vpop.f32.mrb[50].mxu0  ;;  %v2916_v57 = vpop.f32.mrb[50].mxu1  ;;  %v2952_v59 = vmul.f32 0.5, %v4411_v14 }
 0x769   :  { %4805 = vtanh.f32 %v2949_v44  ;;  %v4348_v62 = vadd.f32 %v2827_v54, %v5467_v5  ;;  %v2829_v63 = vpop.f32.mrb[51].mxu0  ;;  %v2918_v4 = vpop.f32.mrb[51].mxu1  ;;  %v4412_v21 = vadd.f32 %v2916_v57, %v5474_v12 }
 0x76a   :  { %4807 = vtanh.f32 %v2950_v50  ;;  %v4349_v7 = vadd.f32 %v2829_v63, %v5471_v6  ;;  %v4413_v1 = vadd.f32 %v2918_v4, %v5478_v27 }
 0x76b   :  { %v2953_v16 = vmul.f32 0.5, %v4348_v62  ;;  %4809 = vtanh.f32 %v4410_v49 }
 0x76c   :  { %v2954_v26 = vmul.f32 0.5, %v4349_v7  ;;  %v2833_v33 = vpop.f32.mrb[52].mxu0  ;;  %v2922_v34 = vpop.f32.mrb[52].mxu1  ;;  %v2956_v8 = vmul.f32 0.5, %v4413_v1 }
 0x76d   :  { %4811 = vtanh.f32 %v2953_v16  ;;  %v4350_v40 = vadd.f32 %v2833_v33, %v5467_v5  ;;  %v2835_v45 = vpop.f32.mrb[53].mxu0  ;;  %v2924_v52 = vpop.f32.mrb[53].mxu1  ;;  %v4414_v58 = vadd.f32 %v2922_v34, %v5474_v12 }
 0x76e   :  { %4813 = vtanh.f32 %v2954_v26  ;;  %v4351_v53 = vadd.f32 %v2835_v45, %v5471_v6  ;;  %v4415_v25 = vadd.f32 %v2924_v52, %v5478_v27 }
 0x76f   :  { %v2957_v60 = vmul.f32 0.5, %v4350_v40  ;;  %4815 = vtanh.f32 %v4412_v21 }
 0x770   :  { %v2958_v19 = vmul.f32 0.5, %v4351_v53  ;;  %v2839_v9 = vpop.f32.mrb[54].mxu0  ;;  %v2928_v13 = vpop.f32.mrb[54].mxu1  ;;  %v2960_v11 = vmul.f32 0.5, %v4415_v25 }
 0x771   :  { %4817 = vtanh.f32 %v2957_v60  ;;  %v4352_v20 = vadd.f32 %v2839_v9, %v5467_v5  ;;  %v2841_v47 = vpop.f32.mrb[55].mxu0  ;;  %v2930_v55 = vpop.f32.mrb[55].mxu1  ;;  %v4416_v2 = vadd.f32 %v2928_v13, %v5474_v12 }
 0x772   :  { %4819 = vtanh.f32 %v2958_v19  ;;  %v4353_v32 = vadd.f32 %v2841_v47, %v5471_v6  ;;  %v4417_v18 = vadd.f32 %v2930_v55, %v5478_v27 }
 0x773   :  { %v4806_v17 = vpop.eup %4805  ;;  %4821 = vtanh.f32 %v2952_v59  ;;  %v2961_v46 = vmul.f32 0.5, %v4352_v20 }
 0x774   :  { %v4808_v15 = vpop.eup %4807  ;;  %v2981_v30 = vmul.f32 0.5, %v4806_v17  ;;  %4823 = vtanh.f32 %v4414_v58  ;;  %v2962_v56 = vmul.f32 0.5, %v4353_v32  ;;  %v2964_v54 = vmul.f32 0.5, %v4417_v18 }
 0x775   :  { %v2982_v43 = vmul.f32 0.5, %v4808_v15  ;;  %4825 = vtanh.f32 %v2961_v46  ;;  %v4810_v42 = vpop.eup %4809 }
 0x776   :  { %v2997_v39 = vadd.f32 0.5, %v2981_v30  ;;  %4827 = vtanh.f32 %v2962_v56 }
 0x777   :  { %v4812_v48 = vpop.eup %4811  ;;  %v2998_v51 = vadd.f32 0.5, %v2982_v43  ;;  %4829 = vtanh.f32 %v2956_v8 }
 0x778   :  { %v4814_v0 = vpop.eup %4813  ;;  %v3017_v38 = vmul.f32 %v4810_v42, %v2997_v39  ;;  %v2985_v3 = vmul.f32 0.5, %v4812_v48  ;;  %4831 = vtanh.f32 %v4416_v2  ;;  %v3328_v42 = vld [vmem:[#allocation8] sm:$0xff]  ;;  %v3329_v39 = vld [vmem:[#allocation8 + $0x8] sm:$0xff] }
 0x779   :  { %v3013_v23 = vmul.f32 %v2998_v51, %v5863_v22  ;;  %v2986_v24 = vmul.f32 0.5, %v4814_v0  ;;  %v4816_v28 = vpop.eup %4815  ;;  %4833 = vtanh.f32 %v2960_v11  ;;  %v4234_v48 = vpack.c.bf16 %v3329_v39, %v3328_v42  ;;  %v3330_v51 = vld [vmem:[#allocation8 + $0x10] sm:$0xff]  ;;  %v3331_v0 = vld [vmem:[#allocation8 + $0x18] sm:$0xff]  ;;  %v3333_v11 = vld [vmem:[#allocation8 + $0x28] sm:$0xff] }
 0x77a   :  { %v3001_v31 = vadd.f32 0.5, %v2985_v3  ;;  %v3332_v3 = vld [vmem:[#allocation8 + $0x20] sm:$0xff] }
 0x77b   :  { %v4818_v36 = vpop.eup %4817  ;;  %v5933_v37 = vadd.f32 %v3017_v38, %v3013_v23  ;;  %v3002_v41 = vadd.f32 0.5, %v2986_v24  ;;  %4235 = vmatprep.subr.bf16.mxu0 %v4234_v48  ;;  %v4238_v38 = vpack.c.bf16 %v3331_v0, %v3330_v51  ;;  %v4242_v18 = vpack.c.bf16 %v3333_v11, %v3332_v3  ;;  %v3334_v23 = vld [vmem:[#allocation8 + $0x30] sm:$0xff]  ;;  %v3335_v24 = vld [vmem:[#allocation8 + $0x38] sm:$0xff]  ;;  %v3465_v0 = vld [vmem:[%s6104_s8 + $0xc8] sm:$0xff] }
 0x77c   :  { %v4820_v44 = vpop.eup %4819  ;;  %v3018_v49 = vmul.f32 %v4816_v28, %v3001_v31  ;;  %v2989_v50 = vmul.f32 0.5, %v4818_v36  ;;  %v4246_v28 = vpack.c.bf16 %v3335_v24, %v3334_v23  ;;  %v3336_v31 = vld [vmem:[#allocation8 + $0x40] sm:$0xff]  ;;  %v3337_v36 = vld [vmem:[#allocation8 + $0x48] sm:$0xff]  ;;  %v3462_v51 = vld [vmem:[%s6104_s8 + $0xb0] sm:$0xff] }
 0x77d   :  { %v4822_v57 = vpop.eup %4821  ;;  %4835 = vtanh.f32 %v5933_v37  ;;  %v3014_v62 = vmul.f32 %v3002_v41, %v5867_v29  ;;  %v2990_v63 = vmul.f32 0.5, %v4820_v44  ;;  %v4250_v41 = vpack.c.bf16 %v3337_v36, %v3336_v31  ;;  %v3338_v44 = vld [vmem:[#allocation8 + $0x50] sm:$0xff] }
 0x77e   :  { %v4824_v22 = vpop.eup %4823  ;;  %v3005_v4 = vadd.f32 0.5, %v2989_v50  ;;  %4837 = vtanh.f32 %v2964_v54  ;;  %v2984_v52 = vmul.f32 0.5, %v4822_v57  ;;  %v3340_v54 = vld [vmem:[#allocation8 + $0x60] sm:$0xff]  ;;  %v3341_v57 = vld [vmem:[#allocation8 + $0x68] sm:$0xff]  ;;  %v3466_v23 = vld [vmem:[%s6104_s8 + $0xd0] sm:$0xff] }
 0x77f   :  { %v4826_v7 = vpop.eup %4825  ;;  %v5937_v14 = vadd.f32 %v3018_v49, %v3014_v62  ;;  %v3006_v16 = vadd.f32 0.5, %v2990_v63  ;;  %v3339_v49 = vld [vmem:[#allocation8 + $0x58] sm:$0xff]  ;;  %v4258_v62 = vpack.c.bf16 %v3341_v57, %v3340_v54  ;;  %v3342_v63 = vld [vmem:[#allocation8 + $0x70] sm:$0xff] }
 0x780   :  { %v4828_v21 = vpop.eup %4827  ;;  %v3019_v26 = vmul.f32 %v4824_v22, %v3005_v4  ;;  %v2993_v33 = vmul.f32 0.5, %v4826_v7  ;;  %v3000_v9 = vadd.f32 0.5, %v2984_v52  ;;  %v4254_v50 = vpack.c.bf16 %v3339_v49, %v3338_v44  ;;  %v3343_v22 = vld [vmem:[#allocation8 + $0x78] sm:$0xff]  ;;  %v3441_v7 = vld [vmem:[%s6104_s8 + $0x8] sm:$0xff] }
 0x781   :  { %v4830_v34 = vpop.eup %4829  ;;  %4839 = vtanh.f32 %v5937_v14  ;;  %v3015_v40 = vmul.f32 %v3006_v16, %v5871_v35  ;;  %v2994_v45 = vmul.f32 0.5, %v4828_v21  ;;  %v4262_v4 = vpack.c.bf16 %v3343_v22, %v3342_v63  ;;  %v3443_v16 = vld [vmem:[%s6104_s8 + $0x18] sm:$0xff]  ;;  %v3440_v21 = vld [vmem:[%s6104_s8] sm:$0xff] }
 0x782   :  { %v3009_v53 = vadd.f32 0.5, %v2993_v33  ;;  %v4832_v29 = vpop.eup %4831  ;;  %v2988_v13 = vmul.f32 0.5, %v4830_v34  ;;  %v3442_v33 = vld [vmem:[%s6104_s8 + $0x10] sm:$0xff]  ;;  %v3445_v34 = vld [vmem:[%s6104_s8 + $0x28] sm:$0xff] }
 0x783   :  { %v5941_v59 = vadd.f32 %v3019_v26, %v3015_v40  ;;  %v3010_v1 = vadd.f32 0.5, %v2994_v45  ;;  %v4834_v19 = vpop.eup %4833  ;;  %v4266_v26 = vpack.c.bf16 %v3443_v16, %v3441_v7  ;;  %v3447_v40 = vld [vmem:[%s6104_s8 + $0x38] sm:$0xff]  ;;  %v4268_v45 = vpack.c.bf16 %v3442_v33, %v3440_v21 }
 0x784   :  { %v3020_v60 = vmul.f32 %v4832_v29, %v3009_v53  ;;  %v3004_v32 = vadd.f32 0.5, %v2988_v13  ;;  %v2992_v17 = vmul.f32 0.5, %v4834_v19  ;;  %v4270_v52 = vpack.c.bf16 %v3447_v40, %v3445_v34  ;;  %v3444_v53 = vld [vmem:[%s6104_s8 + $0x20] sm:$0xff]  ;;  %v3446_v29 = vld [vmem:[%s6104_s8 + $0x30] sm:$0xff] }
 0x785   :  { %4841 = vtanh.f32 %v5941_v59  ;;  %v3016_v58 = vmul.f32 %v3010_v1, %v5875_v10  ;;  %v3449_v1 = vld [vmem:[%s6104_s8 + $0x48] sm:$0xff]  ;;  %4267 = vmatprep.subr.bf16.mxu1 %v4266_v26  ;;  %v3450_v13 = vld [vmem:[%s6104_s8 + $0x50] sm:$0xff] }
 0x786   :  { %v3008_v46 = vadd.f32 0.5, %v2992_v17  ;;  %v3452_v17 = vld [vmem:[%s6104_s8 + $0x60] sm:$0xff] }
 0x787   :  { %v4836_v20 = vpop.eup %4835  ;;  %v5945_v47 = vadd.f32 %v3020_v60, %v3016_v58  ;;  %v3451_v60 = vld [vmem:[%s6104_s8 + $0x58] sm:$0xff]  ;;  %v4272_v58 = vpack.c.bf16 %v3446_v29, %v3444_v53 }
 0x788   :  { %v3029_v55 = vmul.f32 %v4836_v20, %v3000_v9  ;;  %v4838_v35 = vpop.eup %4837  ;;  %v4274_v19 = vpack.c.bf16 %v3451_v60, %v3449_v1  ;;  %v3448_v9 = vld [vmem:[%s6104_s8 + $0x40] sm:$0xff]  ;;  %v3453_v20 = vld [vmem:[%s6104_s8 + $0x68] sm:$0xff] }
 0x789   :  { %4843 = vtanh.f32 %v5945_v47  ;;  %v2996_v15 = vmul.f32 0.5, %v4838_v35  ;;  %v4276_v35 = vpack.c.bf16 %v3450_v13, %v3448_v9 }
 0x78a   :  { %3115 = vmatmul.mubr.f32.vlgmr.msra.gmra.mrb[56].mxu0 %v3029_v55  ;;  %3204 = vmatmul.mubr.f32.vlgmr.msra.gmra.mrb[56].mxu1 %v3029_v55  ;;  %v3455_v55 = vld [vmem:[%s6104_s8 + $0x78] sm:$0xff] }
 0x78b   :  { %v4840_v8 = vpop.eup %4839  ;;  %3120 = vmatprep.mubr.f32.mxu0 %v6114_v61  ;;  %3209 = vmatprep.mubr.f32.mxu1 %v6114_v61  ;;  %v3012_v56 = vadd.f32 0.5, %v2996_v15 }
 0x78c   :  { %v3030_v10 = vmul.f32 %v4840_v8, %v3004_v32  ;;  %4237 = vmatpush3.bf16.msra.mxu0 %v4234_v48  ;;  %4269 = vmatpush1.bf16.msra.mxu1 %v4268_v45  ;;  %v4278_v32 = vpack.c.bf16 %v3455_v55, %v3453_v20  ;;  %v3454_v8 = vld [vmem:[%s6104_s8 + $0x70] sm:$0xff]  ;;  %v3460_v48 = vld [vmem:[%s6104_s8 + $0xa0] sm:$0xff] }
 0x78d   :  { %4239 = vmatprep.subr.bf16.mxu0 %v4238_v38  ;;  %4271 = vmatprep.subr.bf16.mxu1 %v4270_v52  ;;  %v4280_v15 = vpack.c.bf16 %v3454_v8, %v3452_v17  ;;  %v4288_v3 = vpack.c.bf16 %v3462_v51, %v3460_v48 }
 0x78e   :  { %3121 = vmatmul.mubr.f32.gmra.mrb[58].mxu0 %v3030_v10  ;;  %3210 = vmatmul.mubr.f32.gmra.mrb[58].mxu1 %v3030_v10  ;;  %v3457_v10 = vld [vmem:[%s6104_s8 + $0x88] sm:$0xff] }
 0x78f   :  { %v4842_v30 = vpop.eup %4841  ;;  %3126 = vmatprep.mubr.f32.mxu0 %v6114_v61  ;;  %3215 = vmatprep.mubr.f32.mxu1 %v6114_v61 }
 0x790   :  { %v3031_v25 = vmul.f32 %v4842_v30, %v3008_v46  ;;  %4241 = vmatpush3.bf16.msra.mxu0 %v4238_v38  ;;  %4273 = vmatpush1.bf16.msra.mxu1 %v4272_v58  ;;  %v3459_v46 = vld [vmem:[%s6104_s8 + $0x98] sm:$0xff] }
 0x791   :  { %4243 = vmatprep.subr.bf16.mxu0 %v4242_v18  ;;  %4275 = vmatprep.subr.bf16.mxu1 %v4274_v19  ;;  %v4282_v30 = vpack.c.bf16 %v3459_v46, %v3457_v10  ;;  %v3467_v38 = vld [vmem:[%s6104_s8 + $0xd8] sm:$0xff] }
 0x792   :  { %3127 = vmatmul.mubr.f32.gmra.mrb[60].mxu0 %v3031_v25  ;;  %3216 = vmatmul.mubr.f32.gmra.mrb[60].mxu1 %v3031_v25  ;;  %v3456_v25 = vld [vmem:[%s6104_s8 + $0x80] sm:$0xff]  ;;  %v4290_v11 = vpack.c.bf16 %v3467_v38, %v3465_v0 }
 0x793   :  { %v4844_v43 = vpop.eup %4843  ;;  %3132 = vmatprep.mubr.f32.mxu0 %v6114_v61  ;;  %3221 = vmatprep.mubr.f32.mxu1 %v6114_v61 }
 0x794   :  { %v3032_v2 = vmul.f32 %v4844_v43, %v3012_v56  ;;  %4245 = vmatpush3.bf16.msra.mxu0 %v4242_v18  ;;  %4277 = vmatpush1.bf16.msra.mxu1 %v4276_v35  ;;  %v3458_v56 = vld [vmem:[%s6104_s8 + $0x90] sm:$0xff]  ;;  %v3461_v43 = vld [vmem:[%s6104_s8 + $0xa8] sm:$0xff]  ;;  %v3464_v18 = vld [vmem:[%s6104_s8 + $0xc0] sm:$0xff] }
 0x795   :  { %4247 = vmatprep.subr.bf16.mxu0 %v4246_v28  ;;  %4279 = vmatprep.subr.bf16.mxu1 %v4278_v32  ;;  %v4284_v42 = vpack.c.bf16 %v3458_v56, %v3456_v25  ;;  %v4292_v24 = vpack.c.bf16 %v3466_v23, %v3464_v18 }
 0x796   :  { %3133 = vmatmul.mubr.f32.gmra.mrb[62].mxu0 %v3032_v2  ;;  %3222 = vmatmul.mubr.f32.gmra.mrb[62].mxu1 %v3032_v2  ;;  %v3463_v2 = vld [vmem:[%s6104_s8 + $0xb8] sm:$0xff] }
 0x797   :  { %3548 = vmatprep.mubr.f32.mxu1 %v6114_v61  ;;  %v4286_v39 = vpack.c.bf16 %v3463_v2, %v3461_v43 }
 0x798   :  { %4249 = vmatpush3.bf16.msra.mxu0 %v4246_v28  ;;  %4281 = vmatpush1.bf16.msra.mxu1 %v4280_v15 }
 0x799   :  { %4251 = vmatprep.subr.bf16.mxu0 %v4250_v41  ;;  %4283 = vmatprep.subr.bf16.mxu1 %v4282_v30 }
 0x79c   :  { %4253 = vmatpush3.bf16.msra.mxu0 %v4250_v41  ;;  %4285 = vmatpush1.bf16.msra.mxu1 %v4284_v42 }
 0x79d   :  { %4255 = vmatprep.subr.bf16.mxu0 %v4254_v50  ;;  %4287 = vmatprep.subr.bf16.mxu1 %v4286_v39 }
 0x7a0   :  { %4257 = vmatpush3.bf16.msra.mxu0 %v4254_v50  ;;  %4289 = vmatpush1.bf16.msra.mxu1 %v4288_v3 }
 0x7a1   :  { %4259 = vmatprep.subr.bf16.mxu0 %v4258_v62  ;;  %4291 = vmatprep.subr.bf16.mxu1 %v4290_v11 }
 0x7a4   :  { %4261 = vmatpush3.bf16.msra.mxu0 %v4258_v62  ;;  %4293 = vmatpush1.bf16.msra.mxu1 %v4292_v24 }
 0x7a5   :  { %4263 = vmatprep.subr.bf16.mxu0 %v4262_v4 }
 0x7a8   :  { %4265 = vmatpush3.bf16.msra.mxu0 %v4262_v4 }
 0x85d   :  { %v3116_v28 = vpop.f32.mrb[56].mxu0  ;;  %v3205_v31 = vpop.f32.mrb[56].mxu1 }
 0x85e   :  { %v4354_v36 = vadd.f32 %v3116_v28, %v5467_v5  ;;  %v3118_v41 = vpop.f32.mrb[57].mxu0  ;;  %v3207_v44 = vpop.f32.mrb[57].mxu1  ;;  %v4418_v54 = vadd.f32 %v3205_v31, %v5474_v12 }
 0x85f   :  { %v4355_v49 = vadd.f32 %v3118_v41, %v5471_v6  ;;  %v4419_v21 = vadd.f32 %v3207_v44, %v5478_v27 }
 0x860   :  { %v3244_v50 = vmul.f32 0.5, %v4354_v36 }
 0x861   :  { %v3245_v57 = vmul.f32 0.5, %v4355_v49  ;;  %v3122_v62 = vpop.f32.mrb[58].mxu0  ;;  %v3211_v63 = vpop.f32.mrb[58].mxu1  ;;  %v3247_v60 = vmul.f32 0.5, %v4419_v21 }
 0x862   :  { %4845 = vtanh.f32 %v3244_v50  ;;  %v4356_v22 = vadd.f32 %v3122_v62, %v5467_v5  ;;  %v3124_v4 = vpop.f32.mrb[59].mxu0  ;;  %v3213_v7 = vpop.f32.mrb[59].mxu1  ;;  %v4420_v33 = vadd.f32 %v3211_v63, %v5474_v12 }
 0x863   :  { %4847 = vtanh.f32 %v3245_v57  ;;  %v4357_v16 = vadd.f32 %v3124_v4, %v5471_v6  ;;  %v4421_v58 = vadd.f32 %v3213_v7, %v5478_v27 }
 0x864   :  { %v3248_v26 = vmul.f32 0.5, %v4356_v22  ;;  %4849 = vtanh.f32 %v4418_v54 }
 0x865   :  { %v3249_v34 = vmul.f32 0.5, %v4357_v16  ;;  %v3128_v40 = vpop.f32.mrb[60].mxu0  ;;  %v3217_v45 = vpop.f32.mrb[60].mxu1  ;;  %v3251_v46 = vmul.f32 0.5, %v4421_v58 }
 0x866   :  { %4851 = vtanh.f32 %v3248_v26  ;;  %v4358_v52 = vadd.f32 %v3128_v40, %v5467_v5  ;;  %v3130_v53 = vpop.f32.mrb[61].mxu0  ;;  %v3219_v29 = vpop.f32.mrb[61].mxu1  ;;  %v4422_v9 = vadd.f32 %v3217_v45, %v5474_v12 }
 0x867   :  { %4853 = vtanh.f32 %v3249_v34  ;;  %v4359_v1 = vadd.f32 %v3130_v53, %v5471_v6  ;;  %v4423_v56 = vadd.f32 %v3219_v29, %v5478_v27 }
 0x868   :  { %v3252_v19 = vmul.f32 0.5, %v4358_v52  ;;  %4855 = vtanh.f32 %v4420_v33 }
 0x869   :  { %v3253_v13 = vmul.f32 0.5, %v4359_v1  ;;  %v3134_v20 = vpop.f32.mrb[62].mxu0  ;;  %v3223_v55 = vpop.f32.mrb[62].mxu1  ;;  %v3255_v3 = vmul.f32 0.5, %v4423_v56  ;;  %v3469_v56 = vld [vmem:[%s6104_s8 + $0xe8] sm:$0xff] }
 0x86a   :  { %4857 = vtanh.f32 %v3252_v19  ;;  %v4360_v35 = vadd.f32 %v3134_v20, %v5467_v5  ;;  %v3136_v32 = vpop.f32.mrb[63].mxu0  ;;  %v3225_v17 = vpop.f32.mrb[63].mxu1  ;;  %v4424_v42 = vadd.f32 %v3223_v55, %v5474_v12 }
 0x86b   :  { %4859 = vtanh.f32 %v3253_v13  ;;  %v4361_v8 = vadd.f32 %v3136_v32, %v5471_v6  ;;  %v4425_v11 = vadd.f32 %v3225_v17, %v5478_v27 }
 0x86c   :  { %v4846_v10 = vpop.eup %4845  ;;  %4861 = vtanh.f32 %v3247_v60  ;;  %v3256_v15 = vmul.f32 0.5, %v4360_v35 }
 0x86d   :  { %v4848_v30 = vpop.eup %4847  ;;  %v3276_v25 = vmul.f32 0.5, %v4846_v10  ;;  %4863 = vtanh.f32 %v4422_v9  ;;  %v3257_v43 = vmul.f32 0.5, %v4361_v8  ;;  %v3259_v50 = vmul.f32 0.5, %v4425_v11 }
 0x86e   :  { %v3277_v2 = vmul.f32 0.5, %v4848_v30  ;;  %4865 = vtanh.f32 %v3256_v15  ;;  %v4850_v5 = vpop.eup %4849 }
 0x86f   :  { %v3292_v39 = vadd.f32 0.5, %v3276_v25  ;;  %4867 = vtanh.f32 %v3257_v43  ;;  %v3471_v43 = vld [vmem:[%s6104_s8 + $0xf8] sm:$0xff] }
 0x870   :  { %v4852_v48 = vpop.eup %4851  ;;  %v3293_v51 = vadd.f32 0.5, %v3277_v2  ;;  %4869 = vtanh.f32 %v3251_v46  ;;  %v4294_v2 = vpack.c.bf16 %v3471_v43, %v3469_v56 }
 0x871   :  { %v4854_v6 = vpop.eup %4853  ;;  %v3312_v0 = vmul.f32 %v4850_v5, %v3292_v39  ;;  %v3280_v38 = vmul.f32 0.5, %v4852_v48  ;;  %4871 = vtanh.f32 %v4424_v42  ;;  %v3468_v42 = vld [vmem:[%s6104_s8 + $0xe0] sm:$0xff]  ;;  %v3470_v5 = vld [vmem:[%s6104_s8 + $0xf0] sm:$0xff] }
 0x872   :  { %v3308_v18 = vmul.f32 %v3293_v51, %v5933_v37  ;;  %v3281_v23 = vmul.f32 0.5, %v4854_v6  ;;  %v4856_v24 = vpop.eup %4855  ;;  %4873 = vtanh.f32 %v3255_v3  ;;  %v4296_v39 = vpack.c.bf16 %v3470_v5, %v3468_v42  ;;  %4295 = vmatprep.subr.bf16.mxu1 %v4294_v2  ;;  %v3663_v48 = vld [vmem:[%s6103_s7] ss:$0 sm:$0xff] }
 0x873   :  { %v3296_v28 = vadd.f32 0.5, %v3280_v38 }
 0x874   :  { %v4858_v31 = vpop.eup %4857  ;;  %v3316_v12 = vadd.f32 %v3312_v0, %v3308_v18  ;;  %v3297_v36 = vadd.f32 0.5, %v3281_v23  ;;  %4297 = vmatpush1.bf16.msra.mxu1 %v4296_v39 }
 0x875   :  { %v4860_v41 = vpop.eup %4859  ;;  %v3313_v44 = vmul.f32 %v4856_v24, %v3296_v28  ;;  %v3284_v49 = vmul.f32 0.5, %v4858_v31 }
 0x876   :  { %v4862_v54 = vpop.eup %4861  ;;  %4875 = vtanh.f32 %v3316_v12  ;;  %v3309_v57 = vmul.f32 %v3297_v36, %v5937_v14  ;;  %v3285_v62 = vmul.f32 0.5, %v4860_v41  ;;  %v3472_v36 = vld [vmem:[%s6105_s9] sm:$0x3]  ;;  %s4987_s9 = smov [#allocation9]  }
 0x877   :  { %v4864_v27 = vpop.eup %4863  ;;  %v3300_v63 = vadd.f32 0.5, %v3284_v49  ;;  %4877 = vtanh.f32 %v3259_v50  ;;  %v3279_v40 = vmul.f32 0.5, %v4862_v54  ;;  %v6115_v41 = vld [vmem:[#allocation13_spill] sm:$0xff]  ;;  %s3586_s0 = sshll.u32 %s4987_s9, 4  ;;  %s3587_s0 = int_to_ptr.vmem [resolvable:$true] %s3586_s0 }
 0x878   :  { %v4866_v37 = vpop.eup %4865  ;;  %v3317_v22 = vadd.f32 %v3313_v44, %v3309_v57  ;;  %v3301_v4 = vadd.f32 0.5, %v3285_v62  ;;  %v6116_v44 = vsub.s32 0, %v6115_v41  ;;  %v6117_v50 = vsub.s32 1, %v6115_v41  ;;  %s4951_s29 = scalar_lea.vmem %s3587_s0, 1024  ;;  %p4956_p11 = scmp.lt.s32.totalorder %s3587_s0, %s3587_s0 }
 0x879   :  { %v4868_v7 = vpop.eup %4867  ;;  %v3314_v16 = vmul.f32 %v4864_v27, %v3300_v63  ;;  %v3288_v21 = vmul.f32 0.5, %v4866_v37  ;;  %v3295_v58 = vadd.f32 0.5, %v3279_v40  ;;  %p4952_p10 = scmp.ne.s32.totalorder %s3587_s0, %s4951_s29  ;;  %p4957_p12 = scmp.lt.s32.totalorder %s4951_s29, %s4951_s29 }
 0x87a   :  { %v4870_v26 = vpop.eup %4869  ;;  %4879 = vtanh.f32 %v3317_v22  ;;  %v3310_v33 = vmul.f32 %v3301_v4, %v5941_v59  ;;  %v3289_v34 = vmul.f32 0.5, %v4868_v7  ;;  %v3477_v49 = vrot.slane %v3472_v36, %v6116_v44 }
 0x87b   :  { %v3304_v45 = vadd.f32 0.5, %v3288_v21  ;;  %v4872_v52 = vpop.eup %4871  ;;  %v3283_v19 = vmul.f32 0.5, %v4870_v26  ;;  %v3481_v54 = vrot.slane %v3472_v36, %v6117_v50  ;;  %p4958_p13 = por %p4957_p12, %p4956_p11 }
 0x87c   :  { %v3318_v53 = vadd.f32 %v3314_v16, %v3310_v33  ;;  %v3305_v14 = vadd.f32 0.5, %v3289_v34  ;;  %v4874_v60 = vpop.eup %4873 }
 0x87d   :  { %v3315_v29 = vmul.f32 %v4872_v52, %v3304_v45  ;;  %v3299_v35 = vadd.f32 0.5, %v3283_v19  ;;  %v3287_v59 = vmul.f32 0.5, %v4874_v60  ;;  %p4959_p0 = pnand %p4958_p13, %p4952_p10 }
 0x87e   :  { %4881 = vtanh.f32 %v3318_v53  ;;  %v3311_v1 = vmul.f32 %v3305_v14, %v5945_v47 }
 0x87f   :  { %v3303_v8 = vadd.f32 0.5, %v3287_v59 }
 0x880   :  { %v4876_v9 = vpop.eup %4875  ;;  %v3319_v13 = vadd.f32 %v3315_v29, %v3311_v1 }
 0x881   :  { %v3324_v20 = vmul.f32 %v4876_v9, %v3295_v58  ;;  %v4878_v55 = vpop.eup %4877 }
 0x882   :  { %4883 = vtanh.f32 %v3319_v13  ;;  %v3291_v10 = vmul.f32 0.5, %v4878_v55 }
 0x883   :  { %3716 = vmatprep.mubr.f32.mxu0 %v3324_v20 }
 0x884   :  { %v4880_v32 = vpop.eup %4879  ;;  %v3307_v30 = vadd.f32 0.5, %v3291_v10 }
 0x885   :  { %v3325_v17 = vmul.f32 %v4880_v32, %v3299_v35 }
 0x887   :  { %3717 = vmatmul.mubr.f32.vlgmr.msra.gmra.mrb[64].mxu0 %v3325_v17 }
 0x888   :  { %v4882_v46 = vpop.eup %4881 }
 0x889   :  { %v3326_v15 = vmul.f32 %v4882_v46, %v3303_v8 }
 0x88b   :  { %3719 = vmatprep.mubr.f32.mxu0 %v3326_v15 }
 0x88c   :  { %v4884_v47 = vpop.eup %4883 }
 0x88d   :  { %v3327_v25 = vmul.f32 %v4884_v47, %v3307_v30 }
 0x88f   :  { %3720 = vmatmul.mubr.f32.gmra.mrb[66].mxu0 %v3327_v25 }
 0x95a   :  { %v3718_v51 = vpop.f32.mrb[64].mxu0 }
 0x95b   :  { %v3417_v6 = vpop.f32.mrb[65].mxu0  ;;  %v3423_v38 = vadd.f32 %v3718_v51, %v3663_v48 }
 0x95c   :  { %v3418_v0 = vadd.f32 %v3663_v48, %v3417_v6 }
 0x95d   :  { %v3437_v11 = vmax.f32 %v3423_v38, 0.0 }
 0x95e   :  { %v3436_v3 = vmax.f32 %v3418_v0, 0.0 }
 0x960   :  { %3549 = vmatmul.mubr.f32.vlgmr.msra.gmra.mrb[64].mxu1 %v3436_v3 }
 0x961   :  { %3554 = vmatprep.mubr.f32.mxu1 %v6114_v61 }
 0x962   :  { %v3721_v18 = vpop.f32.mrb[66].mxu0 }
 0x963   :  { %v3427_v23 = vpop.f32.mrb[67].mxu0  ;;  %v3433_v28 = vadd.f32 %v3721_v18, %v3663_v48 }
 0x964   :  { %v3428_v24 = vadd.f32 %v3663_v48, %v3427_v23  ;;  %3555 = vmatmul.mubr.f32.gmra.mrb[66].mxu1 %v3437_v11 }
 0x965   :  { %3560 = vmatprep.mubr.f32.mxu1 %v6114_v61  ;;  %v3439_v12 = vmax.f32 %v3433_v28, 0.0 }
 0x966   :  { %v3438_v31 = vmax.f32 %v3428_v24, 0.0 }
 0x968   :  { %3561 = vmatmul.mubr.f32.gmra.mrb[68].mxu1 %v3438_v31 }
 0x969   :  { %3566 = vmatprep.mubr.f32.mxu1 %v6114_v61 }
 0x96c   :  { %3567 = vmatmul.mubr.f32.gmra.mrb[70].mxu1 %v3439_v12 }
 0xa33   :  { %v3550_v57 = vpop.f32.mrb[64].mxu1 }
 0xa34   :  { %v3551_v62 = vadd.f32 %v3550_v57, %v3477_v49  ;;  %v3552_v27 = vpop.f32.mrb[65].mxu1 }
 0xa35   :  { %v3553_v63 = vadd.f32 %v3552_v27, %v3481_v54 }
 0xa36   :  { %3573 = vst [vmem:[#allocation9] sm:$0xff] %v3551_v62 }
 0xa37   :  { %3574 = vst [vmem:[#allocation9 + $0x8] sm:$0xff] %v3553_v63  ;;  %v3556_v37 = vpop.f32.mrb[66].mxu1 }
 0xa38   :  { %v3557_v61 = vadd.f32 %v3556_v37, %v3477_v49  ;;  %v3558_v22 = vpop.f32.mrb[67].mxu1 }
 0xa39   :  { %v3559_v4 = vadd.f32 %v3558_v22, %v3481_v54 }
 0xa3a   :  { %3575 = vst [vmem:[#allocation9 + $0x10] sm:$0xff] %v3557_v61 }
 0xa3b   :  { %3576 = vst [vmem:[#allocation9 + $0x18] sm:$0xff] %v3559_v4  ;;  %v3562_v7 = vpop.f32.mrb[68].mxu1 }
 0xa3c   :  { %v3563_v16 = vadd.f32 %v3562_v7, %v3477_v49  ;;  %v3564_v21 = vpop.f32.mrb[69].mxu1 }
 0xa3d   :  { %v3565_v26 = vadd.f32 %v3564_v21, %v3481_v54 }
 0xa3e   :  { %3577 = vst [vmem:[#allocation9 + $0x20] sm:$0xff] %v3563_v16 }
 0xa3f   :  { %3578 = vst [vmem:[#allocation9 + $0x28] sm:$0xff] %v3565_v26  ;;  %v3568_v33 = vpop.f32.mrb[70].mxu1 }
 0xa40   :  { %v3569_v34 = vadd.f32 %v3568_v33, %v3477_v49  ;;  %v3570_v40 = vpop.f32.mrb[71].mxu1 }
 0xa41   :  { %v3571_v45 = vadd.f32 %v3570_v40, %v3481_v54 }
 0xa42   :  { %3579 = vst [vmem:[#allocation9 + $0x30] sm:$0xff] %v3569_v34 }
 0xa43   :  { %3580 = vst [vmem:[#allocation9 + $0x38] sm:$0xff] %v3571_v45 }
 0xa44   :  { %4962 = shalt.err (!%p4959_p0)
}
 0xa45   :  { %s4963_s13 = scalar_lea.hbm %s6106_s10, 1024 }
 0xa46   :  { %p4964_p1 = scmp.ne.s32.totalorder %s6106_s10, %s4963_s13  ;;  %p4967_p2 = scmp.lt.u32.totalorder %s4963_s13, %s6106_s10 }
 0xa48   :  { %p4969_p3 = pnand %p4967_p2, %p4964_p1 }
 0xa4a   :  { %4972 = shalt.err (!%p4969_p3)
}
 0xa4b   :  { %s4988_s15 = smov 256   ;;  %s4989_s16 = smov 16  }
 0xa4c   :  { %3592 = dma.vmem_to_hbm [thread:$0]  %s3587_s0, 1024, %s6106_s10, [#allocation5], %s4988_s15, %s4988_s15, %s4989_s16  }
 0xa4d   :  { %4977 = dma.done.wait [#allocation5], 1024  }
 0xa4e   :  { %4978 = vsyncadd [#allocation5], 4294966272 }
 0xa4f   :  { %3596 = vsyncpa [#allocation4], 1 }
 0xa50   :  { %3597 = vsyncpa [#allocation7], 1 }
 0xa51   :  { %3598 = vsyncpa [#allocation5], 1 }

</bundles_post_ra>
